<compile_context>
chip_gen: v6e
topology: v6e:2x2x1
jax: 0.10.0
libtpu: 0.0.40
codegen_flags: <defaults>
</compile_context>

<pallas_src>
import functools
import math

import jax
import jax.numpy as jnp
from jax import lax
from jax.experimental import pallas as pl
from jax.experimental.pallas import tpu as pltpu


# ---------------------------------------------------------------------------
# Tiled matmul kernel:  y = act(x @ w + b)
# ---------------------------------------------------------------------------

def _round_up(x, m):
    return (x + m - 1) // m * m


def _matmul_kernel(x_ref, w_ref, b_ref, o_ref, acc_ref, *, activation):
    k = pl.program_id(2)

    @pl.when(k == 0)
    def _():
        acc_ref[...] = jnp.zeros_like(acc_ref)

    acc_ref[...] += jnp.dot(x_ref[...], w_ref[...],
                            preferred_element_type=jnp.float32)

    @pl.when(k == pl.num_programs(2) - 1)
    def _():
        y = acc_ref[...] + b_ref[...].astype(jnp.float32)
        if activation == "relu":
            y = jnp.maximum(y, 0.0)
        elif activation == "tanh":
            y = jnp.tanh(y)
        o_ref[...] = y.astype(o_ref.dtype)


def matmul_bias_act(x, w, b, activation=None):
    """act(x @ w + b).  x: (M, K); w: (K, N) (already pre-transposed); b: (N,)."""
    M, K = x.shape
    Kw, N = w.shape
    assert K == Kw and b.shape == (N,)
    out_dtype = x.dtype

    # Lane/sublane-aligned tiles; pad instead of emitting masked partial stores.
    tm = min(256, _round_up(M, 8))
    tn = min(256, _round_up(N, 128))
    tk = min(512, _round_up(K, 128))
    Mp, Kp, Np = _round_up(M, tm), _round_up(K, tk), _round_up(N, tn)

    if (Mp, Kp) != (M, K):
        x = jnp.pad(x, ((0, Mp - M), (0, Kp - K)))
    if (Kp, Np) != (K, N):
        w = jnp.pad(w, ((0, Kp - K), (0, Np - N)))
    b2 = jnp.pad(b, (0, Np - N)).reshape(1, Np)

    grid = (Mp // tm, Np // tn, Kp // tk)

    itemsize = jnp.dtype(out_dtype).itemsize
    cost = pl.CostEstimate(
        flops=2 * M * N * K,
        transcendentals=(M * N if activation == "tanh" else 0),
        bytes_accessed=(M * K + K * N + N + M * N) * itemsize,
    )

    out = pl.pallas_call(
        functools.partial(_matmul_kernel, activation=activation),
        out_shape=jax.ShapeDtypeStruct((Mp, Np), out_dtype),
        grid_spec=pltpu.PrefetchScalarGridSpec(
            num_scalar_prefetch=0,
            grid=grid,
            in_specs=[
                pl.BlockSpec((tm, tk), lambda i, j, k: (i, k)),
                pl.BlockSpec((tk, tn), lambda i, j, k: (k, j)),
                pl.BlockSpec((1, tn), lambda i, j, k: (0, j)),
            ],
            out_specs=pl.BlockSpec((tm, tn), lambda i, j, k: (i, j)),
            scratch_shapes=[pltpu.VMEM((tm, tn), jnp.float32)],
        ),
        compiler_params=pltpu.CompilerParams(
            dimension_semantics=("parallel", "parallel", "arbitrary"),
            vmem_limit_bytes=32 * 1024 * 1024,
        ),
        cost_estimate=cost,
    )(x, w, b2)

    if (Mp, Np) != (M, N):
        out = out[:M, :N]
    return out


def linear_pallas(x, p, activation=None):
    lead = x.shape[:-1]
    m = int(math.prod(lead)) if lead else 1
    y = matmul_bias_act(x.reshape(m, x.shape[-1]), p["w"], p["b"], activation)
    return y.reshape(*lead, p["w"].shape[1])


# ---------------------------------------------------------------------------
# Conv2d(3x3, stride 2, pad 1) + folded inference BatchNorm + ReLU via im2col
# ---------------------------------------------------------------------------

def _im2col_3x3_s2(x_nhwc):
    n, h, w, c = x_nhwc.shape
    ho = (h - 3 + 2) // 2 + 1
    wo = (w - 3 + 2) // 2 + 1
    xp = jnp.pad(x_nhwc, ((0, 0), (1, 1), (1, 1), (0, 0)))
    cols = []
    for kh in range(3):
        for kw in range(3):
            cols.append(xp[:, kh:kh + 2 * ho - 1:2, kw:kw + 2 * wo - 1:2, :])
    patches = jnp.stack(cols, axis=3)                # (N, Ho, Wo, 9, C)
    return patches.reshape(n * ho * wo, 9 * c), (n, ho, wo)


def conv_bn_relu_pallas(x_nhwc, p, eps=1e-5):
    cout = p["w"].shape[-1]
    scale = p["gamma"] / jnp.sqrt(p["rvar"] + eps)
    w = p["w"].reshape(-1, cout) * scale[None, :]            # (9*Cin, Cout)
    b = (p["b"] - p["rmean"]) * scale + p["beta"]
    cols, (n, ho, wo) = _im2col_3x3_s2(x_nhwc)
    y = matmul_bias_act(cols, w, b, activation="relu")
    return y.reshape(n, ho, wo, cout)


# ---------------------------------------------------------------------------
# GRU: big MXU matmul for the input projection + Pallas recurrence kernel
# ---------------------------------------------------------------------------

def _sigmoid(x):
    return 1.0 / (1.0 + jnp.exp(-x))


def _gru_kernel(gxr_ref, gxz_ref, gxn_ref,
                whr_ref, whz_ref, whn_ref,
                bhr_ref, bhz_ref, bhn_ref,
                h_out_ref, h_ref):
    t = pl.program_id(0)

    @pl.when(t == 0)
    def _():
        h_ref[...] = jnp.zeros_like(h_ref)

    h = h_ref[...]
    hr = jnp.dot(h, whr_ref[...], preferred_element_type=jnp.float32) + bhr_ref[...]
    hz = jnp.dot(h, whz_ref[...], preferred_element_type=jnp.float32) + bhz_ref[...]
    hn = jnp.dot(h, whn_ref[...], preferred_element_type=jnp.float32) + bhn_ref[...]
    r = _sigmoid(gxr_ref[0].astype(jnp.float32) + hr)
    z = _sigmoid(gxz_ref[0].astype(jnp.float32) + hz)
    n = jnp.tanh(gxn_ref[0].astype(jnp.float32) + r * hn)
    h_new = (1.0 - z) * n + z * h
    h_ref[...] = h_new

    @pl.when(t == pl.num_programs(0) - 1)
    def _():
        h_out_ref[...] = h_new.astype(h_out_ref.dtype)


def gru_forward_pallas(x, p):
    """Single-layer, batch_first GRU; returns the final hidden state (N, H)."""
    n, t, d = x.shape
    hdim = p["w_hr_t"].shape[0]
    # Input projection for all timesteps in one lane-dense MXU matmul.
    gx = matmul_bias_act(x.reshape(n * t, d), p["w_ih_t"], p["b_ih"])
    gx = gx.reshape(n, t, 3 * hdim).transpose(1, 0, 2)       # (T, N, 3H)
    gxr = gx[..., :hdim]
    gxz = gx[..., hdim:2 * hdim]
    gxn = gx[..., 2 * hdim:]

    gate_spec = pl.BlockSpec((1, n, hdim), lambda i: (i, 0, 0))
    w_spec = pl.BlockSpec((hdim, hdim), lambda i: (0, 0))
    b_spec = pl.BlockSpec((1, hdim), lambda i: (0, 0))

    return pl.pallas_call(
        _gru_kernel,
        out_shape=jax.ShapeDtypeStruct((n, hdim), x.dtype),
        grid_spec=pltpu.PrefetchScalarGridSpec(
            num_scalar_prefetch=0,
            grid=(t,),
            in_specs=[gate_spec, gate_spec, gate_spec,
                      w_spec, w_spec, w_spec,
                      b_spec, b_spec, b_spec],
            out_specs=pl.BlockSpec((n, hdim), lambda i: (0, 0)),
            scratch_shapes=[pltpu.VMEM((n, hdim), jnp.float32)],
        ),
        compiler_params=pltpu.CompilerParams(
            dimension_semantics=("arbitrary",)),
    )(gxr, gxz, gxn,
      p["w_hr_t"], p["w_hz_t"], p["w_hn_t"],
      p["b_hr"].reshape(1, hdim), p["b_hz"].reshape(1, hdim),
      p["b_hn"].reshape(1, hdim))


# ---------------------------------------------------------------------------
# ReferenceEncoder / EDM forward (Pallas)
# ---------------------------------------------------------------------------

def reference_encoder_forward(params, inputs, n_mel_channels):
    n = inputs.shape[0]
    x = inputs.reshape(n, -1, n_mel_channels, 1)             # NHWC, C=1
    for layer in params["convs"]:
        x = conv_bn_relu_pallas(x, layer)
    n_, t, mo, c = x.shape
    # Match PyTorch's (N, T, C*Mo) flattening order.
    x = jnp.transpose(x, (0, 1, 3, 2)).reshape(n_, t, c * mo)
    h = gru_forward_pallas(x, params["gru"])
    h = linear_pallas(h, params["fc1"], activation="relu")
    h = linear_pallas(h, params["fc2"], activation="relu")
    h = linear_pallas(h, params["fc3"], activation="tanh")
    return h


def edm_forward(params, x, n_mel_channels):
    s1 = reference_encoder_forward(params["enc1"], x, n_mel_channels)
    s2 = reference_encoder_forward(params["enc2"], x, n_mel_channels)
    pred1 = linear_pallas(s1, params["cls1"])
    pred2 = linear_pallas(s2, params["cls2"])
    pred2_adv = linear_pallas(s1, params["adv"])  # RevGrad forward == identity
    return s1, s2, pred1, pred2, pred2_adv


# ---------------------------------------------------------------------------
# Pure-JAX reference (for correctness checking only)
# ---------------------------------------------------------------------------

def _ref_conv_bn_relu(x, p, eps=1e-5):
    scale = p["gamma"] / jnp.sqrt(p["rvar"] + eps)
    y = lax.conv_general_dilated(
        x, p["w"], window_strides=(2, 2), padding=((1, 1), (1, 1)),
        dimension_numbers=("NHWC", "HWIO", "NHWC"))
    y = (y + p["b"] - p["rmean"]) * scale + p["beta"]
    return jnp.maximum(y, 0.0)


def _ref_gru(x, p):
    n, t, d = x.shape
    hdim = p["w_hr_t"].shape[0]
    gx = x @ p["w_ih_t"] + p["b_ih"]

    def step(h, gxt):
        r = _sigmoid(gxt[:, :hdim] + h @ p["w_hr_t"] + p["b_hr"])
        z = _sigmoid(gxt[:, hdim:2 * hdim] + h @ p["w_hz_t"] + p["b_hz"])
        nn = jnp.tanh(gxt[:, 2 * hdim:] + r * (h @ p["w_hn_t"] + p["b_hn"]))
        return (1.0 - z) * nn + z * h, None

    h0 = jnp.zeros((n, hdim), x.dtype)
    h, _ = lax.scan(step, h0, jnp.transpose(gx, (1, 0, 2)))
    return h


def _ref_reference_encoder(params, inputs, n_mel_channels):
    n = inputs.shape[0]
    x = inputs.reshape(n, -1, n_mel_channels, 1)
    for layer in params["convs"]:
        x = _ref_conv_bn_relu(x, layer)
    n_, t, mo, c = x.shape
    x = jnp.transpose(x, (0, 1, 3, 2)).reshape(n_, t, c * mo)
    h = _ref_gru(x, params["gru"])
    h = jnp.maximum(h @ params["fc1"]["w"] + params["fc1"]["b"], 0.0)
    h = jnp.maximum(h @ params["fc2"]["w"] + params["fc2"]["b"], 0.0)
    h = jnp.tanh(h @ params["fc3"]["w"] + params["fc3"]["b"])
    return h


def edm_forward_ref(params, x, n_mel_channels):
    s1 = _ref_reference_encoder(params["enc1"], x, n_mel_channels)
    s2 = _ref_reference_encoder(params["enc2"], x, n_mel_channels)
    pred1 = s1 @ params["cls1"]["w"] + params["cls1"]["b"]
    pred2 = s2 @ params["cls2"]["w"] + params["cls2"]["b"]
    pred2_adv = s1 @ params["adv"]["w"] + params["adv"]["b"]
    return s1, s2, pred1, pred2, pred2_adv


# ---------------------------------------------------------------------------
# Parameter initialization (weights stored pre-transposed: (in, out))
# ---------------------------------------------------------------------------

def _uniform(key, shape, bound):
    return jax.random.uniform(key, shape, dtype=jnp.float32,
                              minval=-bound, maxval=bound)


def init_linear(key, in_dim, out_dim):
    kw, kb = jax.random.split(key)
    bound = 1.0 / math.sqrt(in_dim)
    return {"w": _uniform(kw, (in_dim, out_dim), bound),
            "b": _uniform(kb, (out_dim,), bound)}


def init_conv_bn(key, cin, cout):
    kw, kb = jax.random.split(key)
    bound = 1.0 / math.sqrt(cin * 9)
    return {"w": _uniform(kw, (3, 3, cin, cout), bound),      # HWIO
            "b": _uniform(kb, (cout,), bound),
            "gamma": jnp.ones((cout,), jnp.float32),
            "beta": jnp.zeros((cout,), jnp.float32),
            "rmean": jnp.zeros((cout,), jnp.float32),
            "rvar": jnp.ones((cout,), jnp.float32)}


def init_gru(key, in_dim, hdim):
    ks = jax.random.split(key, 8)
    bound = 1.0 / math.sqrt(hdim)
    return {"w_ih_t": _uniform(ks[0], (in_dim, 3 * hdim), bound),
            "b_ih": _uniform(ks[1], (3 * hdim,), bound),
            "w_hr_t": _uniform(ks[2], (hdim, hdim), bound),
            "w_hz_t": _uniform(ks[3], (hdim, hdim), bound),
            "w_hn_t": _uniform(ks[4], (hdim, hdim), bound),
            "b_hr": _uniform(ks[5], (hdim,), bound),
            "b_hz": _uniform(ks[6], (hdim,), bound),
            "b_hn": _uniform(ks[7], (hdim,), bound)}


def _conv_out_len(length, n_convs):
    for _ in range(n_convs):
        length = (length - 3 + 2) // 2 + 1
    return length


def init_reference_encoder(key, hp):
    kconv, kgru, k1, k2, k3 = jax.random.split(key, 5)
    filters = [1] + list(hp["ref_enc_filters"])
    nconv = len(hp["ref_enc_filters"])
    convs = [init_conv_bn(k, filters[i], filters[i + 1])
             for i, k in enumerate(jax.random.split(kconv, nconv))]
    out_ch = _conv_out_len(hp["n_mel_channels"], nconv)
    e = hp["feature_embedding_dim"]
    gru = init_gru(kgru, hp["ref_enc_filters"][-1] * out_ch, e // 2)
    return {"convs": convs, "gru": gru,
            "fc1": init_linear(k1, e // 2, e),
            "fc2": init_linear(k2, e, e),
            "fc3": init_linear(k3, e, e)}


def init_edm(key, hp):
    k1, k2, k3, k4, k5 = jax.random.split(key, 5)
    e = hp["feature_embedding_dim"]
    return {"enc1": init_reference_encoder(k1, hp),
            "enc2": init_reference_encoder(k2, hp),
            "cls1": init_linear(k3, e, hp["n_gender"]),
            "cls2": init_linear(k4, e, hp["n_intonation"]),
            "adv": init_linear(k5, e, hp["n_intonation"])}


# ---------------------------------------------------------------------------

if __name__ == "__main__":
    hp = dict(n_mel_channels=32,
              ref_enc_filters=[32, 32, 64],
              feature_embedding_dim=32,
              n_gender=2,
              n_intonation=4)

    key = jax.random.PRNGKey(0)
    kparams, kx = jax.random.split(key)
    params = init_edm(kparams, hp)

    batch, ty = 2, 64
    x = jax.random.normal(kx, (batch, ty, hp["n_mel_channels"]), jnp.float32)

    fwd = jax.jit(functools.partial(edm_forward,
                                    n_mel_channels=hp["n_mel_channels"]))
    outs = jax.block_until_ready(fwd(params, x))

    refs = jax.block_until_ready(
        edm_forward_ref(params, x, hp["n_mel_channels"]))

    names = ("style1_emb", "style2_emb", "pred_style1",
             "pred_style2", "pred_style2_adv")
    expected_shapes = ((batch, hp["feature_embedding_dim"]),
                       (batch, hp["feature_embedding_dim"]),
                       (batch, hp["n_gender"]),
                       (batch, hp["n_intonation"]),
                       (batch, hp["n_intonation"]))
    for name, shape, o, r in zip(names, expected_shapes, outs, refs):
        assert o.shape == shape, (name, o.shape, shape)
        assert jnp.allclose(o, r, atol=2e-3, rtol=2e-3), (
            name, float(jnp.max(jnp.abs(o - r))))

    print("KERNEL_OK")
</pallas_src>

<mosaic_0001>
module attributes {stable_mosaic.version = 11 : i64} {
  func.func @_matmul_kernel(%arg0: i32, %arg1: i32, %arg2: i32, %arg3: memref<256x128xf32, #tpu.memory_space<vmem>>, %arg4: memref<128x128xf32, #tpu.memory_space<vmem>>, %arg5: memref<1x128xf32, #tpu.memory_space<vmem>>, %arg6: memref<256x128xf32, #tpu.memory_space<vmem>>, %arg7: memref<256x128xf32, #tpu.memory_space<vmem>>) attributes {dimension_semantics = [#tpu.dimension_semantics<parallel>, #tpu.dimension_semantics<parallel>, #tpu.dimension_semantics<arbitrary>], iteration_bounds = array<i64: 4, 1, 1>, scalar_prefetch = 0 : i64, scratch_operands = 1 : i64, tpu.core_type = #tpu.core_type<tc>, window_params = [{transform_indices = @transform_0, window_bounds = array<i64: 256, 128>}, {transform_indices = @transform_1, window_bounds = array<i64: 128, 128>}, {transform_indices = @transform_2, window_bounds = array<i64: 1, 128>}, {transform_indices = @transform_3, window_bounds = array<i64: 256, 128>}]} {
    %c0_i32 = arith.constant 0 : i32
    %0 = arith.cmpi eq, %arg2, %c0_i32 : i32
    %1 = arith.extui %0 : i1 to i32
    %c0_i32_0 = arith.constant 0 : i32
    %2 = arith.cmpi ne, %1, %c0_i32_0 : i32
    scf.if %2 {
      %cst_10 = arith.constant 0.000000e+00 : f32
      %12 = vector.broadcast %cst_10 : f32 to vector<256x128xf32>
      %c0_11 = arith.constant 0 : index
      %c0_12 = arith.constant 0 : index
      %13 = vector.load %arg7[%c0_11, %c0_12] : memref<256x128xf32, #tpu.memory_space<vmem>>, vector<256x128xf32>
      tpu.vector_store %arg7[%c0_11, %c0_12], %12 {strides = array<i32>} : memref<256x128xf32, #tpu.memory_space<vmem>>, vector<256x128xf32>,
    } else {
    }
    %c0 = arith.constant 0 : index
    %c0_1 = arith.constant 0 : index
    %3 = vector.load %arg7[%c0, %c0_1] : memref<256x128xf32, #tpu.memory_space<vmem>>, vector<256x128xf32>
    %c0_2 = arith.constant 0 : index
    %c0_3 = arith.constant 0 : index
    %4 = vector.load %arg3[%c0_2, %c0_3] : memref<256x128xf32, #tpu.memory_space<vmem>>, vector<256x128xf32>
    %c0_4 = arith.constant 0 : index
    %c0_5 = arith.constant 0 : index
    %5 = vector.load %arg4[%c0_4, %c0_5] : memref<128x128xf32, #tpu.memory_space<vmem>>, vector<128x128xf32>
    %cst = arith.constant dense<0.000000e+00> : vector<256x128xf32>
    %6 = tpu.matmul %4, %5, %cst {dimension_numbers = #tpu.dot_dimension_numbers<[1], [0], [0], [1], [0, 0, 1, 1], [], []>} : vector<256x128xf32>, vector<128x128xf32>, vector<256x128xf32> -> vector<256x128xf32>
    %7 = arith.addf %3, %6 : vector<256x128xf32>
    %c0_6 = arith.constant 0 : index
    %c0_7 = arith.constant 0 : index
    %8 = vector.load %arg7[%c0_6, %c0_7] : memref<256x128xf32, #tpu.memory_space<vmem>>, vector<256x128xf32>
    tpu.vector_store %arg7[%c0_6, %c0_7], %7 {strides = array<i32>} : memref<256x128xf32, #tpu.memory_space<vmem>>, vector<256x128xf32>,
    %c0_i32_8 = arith.constant 0 : i32
    %9 = arith.cmpi eq, %arg2, %c0_i32_8 : i32
    %10 = arith.extui %9 : i1 to i32
    %c0_i32_9 = arith.constant 0 : i32
    %11 = arith.cmpi ne, %10, %c0_i32_9 : i32
    scf.if %11 {
      %c0_10 = arith.constant 0 : index
      %c0_11 = arith.constant 0 : index
      %12 = vector.load %arg7[%c0_10, %c0_11] : memref<256x128xf32, #tpu.memory_space<vmem>>, vector<256x128xf32>
      %c0_12 = arith.constant 0 : index
      %c0_13 = arith.constant 0 : index
      %13 = vector.load %arg5[%c0_12, %c0_13] : memref<1x128xf32, #tpu.memory_space<vmem>>, vector<1x128xf32>
      %14 = vector.broadcast %13 : vector<1x128xf32> to vector<256x128xf32>
      %15 = arith.addf %12, %14 : vector<256x128xf32>
      %cst_14 = arith.constant 0.000000e+00 : f32
      %16 = vector.broadcast %cst_14 : f32 to vector<256x128xf32>
      %17 = arith.maximumf %15, %16 : vector<256x128xf32>
      %c0_15 = arith.constant 0 : index
      %c0_16 = arith.constant 0 : index
      %18 = vector.load %arg6[%c0_15, %c0_16] : memref<256x128xf32, #tpu.memory_space<vmem>>, vector<256x128xf32>
      tpu.vector_store %arg6[%c0_15, %c0_16], %17 {strides = array<i32>} : memref<256x128xf32, #tpu.memory_space<vmem>>, vector<256x128xf32>,
    } else {
    }
    return
  }
  func.func @transform_0(%arg0: i32, %arg1: i32, %arg2: i32) -> (i32, i32) {
    %c0_i32 = arith.constant 0 : i32
    return %arg0, %arg2 : i32, i32
  }
  func.func @transform_1(%arg0: i32, %arg1: i32, %arg2: i32) -> (i32, i32) {
    %c0_i32 = arith.constant 0 : i32
    return %arg2, %arg1 : i32, i32
  }
  func.func @transform_2(%arg0: i32, %arg1: i32, %arg2: i32) -> (i32, i32) {
    %c0_i32 = arith.constant 0 : i32
    %c0_i32_0 = arith.constant 0 : i32
    return %c0_i32, %arg1 : i32, i32
  }
  func.func @transform_3(%arg0: i32, %arg1: i32, %arg2: i32) -> (i32, i32) {
    %c0_i32 = arith.constant 0 : i32
    return %arg0, %arg1 : i32, i32
  }
}

module attributes {stable_mosaic.version = 11 : i64} {
  func.func @_matmul_kernel(%arg0: i32, %arg1: i32, %arg2: i32, %arg3: memref<256x384xf32, #tpu.memory_space<vmem>>, %arg4: memref<384x128xf32, #tpu.memory_space<vmem>>, %arg5: memref<1x128xf32, #tpu.memory_space<vmem>>, %arg6: memref<256x128xf32, #tpu.memory_space<vmem>>, %arg7: memref<256x128xf32, #tpu.memory_space<vmem>>) attributes {dimension_semantics = [#tpu.dimension_semantics<parallel>, #tpu.dimension_semantics<parallel>, #tpu.dimension_semantics<arbitrary>], iteration_bounds = array<i64: 1, 1, 1>, scalar_prefetch = 0 : i64, scratch_operands = 1 : i64, tpu.core_type = #tpu.core_type<tc>, window_params = [{transform_indices = @transform_0, window_bounds = array<i64: 256, 384>}, {transform_indices = @transform_1, window_bounds = array<i64: 384, 128>}, {transform_indices = @transform_2, window_bounds = array<i64: 1, 128>}, {transform_indices = @transform_3, window_bounds = array<i64: 256, 128>}]} {
    %c0_i32 = arith.constant 0 : i32
    %0 = arith.cmpi eq, %arg2, %c0_i32 : i32
    %1 = arith.extui %0 : i1 to i32
    %c0_i32_0 = arith.constant 0 : i32
    %2 = arith.cmpi ne, %1, %c0_i32_0 : i32
    scf.if %2 {
      %cst_10 = arith.constant 0.000000e+00 : f32
      %12 = vector.broadcast %cst_10 : f32 to vector<256x128xf32>
      %c0_11 = arith.constant 0 : index
      %c0_12 = arith.constant 0 : index
      %13 = vector.load %arg7[%c0_11, %c0_12] : memref<256x128xf32, #tpu.memory_space<vmem>>, vector<256x128xf32>
      tpu.vector_store %arg7[%c0_11, %c0_12], %12 {strides = array<i32>} : memref<256x128xf32, #tpu.memory_space<vmem>>, vector<256x128xf32>,
    } else {
    }
    %c0 = arith.constant 0 : index
    %c0_1 = arith.constant 0 : index
    %3 = vector.load %arg7[%c0, %c0_1] : memref<256x128xf32, #tpu.memory_space<vmem>>, vector<256x128xf32>
    %c0_2 = arith.constant 0 : index
    %c0_3 = arith.constant 0 : index
    %4 = vector.load %arg3[%c0_2, %c0_3] : memref<256x384xf32, #tpu.memory_space<vmem>>, vector<256x384xf32>
    %c0_4 = arith.constant 0 : index
    %c0_5 = arith.constant 0 : index
    %5 = vector.load %arg4[%c0_4, %c0_5] : memref<384x128xf32, #tpu.memory_space<vmem>>, vector<384x128xf32>
    %cst = arith.constant dense<0.000000e+00> : vector<256x128xf32>
    %6 = tpu.matmul %4, %5, %cst {dimension_numbers = #tpu.dot_dimension_numbers<[1], [0], [0], [1], [0, 0, 1, 1], [], []>} : vector<256x384xf32>, vector<384x128xf32>, vector<256x128xf32> -> vector<256x128xf32>
    %7 = arith.addf %3, %6 : vector<256x128xf32>
    %c0_6 = arith.constant 0 : index
    %c0_7 = arith.constant 0 : index
    %8 = vector.load %arg7[%c0_6, %c0_7] : memref<256x128xf32, #tpu.memory_space<vmem>>, vector<256x128xf32>
    tpu.vector_store %arg7[%c0_6, %c0_7], %7 {strides = array<i32>} : memref<256x128xf32, #tpu.memory_space<vmem>>, vector<256x128xf32>,
    %c0_i32_8 = arith.constant 0 : i32
    %9 = arith.cmpi eq, %arg2, %c0_i32_8 : i32
    %10 = arith.extui %9 : i1 to i32
    %c0_i32_9 = arith.constant 0 : i32
    %11 = arith.cmpi ne, %10, %c0_i32_9 : i32
    scf.if %11 {
      %c0_10 = arith.constant 0 : index
      %c0_11 = arith.constant 0 : index
      %12 = vector.load %arg7[%c0_10, %c0_11] : memref<256x128xf32, #tpu.memory_space<vmem>>, vector<256x128xf32>
      %c0_12 = arith.constant 0 : index
      %c0_13 = arith.constant 0 : index
      %13 = vector.load %arg5[%c0_12, %c0_13] : memref<1x128xf32, #tpu.memory_space<vmem>>, vector<1x128xf32>
      %14 = vector.broadcast %13 : vector<1x128xf32> to vector<256x128xf32>
      %15 = arith.addf %12, %14 : vector<256x128xf32>
      %cst_14 = arith.constant 0.000000e+00 : f32
      %16 = vector.broadcast %cst_14 : f32 to vector<256x128xf32>
      %17 = arith.maximumf %15, %16 : vector<256x128xf32>
      %c0_15 = arith.constant 0 : index
      %c0_16 = arith.constant 0 : index
      %18 = vector.load %arg6[%c0_15, %c0_16] : memref<256x128xf32, #tpu.memory_space<vmem>>, vector<256x128xf32>
      tpu.vector_store %arg6[%c0_15, %c0_16], %17 {strides = array<i32>} : memref<256x128xf32, #tpu.memory_space<vmem>>, vector<256x128xf32>,
    } else {
    }
    return
  }
  func.func @transform_0(%arg0: i32, %arg1: i32, %arg2: i32) -> (i32, i32) {
    %c0_i32 = arith.constant 0 : i32
    return %arg0, %arg2 : i32, i32
  }
  func.func @transform_1(%arg0: i32, %arg1: i32, %arg2: i32) -> (i32, i32) {
    %c0_i32 = arith.constant 0 : i32
    return %arg2, %arg1 : i32, i32
  }
  func.func @transform_2(%arg0: i32, %arg1: i32, %arg2: i32) -> (i32, i32) {
    %c0_i32 = arith.constant 0 : i32
    %c0_i32_0 = arith.constant 0 : i32
    return %c0_i32, %arg1 : i32, i32
  }
  func.func @transform_3(%arg0: i32, %arg1: i32, %arg2: i32) -> (i32, i32) {
    %c0_i32 = arith.constant 0 : i32
    return %arg0, %arg1 : i32, i32
  }
}

module attributes {stable_mosaic.version = 11 : i64} {
  func.func @_matmul_kernel(%arg0: i32, %arg1: i32, %arg2: i32, %arg3: memref<64x384xf32, #tpu.memory_space<vmem>>, %arg4: memref<384x128xf32, #tpu.memory_space<vmem>>, %arg5: memref<1x128xf32, #tpu.memory_space<vmem>>, %arg6: memref<64x128xf32, #tpu.memory_space<vmem>>, %arg7: memref<64x128xf32, #tpu.memory_space<vmem>>) attributes {dimension_semantics = [#tpu.dimension_semantics<parallel>, #tpu.dimension_semantics<parallel>, #tpu.dimension_semantics<arbitrary>], iteration_bounds = array<i64: 1, 1, 1>, scalar_prefetch = 0 : i64, scratch_operands = 1 : i64, tpu.core_type = #tpu.core_type<tc>, window_params = [{transform_indices = @transform_0, window_bounds = array<i64: 64, 384>}, {transform_indices = @transform_1, window_bounds = array<i64: 384, 128>}, {transform_indices = @transform_2, window_bounds = array<i64: 1, 128>}, {transform_indices = @transform_3, window_bounds = array<i64: 64, 128>}]} {
    %c0_i32 = arith.constant 0 : i32
    %0 = arith.cmpi eq, %arg2, %c0_i32 : i32
    %1 = arith.extui %0 : i1 to i32
    %c0_i32_0 = arith.constant 0 : i32
    %2 = arith.cmpi ne, %1, %c0_i32_0 : i32
    scf.if %2 {
      %cst_10 = arith.constant 0.000000e+00 : f32
      %12 = vector.broadcast %cst_10 : f32 to vector<64x128xf32>
      %c0_11 = arith.constant 0 : index
      %c0_12 = arith.constant 0 : index
      %13 = vector.load %arg7[%c0_11, %c0_12] : memref<64x128xf32, #tpu.memory_space<vmem>>, vector<64x128xf32>
      tpu.vector_store %arg7[%c0_11, %c0_12], %12 {strides = array<i32>} : memref<64x128xf32, #tpu.memory_space<vmem>>, vector<64x128xf32>,
    } else {
    }
    %c0 = arith.constant 0 : index
    %c0_1 = arith.constant 0 : index
    %3 = vector.load %arg7[%c0, %c0_1] : memref<64x128xf32, #tpu.memory_space<vmem>>, vector<64x128xf32>
    %c0_2 = arith.constant 0 : index
    %c0_3 = arith.constant 0 : index
    %4 = vector.load %arg3[%c0_2, %c0_3] : memref<64x384xf32, #tpu.memory_space<vmem>>, vector<64x384xf32>
    %c0_4 = arith.constant 0 : index
    %c0_5 = arith.constant 0 : index
    %5 = vector.load %arg4[%c0_4, %c0_5] : memref<384x128xf32, #tpu.memory_space<vmem>>, vector<384x128xf32>
    %cst = arith.constant dense<0.000000e+00> : vector<64x128xf32>
    %6 = tpu.matmul %4, %5, %cst {dimension_numbers = #tpu.dot_dimension_numbers<[1], [0], [0], [1], [0, 0, 1, 1], [], []>} : vector<64x384xf32>, vector<384x128xf32>, vector<64x128xf32> -> vector<64x128xf32>
    %7 = arith.addf %3, %6 : vector<64x128xf32>
    %c0_6 = arith.constant 0 : index
    %c0_7 = arith.constant 0 : index
    %8 = vector.load %arg7[%c0_6, %c0_7] : memref<64x128xf32, #tpu.memory_space<vmem>>, vector<64x128xf32>
    tpu.vector_store %arg7[%c0_6, %c0_7], %7 {strides = array<i32>} : memref<64x128xf32, #tpu.memory_space<vmem>>, vector<64x128xf32>,
    %c0_i32_8 = arith.constant 0 : i32
    %9 = arith.cmpi eq, %arg2, %c0_i32_8 : i32
    %10 = arith.extui %9 : i1 to i32
    %c0_i32_9 = arith.constant 0 : i32
    %11 = arith.cmpi ne, %10, %c0_i32_9 : i32
    scf.if %11 {
      %c0_10 = arith.constant 0 : index
      %c0_11 = arith.constant 0 : index
      %12 = vector.load %arg7[%c0_10, %c0_11] : memref<64x128xf32, #tpu.memory_space<vmem>>, vector<64x128xf32>
      %c0_12 = arith.constant 0 : index
      %c0_13 = arith.constant 0 : index
      %13 = vector.load %arg5[%c0_12, %c0_13] : memref<1x128xf32, #tpu.memory_space<vmem>>, vector<1x128xf32>
      %14 = vector.broadcast %13 : vector<1x128xf32> to vector<64x128xf32>
      %15 = arith.addf %12, %14 : vector<64x128xf32>
      %cst_14 = arith.constant 0.000000e+00 : f32
      %16 = vector.broadcast %cst_14 : f32 to vector<64x128xf32>
      %17 = arith.maximumf %15, %16 : vector<64x128xf32>
      %c0_15 = arith.constant 0 : index
      %c0_16 = arith.constant 0 : index
      %18 = vector.load %arg6[%c0_15, %c0_16] : memref<64x128xf32, #tpu.memory_space<vmem>>, vector<64x128xf32>
      tpu.vector_store %arg6[%c0_15, %c0_16], %17 {strides = array<i32>} : memref<64x128xf32, #tpu.memory_space<vmem>>, vector<64x128xf32>,
    } else {
    }
    return
  }
  func.func @transform_0(%arg0: i32, %arg1: i32, %arg2: i32) -> (i32, i32) {
    %c0_i32 = arith.constant 0 : i32
    return %arg0, %arg2 : i32, i32
  }
  func.func @transform_1(%arg0: i32, %arg1: i32, %arg2: i32) -> (i32, i32) {
    %c0_i32 = arith.constant 0 : i32
    return %arg2, %arg1 : i32, i32
  }
  func.func @transform_2(%arg0: i32, %arg1: i32, %arg2: i32) -> (i32, i32) {
    %c0_i32 = arith.constant 0 : i32
    %c0_i32_0 = arith.constant 0 : i32
    return %c0_i32, %arg1 : i32, i32
  }
  func.func @transform_3(%arg0: i32, %arg1: i32, %arg2: i32) -> (i32, i32) {
    %c0_i32 = arith.constant 0 : i32
    return %arg0, %arg1 : i32, i32
  }
}

module attributes {stable_mosaic.version = 11 : i64} {
  func.func @_matmul_kernel(%arg0: i32, %arg1: i32, %arg2: i32, %arg3: memref<16x256xf32, #tpu.memory_space<vmem>>, %arg4: memref<256x128xf32, #tpu.memory_space<vmem>>, %arg5: memref<1x128xf32, #tpu.memory_space<vmem>>, %arg6: memref<16x128xf32, #tpu.memory_space<vmem>>, %arg7: memref<16x128xf32, #tpu.memory_space<vmem>>) attributes {dimension_semantics = [#tpu.dimension_semantics<parallel>, #tpu.dimension_semantics<parallel>, #tpu.dimension_semantics<arbitrary>], iteration_bounds = array<i64: 1, 1, 1>, scalar_prefetch = 0 : i64, scratch_operands = 1 : i64, tpu.core_type = #tpu.core_type<tc>, window_params = [{transform_indices = @transform_0, window_bounds = array<i64: 16, 256>}, {transform_indices = @transform_1, window_bounds = array<i64: 256, 128>}, {transform_indices = @transform_2, window_bounds = array<i64: 1, 128>}, {transform_indices = @transform_3, window_bounds = array<i64: 16, 128>}]} {
    %c0_i32 = arith.constant 0 : i32
    %0 = arith.cmpi eq, %arg2, %c0_i32 : i32
    %1 = arith.extui %0 : i1 to i32
    %c0_i32_0 = arith.constant 0 : i32
    %2 = arith.cmpi ne, %1, %c0_i32_0 : i32
    scf.if %2 {
      %cst_10 = arith.constant 0.000000e+00 : f32
      %12 = vector.broadcast %cst_10 : f32 to vector<16x128xf32>
      %c0_11 = arith.constant 0 : index
      %c0_12 = arith.constant 0 : index
      %13 = vector.load %arg7[%c0_11, %c0_12] : memref<16x128xf32, #tpu.memory_space<vmem>>, vector<16x128xf32>
      tpu.vector_store %arg7[%c0_11, %c0_12], %12 {strides = array<i32>} : memref<16x128xf32, #tpu.memory_space<vmem>>, vector<16x128xf32>,
    } else {
    }
    %c0 = arith.constant 0 : index
    %c0_1 = arith.constant 0 : index
    %3 = vector.load %arg7[%c0, %c0_1] : memref<16x128xf32, #tpu.memory_space<vmem>>, vector<16x128xf32>
    %c0_2 = arith.constant 0 : index
    %c0_3 = arith.constant 0 : index
    %4 = vector.load %arg3[%c0_2, %c0_3] : memref<16x256xf32, #tpu.memory_space<vmem>>, vector<16x256xf32>
    %c0_4 = arith.constant 0 : index
    %c0_5 = arith.constant 0 : index
    %5 = vector.load %arg4[%c0_4, %c0_5] : memref<256x128xf32, #tpu.memory_space<vmem>>, vector<256x128xf32>
    %cst = arith.constant dense<0.000000e+00> : vector<16x128xf32>
    %6 = tpu.matmul %4, %5, %cst {dimension_numbers = #tpu.dot_dimension_numbers<[1], [0], [0], [1], [0, 0, 1, 1], [], []>} : vector<16x256xf32>, vector<256x128xf32>, vector<16x128xf32> -> vector<16x128xf32>
    %7 = arith.addf %3, %6 : vector<16x128xf32>
    %c0_6 = arith.constant 0 : index
    %c0_7 = arith.constant 0 : index
    %8 = vector.load %arg7[%c0_6, %c0_7] : memref<16x128xf32, #tpu.memory_space<vmem>>, vector<16x128xf32>
    tpu.vector_store %arg7[%c0_6, %c0_7], %7 {strides = array<i32>} : memref<16x128xf32, #tpu.memory_space<vmem>>, vector<16x128xf32>,
    %c0_i32_8 = arith.constant 0 : i32
    %9 = arith.cmpi eq, %arg2, %c0_i32_8 : i32
    %10 = arith.extui %9 : i1 to i32
    %c0_i32_9 = arith.constant 0 : i32
    %11 = arith.cmpi ne, %10, %c0_i32_9 : i32
    scf.if %11 {
      %c0_10 = arith.constant 0 : index
      %c0_11 = arith.constant 0 : index
      %12 = vector.load %arg7[%c0_10, %c0_11] : memref<16x128xf32, #tpu.memory_space<vmem>>, vector<16x128xf32>
      %c0_12 = arith.constant 0 : index
      %c0_13 = arith.constant 0 : index
      %13 = vector.load %arg5[%c0_12, %c0_13] : memref<1x128xf32, #tpu.memory_space<vmem>>, vector<1x128xf32>
      %14 = vector.broadcast %13 : vector<1x128xf32> to vector<16x128xf32>
      %15 = arith.addf %12, %14 : vector<16x128xf32>
      %c0_14 = arith.constant 0 : index
      %c0_15 = arith.constant 0 : index
      %16 = vector.load %arg6[%c0_14, %c0_15] : memref<16x128xf32, #tpu.memory_space<vmem>>, vector<16x128xf32>
      tpu.vector_store %arg6[%c0_14, %c0_15], %15 {strides = array<i32>} : memref<16x128xf32, #tpu.memory_space<vmem>>, vector<16x128xf32>,
    } else {
    }
    return
  }
  func.func @transform_0(%arg0: i32, %arg1: i32, %arg2: i32) -> (i32, i32) {
    %c0_i32 = arith.constant 0 : i32
    return %arg0, %arg2 : i32, i32
  }
  func.func @transform_1(%arg0: i32, %arg1: i32, %arg2: i32) -> (i32, i32) {
    %c0_i32 = arith.constant 0 : i32
    return %arg2, %arg1 : i32, i32
  }
  func.func @transform_2(%arg0: i32, %arg1: i32, %arg2: i32) -> (i32, i32) {
    %c0_i32 = arith.constant 0 : i32
    %c0_i32_0 = arith.constant 0 : i32
    return %c0_i32, %arg1 : i32, i32
  }
  func.func @transform_3(%arg0: i32, %arg1: i32, %arg2: i32) -> (i32, i32) {
    %c0_i32 = arith.constant 0 : i32
    return %arg0, %arg1 : i32, i32
  }
}

module attributes {stable_mosaic.version = 11 : i64} {
  func.func @_matmul_kernel(%arg0: i32, %arg1: i32, %arg2: i32, %arg3: memref<8x128xf32, #tpu.memory_space<vmem>>, %arg4: memref<128x128xf32, #tpu.memory_space<vmem>>, %arg5: memref<1x128xf32, #tpu.memory_space<vmem>>, %arg6: memref<8x128xf32, #tpu.memory_space<vmem>>, %arg7: memref<8x128xf32, #tpu.memory_space<vmem>>) attributes {dimension_semantics = [#tpu.dimension_semantics<parallel>, #tpu.dimension_semantics<parallel>, #tpu.dimension_semantics<arbitrary>], iteration_bounds = array<i64: 1, 1, 1>, scalar_prefetch = 0 : i64, scratch_operands = 1 : i64, tpu.core_type = #tpu.core_type<tc>, window_params = [{transform_indices = @transform_0, window_bounds = array<i64: 8, 128>}, {transform_indices = @transform_1, window_bounds = array<i64: 128, 128>}, {transform_indices = @transform_2, window_bounds = array<i64: 1, 128>}, {transform_indices = @transform_3, window_bounds = array<i64: 8, 128>}]} {
    %c0_i32 = arith.constant 0 : i32
    %0 = arith.cmpi eq, %arg2, %c0_i32 : i32
    %1 = arith.extui %0 : i1 to i32
    %c0_i32_0 = arith.constant 0 : i32
    %2 = arith.cmpi ne, %1, %c0_i32_0 : i32
    scf.if %2 {
      %cst_10 = arith.constant 0.000000e+00 : f32
      %12 = vector.broadcast %cst_10 : f32 to vector<8x128xf32>
      %c0_11 = arith.constant 0 : index
      %c0_12 = arith.constant 0 : index
      %13 = vector.load %arg7[%c0_11, %c0_12] : memref<8x128xf32, #tpu.memory_space<vmem>>, vector<8x128xf32>
      tpu.vector_store %arg7[%c0_11, %c0_12], %12 {strides = array<i32>} : memref<8x128xf32, #tpu.memory_space<vmem>>, vector<8x128xf32>,
    } else {
    }
    %c0 = arith.constant 0 : index
    %c0_1 = arith.constant 0 : index
    %3 = vector.load %arg7[%c0, %c0_1] : memref<8x128xf32, #tpu.memory_space<vmem>>, vector<8x128xf32>
    %c0_2 = arith.constant 0 : index
    %c0_3 = arith.constant 0 : index
    %4 = vector.load %arg3[%c0_2, %c0_3] : memref<8x128xf32, #tpu.memory_space<vmem>>, vector<8x128xf32>
    %c0_4 = arith.constant 0 : index
    %c0_5 = arith.constant 0 : index
    %5 = vector.load %arg4[%c0_4, %c0_5] : memref<128x128xf32, #tpu.memory_space<vmem>>, vector<128x128xf32>
    %cst = arith.constant dense<0.000000e+00> : vector<8x128xf32>
    %6 = tpu.matmul %4, %5, %cst {dimension_numbers = #tpu.dot_dimension_numbers<[1], [0], [0], [1], [0, 0, 1, 1], [], []>} : vector<8x128xf32>, vector<128x128xf32>, vector<8x128xf32> -> vector<8x128xf32>
    %7 = arith.addf %3, %6 : vector<8x128xf32>
    %c0_6 = arith.constant 0 : index
    %c0_7 = arith.constant 0 : index
    %8 = vector.load %arg7[%c0_6, %c0_7] : memref<8x128xf32, #tpu.memory_space<vmem>>, vector<8x128xf32>
    tpu.vector_store %arg7[%c0_6, %c0_7], %7 {strides = array<i32>} : memref<8x128xf32, #tpu.memory_space<vmem>>, vector<8x128xf32>,
    %c0_i32_8 = arith.constant 0 : i32
    %9 = arith.cmpi eq, %arg2, %c0_i32_8 : i32
    %10 = arith.extui %9 : i1 to i32
    %c0_i32_9 = arith.constant 0 : i32
    %11 = arith.cmpi ne, %10, %c0_i32_9 : i32
    scf.if %11 {
      %c0_10 = arith.constant 0 : index
      %c0_11 = arith.constant 0 : index
      %12 = vector.load %arg7[%c0_10, %c0_11] : memref<8x128xf32, #tpu.memory_space<vmem>>, vector<8x128xf32>
      %c0_12 = arith.constant 0 : index
      %c0_13 = arith.constant 0 : index
      %13 = vector.load %arg5[%c0_12, %c0_13] : memref<1x128xf32, #tpu.memory_space<vmem>>, vector<1x128xf32>
      %14 = vector.broadcast %13 : vector<1x128xf32> to vector<8x128xf32>
      %15 = arith.addf %12, %14 : vector<8x128xf32>
      %cst_14 = arith.constant 0.000000e+00 : f32
      %16 = vector.broadcast %cst_14 : f32 to vector<8x128xf32>
      %17 = arith.maximumf %15, %16 : vector<8x128xf32>
      %c0_15 = arith.constant 0 : index
      %c0_16 = arith.constant 0 : index
      %18 = vector.load %arg6[%c0_15, %c0_16] : memref<8x128xf32, #tpu.memory_space<vmem>>, vector<8x128xf32>
      tpu.vector_store %arg6[%c0_15, %c0_16], %17 {strides = array<i32>} : memref<8x128xf32, #tpu.memory_space<vmem>>, vector<8x128xf32>,
    } else {
    }
    return
  }
  func.func @transform_0(%arg0: i32, %arg1: i32, %arg2: i32) -> (i32, i32) {
    %c0_i32 = arith.constant 0 : i32
    return %arg0, %arg2 : i32, i32
  }
  func.func @transform_1(%arg0: i32, %arg1: i32, %arg2: i32) -> (i32, i32) {
    %c0_i32 = arith.constant 0 : i32
    return %arg2, %arg1 : i32, i32
  }
  func.func @transform_2(%arg0: i32, %arg1: i32, %arg2: i32) -> (i32, i32) {
    %c0_i32 = arith.constant 0 : i32
    %c0_i32_0 = arith.constant 0 : i32
    return %c0_i32, %arg1 : i32, i32
  }
  func.func @transform_3(%arg0: i32, %arg1: i32, %arg2: i32) -> (i32, i32) {
    %c0_i32 = arith.constant 0 : i32
    return %arg0, %arg1 : i32, i32
  }
}

module attributes {stable_mosaic.version = 11 : i64} {
  func.func @_gru_kernel(%arg0: i32, %arg1: memref<1x2x16xf32, #tpu.memory_space<vmem>>, %arg2: memref<1x2x16xf32, #tpu.memory_space<vmem>>, %arg3: memref<1x2x16xf32, #tpu.memory_space<vmem>>, %arg4: memref<16x16xf32, #tpu.memory_space<vmem>>, %arg5: memref<16x16xf32, #tpu.memory_space<vmem>>, %arg6: memref<16x16xf32, #tpu.memory_space<vmem>>, %arg7: memref<1x16xf32, #tpu.memory_space<vmem>>, %arg8: memref<1x16xf32, #tpu.memory_space<vmem>>, %arg9: memref<1x16xf32, #tpu.memory_space<vmem>>, %arg10: memref<2x16xf32, #tpu.memory_space<vmem>>, %arg11: memref<2x16xf32, #tpu.memory_space<vmem>>) attributes {dimension_semantics = [#tpu.dimension_semantics<arbitrary>], iteration_bounds = array<i64: 8>, scalar_prefetch = 0 : i64, scratch_operands = 1 : i64, tpu.core_type = #tpu.core_type<tc>, window_params = [{transform_indices = @transform_0, window_bounds = array<i64: 1, 2, 16>}, {transform_indices = @transform_1, window_bounds = array<i64: 1, 2, 16>}, {transform_indices = @transform_2, window_bounds = array<i64: 1, 2, 16>}, {pipeline_mode = #tpu.pipeline_mode<synchronous>, transform_indices = @transform_3, window_bounds = array<i64: 16, 16>}, {pipeline_mode = #tpu.pipeline_mode<synchronous>, transform_indices = @transform_4, window_bounds = array<i64: 16, 16>}, {pipeline_mode = #tpu.pipeline_mode<synchronous>, transform_indices = @transform_5, window_bounds = array<i64: 16, 16>}, {pipeline_mode = #tpu.pipeline_mode<synchronous>, transform_indices = @transform_6, window_bounds = array<i64: 1, 16>}, {pipeline_mode = #tpu.pipeline_mode<synchronous>, transform_indices = @transform_7, window_bounds = array<i64: 1, 16>}, {pipeline_mode = #tpu.pipeline_mode<synchronous>, transform_indices = @transform_8, window_bounds = array<i64: 1, 16>}, {pipeline_mode = #tpu.pipeline_mode<synchronous>, transform_indices = @transform_9, window_bounds = array<i64: 2, 16>}]} {
    %c0_i32 = arith.constant 0 : i32
    %0 = arith.cmpi eq, %arg0, %c0_i32 : i32
    %1 = arith.extui %0 : i1 to i32
    %c0_i32_0 = arith.constant 0 : i32
    %2 = arith.cmpi ne, %1, %c0_i32_0 : i32
    scf.if %2 {
      %cst_35 = arith.constant 0.000000e+00 : f32
      %53 = vector.broadcast %cst_35 : f32 to vector<2x16xf32>
      %c0_36 = arith.constant 0 : index
      %c0_37 = arith.constant 0 : index
      %54 = vector.load %arg11[%c0_36, %c0_37] : memref<2x16xf32, #tpu.memory_space<vmem>>, vector<2x16xf32>
      tpu.vector_store %arg11[%c0_36, %c0_37], %53 {strides = array<i32>} : memref<2x16xf32, #tpu.memory_space<vmem>>, vector<2x16xf32>,
    } else {
    }
    %c0 = arith.constant 0 : index
    %c0_1 = arith.constant 0 : index
    %3 = vector.load %arg11[%c0, %c0_1] : memref<2x16xf32, #tpu.memory_space<vmem>>, vector<2x16xf32>
    %c0_2 = arith.constant 0 : index
    %c0_3 = arith.constant 0 : index
    %4 = vector.load %arg4[%c0_2, %c0_3] : memref<16x16xf32, #tpu.memory_space<vmem>>, vector<16x16xf32>
    %cst = arith.constant dense<0.000000e+00> : vector<2x16xf32>
    %5 = tpu.matmul %3, %4, %cst {dimension_numbers = #tpu.dot_dimension_numbers<[1], [0], [0], [1], [0, 0, 1, 1], [], []>} : vector<2x16xf32>, vector<16x16xf32>, vector<2x16xf32> -> vector<2x16xf32>
    %c0_4 = arith.constant 0 : index
    %c0_5 = arith.constant 0 : index
    %6 = vector.load %arg7[%c0_4, %c0_5] : memref<1x16xf32, #tpu.memory_space<vmem>>, vector<1x16xf32>
    %7 = vector.broadcast %6 : vector<1x16xf32> to vector<2x16xf32>
    %8 = arith.addf %5, %7 : vector<2x16xf32>
    %c0_6 = arith.constant 0 : index
    %c0_7 = arith.constant 0 : index
    %9 = vector.load %arg5[%c0_6, %c0_7] : memref<16x16xf32, #tpu.memory_space<vmem>>, vector<16x16xf32>
    %cst_8 = arith.constant dense<0.000000e+00> : vector<2x16xf32>
    %10 = tpu.matmul %3, %9, %cst_8 {dimension_numbers = #tpu.dot_dimension_numbers<[1], [0], [0], [1], [0, 0, 1, 1], [], []>} : vector<2x16xf32>, vector<16x16xf32>, vector<2x16xf32> -> vector<2x16xf32>
    %c0_9 = arith.constant 0 : index
    %c0_10 = arith.constant 0 : index
    %11 = vector.load %arg8[%c0_9, %c0_10] : memref<1x16xf32, #tpu.memory_space<vmem>>, vector<1x16xf32>
    %12 = vector.broadcast %11 : vector<1x16xf32> to vector<2x16xf32>
    %13 = arith.addf %10, %12 : vector<2x16xf32>
    %c0_11 = arith.constant 0 : index
    %c0_12 = arith.constant 0 : index
    %14 = vector.load %arg6[%c0_11, %c0_12] : memref<16x16xf32, #tpu.memory_space<vmem>>, vector<16x16xf32>
    %cst_13 = arith.constant dense<0.000000e+00> : vector<2x16xf32>
    %15 = tpu.matmul %3, %14, %cst_13 {dimension_numbers = #tpu.dot_dimension_numbers<[1], [0], [0], [1], [0, 0, 1, 1], [], []>} : vector<2x16xf32>, vector<16x16xf32>, vector<2x16xf32> -> vector<2x16xf32>
    %c0_14 = arith.constant 0 : index
    %c0_15 = arith.constant 0 : index
    %16 = vector.load %arg9[%c0_14, %c0_15] : memref<1x16xf32, #tpu.memory_space<vmem>>, vector<1x16xf32>
    %17 = vector.broadcast %16 : vector<1x16xf32> to vector<2x16xf32>
    %18 = arith.addf %15, %17 : vector<2x16xf32>
    %c0_16 = arith.constant 0 : index
    %c0_17 = arith.constant 0 : index
    %c0_18 = arith.constant 0 : index
    %19 = vector.load %arg1[%c0_16, %c0_17, %c0_18] : memref<1x2x16xf32, #tpu.memory_space<vmem>>, vector<1x2x16xf32>
    %20 = vector.shape_cast %19 : vector<1x2x16xf32> to vector<2x16xf32>
    %21 = arith.addf %20, %8 : vector<2x16xf32>
    %cst_19 = arith.constant 0.000000e+00 : f32
    %22 = vector.broadcast %cst_19 : f32 to vector<2x16xf32>
    %23 = arith.subf %22, %21 : vector<2x16xf32>
    %24 = math.exp %23 : vector<2x16xf32>
    %cst_20 = arith.constant 1.000000e+00 : f32
    %25 = vector.broadcast %cst_20 : f32 to vector<2x16xf32>
    %26 = arith.addf %25, %24 : vector<2x16xf32>
    %cst_21 = arith.constant 1.000000e+00 : f32
    %27 = vector.broadcast %cst_21 : f32 to vector<2x16xf32>
    %28 = arith.divf %27, %26 : vector<2x16xf32>
    %c0_22 = arith.constant 0 : index
    %c0_23 = arith.constant 0 : index
    %c0_24 = arith.constant 0 : index
    %29 = vector.load %arg2[%c0_22, %c0_23, %c0_24] : memref<1x2x16xf32, #tpu.memory_space<vmem>>, vector<1x2x16xf32>
    %30 = vector.shape_cast %29 : vector<1x2x16xf32> to vector<2x16xf32>
    %31 = arith.addf %30, %13 : vector<2x16xf32>
    %cst_25 = arith.constant 0.000000e+00 : f32
    %32 = vector.broadcast %cst_25 : f32 to vector<2x16xf32>
    %33 = arith.subf %32, %31 : vector<2x16xf32>
    %34 = math.exp %33 : vector<2x16xf32>
    %cst_26 = arith.constant 1.000000e+00 : f32
    %35 = vector.broadcast %cst_26 : f32 to vector<2x16xf32>
    %36 = arith.addf %35, %34 : vector<2x16xf32>
    %cst_27 = arith.constant 1.000000e+00 : f32
    %37 = vector.broadcast %cst_27 : f32 to vector<2x16xf32>
    %38 = arith.divf %37, %36 : vector<2x16xf32>
    %c0_28 = arith.constant 0 : index
    %c0_29 = arith.constant 0 : index
    %c0_30 = arith.constant 0 : index
    %39 = vector.load %arg3[%c0_28, %c0_29, %c0_30] : memref<1x2x16xf32, #tpu.memory_space<vmem>>, vector<1x2x16xf32>
    %40 = vector.shape_cast %39 : vector<1x2x16xf32> to vector<2x16xf32>
    %41 = arith.mulf %28, %18 : vector<2x16xf32>
    %42 = arith.addf %40, %41 : vector<2x16xf32>
    %43 = math.tanh %42 : vector<2x16xf32>
    %cst_31 = arith.constant 1.000000e+00 : f32
    %44 = vector.broadcast %cst_31 : f32 to vector<2x16xf32>
    %45 = arith.subf %44, %38 : vector<2x16xf32>
    %46 = arith.mulf %45, %43 : vector<2x16xf32>
    %47 = arith.mulf %38, %3 : vector<2x16xf32>
    %48 = arith.addf %46, %47 : vector<2x16xf32>
    %c0_32 = arith.constant 0 : index
    %c0_33 = arith.constant 0 : index
    %49 = vector.load %arg11[%c0_32, %c0_33] : memref<2x16xf32, #tpu.memory_space<vmem>>, vector<2x16xf32>
    tpu.vector_store %arg11[%c0_32, %c0_33], %48 {strides = array<i32>} : memref<2x16xf32, #tpu.memory_space<vmem>>, vector<2x16xf32>,
    %c7_i32 = arith.constant 7 : i32
    %50 = arith.cmpi eq, %arg0, %c7_i32 : i32
    %51 = arith.extui %50 : i1 to i32
    %c0_i32_34 = arith.constant 0 : i32
    %52 = arith.cmpi ne, %51, %c0_i32_34 : i32
    scf.if %52 {
      %c0_35 = arith.constant 0 : index
      %c0_36 = arith.constant 0 : index
      %53 = vector.load %arg10[%c0_35, %c0_36] : memref<2x16xf32, #tpu.memory_space<vmem>>, vector<2x16xf32>
      tpu.vector_store %arg10[%c0_35, %c0_36], %48 {strides = array<i32>} : memref<2x16xf32, #tpu.memory_space<vmem>>, vector<2x16xf32>,
    } else {
    }
    return
  }
  func.func @transform_0(%arg0: i32) -> (i32, i32, i32) {
    %c0_i32 = arith.constant 0 : i32
    %c0_i32_0 = arith.constant 0 : i32
    %c0_i32_1 = arith.constant 0 : i32
    return %arg0, %c0_i32, %c0_i32_0 : i32, i32, i32
  }
  func.func @transform_1(%arg0: i32) -> (i32, i32, i32) {
    %c0_i32 = arith.constant 0 : i32
    %c0_i32_0 = arith.constant 0 : i32
    %c0_i32_1 = arith.constant 0 : i32
    return %arg0, %c0_i32, %c0_i32_0 : i32, i32, i32
  }
  func.func @transform_2(%arg0: i32) -> (i32, i32, i32) {
    %c0_i32 = arith.constant 0 : i32
    %c0_i32_0 = arith.constant 0 : i32
    %c0_i32_1 = arith.constant 0 : i32
    return %arg0, %c0_i32, %c0_i32_0 : i32, i32, i32
  }
  func.func @transform_3(%arg0: i32) -> (i32, i32) {
    %c0_i32 = arith.constant 0 : i32
    %c0_i32_0 = arith.constant 0 : i32
    %c0_i32_1 = arith.constant 0 : i32
    return %c0_i32, %c0_i32_0 : i32, i32
  }
  func.func @transform_4(%arg0: i32) -> (i32, i32) {
    %c0_i32 = arith.constant 0 : i32
    %c0_i32_0 = arith.constant 0 : i32
    %c0_i32_1 = arith.constant 0 : i32
    return %c0_i32, %c0_i32_0 : i32, i32
  }
  func.func @transform_5(%arg0: i32) -> (i32, i32) {
    %c0_i32 = arith.constant 0 : i32
    %c0_i32_0 = arith.constant 0 : i32
    %c0_i32_1 = arith.constant 0 : i32
    return %c0_i32, %c0_i32_0 : i32, i32
  }
  func.func @transform_6(%arg0: i32) -> (i32, i32) {
    %c0_i32 = arith.constant 0 : i32
    %c0_i32_0 = arith.constant 0 : i32
    %c0_i32_1 = arith.constant 0 : i32
    return %c0_i32, %c0_i32_0 : i32, i32
  }
  func.func @transform_7(%arg0: i32) -> (i32, i32) {
    %c0_i32 = arith.constant 0 : i32
    %c0_i32_0 = arith.constant 0 : i32
    %c0_i32_1 = arith.constant 0 : i32
    return %c0_i32, %c0_i32_0 : i32, i32
  }
  func.func @transform_8(%arg0: i32) -> (i32, i32) {
    %c0_i32 = arith.constant 0 : i32
    %c0_i32_0 = arith.constant 0 : i32
    %c0_i32_1 = arith.constant 0 : i32
    return %c0_i32, %c0_i32_0 : i32, i32
  }
  func.func @transform_9(%arg0: i32) -> (i32, i32) {
    %c0_i32 = arith.constant 0 : i32
    %c0_i32_0 = arith.constant 0 : i32
    %c0_i32_1 = arith.constant 0 : i32
    return %c0_i32, %c0_i32_0 : i32, i32
  }
}

module attributes {stable_mosaic.version = 11 : i64} {
  func.func @_matmul_kernel(%arg0: i32, %arg1: i32, %arg2: i32, %arg3: memref<8x128xf32, #tpu.memory_space<vmem>>, %arg4: memref<128x128xf32, #tpu.memory_space<vmem>>, %arg5: memref<1x128xf32, #tpu.memory_space<vmem>>, %arg6: memref<8x128xf32, #tpu.memory_space<vmem>>, %arg7: memref<8x128xf32, #tpu.memory_space<vmem>>) attributes {dimension_semantics = [#tpu.dimension_semantics<parallel>, #tpu.dimension_semantics<parallel>, #tpu.dimension_semantics<arbitrary>], iteration_bounds = array<i64: 1, 1, 1>, scalar_prefetch = 0 : i64, scratch_operands = 1 : i64, tpu.core_type = #tpu.core_type<tc>, window_params = [{transform_indices = @transform_0, window_bounds = array<i64: 8, 128>}, {transform_indices = @transform_1, window_bounds = array<i64: 128, 128>}, {transform_indices = @transform_2, window_bounds = array<i64: 1, 128>}, {transform_indices = @transform_3, window_bounds = array<i64: 8, 128>}]} {
    %c0_i32 = arith.constant 0 : i32
    %0 = arith.cmpi eq, %arg2, %c0_i32 : i32
    %1 = arith.extui %0 : i1 to i32
    %c0_i32_0 = arith.constant 0 : i32
    %2 = arith.cmpi ne, %1, %c0_i32_0 : i32
    scf.if %2 {
      %cst_10 = arith.constant 0.000000e+00 : f32
      %12 = vector.broadcast %cst_10 : f32 to vector<8x128xf32>
      %c0_11 = arith.constant 0 : index
      %c0_12 = arith.constant 0 : index
      %13 = vector.load %arg7[%c0_11, %c0_12] : memref<8x128xf32, #tpu.memory_space<vmem>>, vector<8x128xf32>
      tpu.vector_store %arg7[%c0_11, %c0_12], %12 {strides = array<i32>} : memref<8x128xf32, #tpu.memory_space<vmem>>, vector<8x128xf32>,
    } else {
    }
    %c0 = arith.constant 0 : index
    %c0_1 = arith.constant 0 : index
    %3 = vector.load %arg7[%c0, %c0_1] : memref<8x128xf32, #tpu.memory_space<vmem>>, vector<8x128xf32>
    %c0_2 = arith.constant 0 : index
    %c0_3 = arith.constant 0 : index
    %4 = vector.load %arg3[%c0_2, %c0_3] : memref<8x128xf32, #tpu.memory_space<vmem>>, vector<8x128xf32>
    %c0_4 = arith.constant 0 : index
    %c0_5 = arith.constant 0 : index
    %5 = vector.load %arg4[%c0_4, %c0_5] : memref<128x128xf32, #tpu.memory_space<vmem>>, vector<128x128xf32>
    %cst = arith.constant dense<0.000000e+00> : vector<8x128xf32>
    %6 = tpu.matmul %4, %5, %cst {dimension_numbers = #tpu.dot_dimension_numbers<[1], [0], [0], [1], [0, 0, 1, 1], [], []>} : vector<8x128xf32>, vector<128x128xf32>, vector<8x128xf32> -> vector<8x128xf32>
    %7 = arith.addf %3, %6 : vector<8x128xf32>
    %c0_6 = arith.constant 0 : index
    %c0_7 = arith.constant 0 : index
    %8 = vector.load %arg7[%c0_6, %c0_7] : memref<8x128xf32, #tpu.memory_space<vmem>>, vector<8x128xf32>
    tpu.vector_store %arg7[%c0_6, %c0_7], %7 {strides = array<i32>} : memref<8x128xf32, #tpu.memory_space<vmem>>, vector<8x128xf32>,
    %c0_i32_8 = arith.constant 0 : i32
    %9 = arith.cmpi eq, %arg2, %c0_i32_8 : i32
    %10 = arith.extui %9 : i1 to i32
    %c0_i32_9 = arith.constant 0 : i32
    %11 = arith.cmpi ne, %10, %c0_i32_9 : i32
    scf.if %11 {
      %c0_10 = arith.constant 0 : index
      %c0_11 = arith.constant 0 : index
      %12 = vector.load %arg7[%c0_10, %c0_11] : memref<8x128xf32, #tpu.memory_space<vmem>>, vector<8x128xf32>
      %c0_12 = arith.constant 0 : index
      %c0_13 = arith.constant 0 : index
      %13 = vector.load %arg5[%c0_12, %c0_13] : memref<1x128xf32, #tpu.memory_space<vmem>>, vector<1x128xf32>
      %14 = vector.broadcast %13 : vector<1x128xf32> to vector<8x128xf32>
      %15 = arith.addf %12, %14 : vector<8x128xf32>
      %cst_14 = arith.constant 0.000000e+00 : f32
      %16 = vector.broadcast %cst_14 : f32 to vector<8x128xf32>
      %17 = arith.maximumf %15, %16 : vector<8x128xf32>
      %c0_15 = arith.constant 0 : index
      %c0_16 = arith.constant 0 : index
      %18 = vector.load %arg6[%c0_15, %c0_16] : memref<8x128xf32, #tpu.memory_space<vmem>>, vector<8x128xf32>
      tpu.vector_store %arg6[%c0_15, %c0_16], %17 {strides = array<i32>} : memref<8x128xf32, #tpu.memory_space<vmem>>, vector<8x128xf32>,
    } else {
    }
    return
  }
  func.func @transform_0(%arg0: i32, %arg1: i32, %arg2: i32) -> (i32, i32) {
    %c0_i32 = arith.constant 0 : i32
    return %arg0, %arg2 : i32, i32
  }
  func.func @transform_1(%arg0: i32, %arg1: i32, %arg2: i32) -> (i32, i32) {
    %c0_i32 = arith.constant 0 : i32
    return %arg2, %arg1 : i32, i32
  }
  func.func @transform_2(%arg0: i32, %arg1: i32, %arg2: i32) -> (i32, i32) {
    %c0_i32 = arith.constant 0 : i32
    %c0_i32_0 = arith.constant 0 : i32
    return %c0_i32, %arg1 : i32, i32
  }
  func.func @transform_3(%arg0: i32, %arg1: i32, %arg2: i32) -> (i32, i32) {
    %c0_i32 = arith.constant 0 : i32
    return %arg0, %arg1 : i32, i32
  }
}

module attributes {stable_mosaic.version = 11 : i64} {
  func.func @_matmul_kernel(%arg0: i32, %arg1: i32, %arg2: i32, %arg3: memref<8x128xf32, #tpu.memory_space<vmem>>, %arg4: memref<128x128xf32, #tpu.memory_space<vmem>>, %arg5: memref<1x128xf32, #tpu.memory_space<vmem>>, %arg6: memref<8x128xf32, #tpu.memory_space<vmem>>, %arg7: memref<8x128xf32, #tpu.memory_space<vmem>>) attributes {dimension_semantics = [#tpu.dimension_semantics<parallel>, #tpu.dimension_semantics<parallel>, #tpu.dimension_semantics<arbitrary>], iteration_bounds = array<i64: 1, 1, 1>, scalar_prefetch = 0 : i64, scratch_operands = 1 : i64, tpu.core_type = #tpu.core_type<tc>, window_params = [{transform_indices = @transform_0, window_bounds = array<i64: 8, 128>}, {transform_indices = @transform_1, window_bounds = array<i64: 128, 128>}, {transform_indices = @transform_2, window_bounds = array<i64: 1, 128>}, {transform_indices = @transform_3, window_bounds = array<i64: 8, 128>}]} {
    %c0_i32 = arith.constant 0 : i32
    %0 = arith.cmpi eq, %arg2, %c0_i32 : i32
    %1 = arith.extui %0 : i1 to i32
    %c0_i32_0 = arith.constant 0 : i32
    %2 = arith.cmpi ne, %1, %c0_i32_0 : i32
    scf.if %2 {
      %cst_10 = arith.constant 0.000000e+00 : f32
      %12 = vector.broadcast %cst_10 : f32 to vector<8x128xf32>
      %c0_11 = arith.constant 0 : index
      %c0_12 = arith.constant 0 : index
      %13 = vector.load %arg7[%c0_11, %c0_12] : memref<8x128xf32, #tpu.memory_space<vmem>>, vector<8x128xf32>
      tpu.vector_store %arg7[%c0_11, %c0_12], %12 {strides = array<i32>} : memref<8x128xf32, #tpu.memory_space<vmem>>, vector<8x128xf32>,
    } else {
    }
    %c0 = arith.constant 0 : index
    %c0_1 = arith.constant 0 : index
    %3 = vector.load %arg7[%c0, %c0_1] : memref<8x128xf32, #tpu.memory_space<vmem>>, vector<8x128xf32>
    %c0_2 = arith.constant 0 : index
    %c0_3 = arith.constant 0 : index
    %4 = vector.load %arg3[%c0_2, %c0_3] : memref<8x128xf32, #tpu.memory_space<vmem>>, vector<8x128xf32>
    %c0_4 = arith.constant 0 : index
    %c0_5 = arith.constant 0 : index
    %5 = vector.load %arg4[%c0_4, %c0_5] : memref<128x128xf32, #tpu.memory_space<vmem>>, vector<128x128xf32>
    %cst = arith.constant dense<0.000000e+00> : vector<8x128xf32>
    %6 = tpu.matmul %4, %5, %cst {dimension_numbers = #tpu.dot_dimension_numbers<[1], [0], [0], [1], [0, 0, 1, 1], [], []>} : vector<8x128xf32>, vector<128x128xf32>, vector<8x128xf32> -> vector<8x128xf32>
    %7 = arith.addf %3, %6 : vector<8x128xf32>
    %c0_6 = arith.constant 0 : index
    %c0_7 = arith.constant 0 : index
    %8 = vector.load %arg7[%c0_6, %c0_7] : memref<8x128xf32, #tpu.memory_space<vmem>>, vector<8x128xf32>
    tpu.vector_store %arg7[%c0_6, %c0_7], %7 {strides = array<i32>} : memref<8x128xf32, #tpu.memory_space<vmem>>, vector<8x128xf32>,
    %c0_i32_8 = arith.constant 0 : i32
    %9 = arith.cmpi eq, %arg2, %c0_i32_8 : i32
    %10 = arith.extui %9 : i1 to i32
    %c0_i32_9 = arith.constant 0 : i32
    %11 = arith.cmpi ne, %10, %c0_i32_9 : i32
    scf.if %11 {
      %c0_10 = arith.constant 0 : index
      %c0_11 = arith.constant 0 : index
      %12 = vector.load %arg7[%c0_10, %c0_11] : memref<8x128xf32, #tpu.memory_space<vmem>>, vector<8x128xf32>
      %c0_12 = arith.constant 0 : index
      %c0_13 = arith.constant 0 : index
      %13 = vector.load %arg5[%c0_12, %c0_13] : memref<1x128xf32, #tpu.memory_space<vmem>>, vector<1x128xf32>
      %14 = vector.broadcast %13 : vector<1x128xf32> to vector<8x128xf32>
      %15 = arith.addf %12, %14 : vector<8x128xf32>
      %16 = math.tanh %15 : vector<8x128xf32>
      %c0_14 = arith.constant 0 : index
      %c0_15 = arith.constant 0 : index
      %17 = vector.load %arg6[%c0_14, %c0_15] : memref<8x128xf32, #tpu.memory_space<vmem>>, vector<8x128xf32>
      tpu.vector_store %arg6[%c0_14, %c0_15], %16 {strides = array<i32>} : memref<8x128xf32, #tpu.memory_space<vmem>>, vector<8x128xf32>,
    } else {
    }
    return
  }
  func.func @transform_0(%arg0: i32, %arg1: i32, %arg2: i32) -> (i32, i32) {
    %c0_i32 = arith.constant 0 : i32
    return %arg0, %arg2 : i32, i32
  }
  func.func @transform_1(%arg0: i32, %arg1: i32, %arg2: i32) -> (i32, i32) {
    %c0_i32 = arith.constant 0 : i32
    return %arg2, %arg1 : i32, i32
  }
  func.func @transform_2(%arg0: i32, %arg1: i32, %arg2: i32) -> (i32, i32) {
    %c0_i32 = arith.constant 0 : i32
    %c0_i32_0 = arith.constant 0 : i32
    return %c0_i32, %arg1 : i32, i32
  }
  func.func @transform_3(%arg0: i32, %arg1: i32, %arg2: i32) -> (i32, i32) {
    %c0_i32 = arith.constant 0 : i32
    return %arg0, %arg1 : i32, i32
  }
}

module attributes {stable_mosaic.version = 11 : i64} {
  func.func @_matmul_kernel(%arg0: i32, %arg1: i32, %arg2: i32, %arg3: memref<8x128xf32, #tpu.memory_space<vmem>>, %arg4: memref<128x128xf32, #tpu.memory_space<vmem>>, %arg5: memref<1x128xf32, #tpu.memory_space<vmem>>, %arg6: memref<8x128xf32, #tpu.memory_space<vmem>>, %arg7: memref<8x128xf32, #tpu.memory_space<vmem>>) attributes {dimension_semantics = [#tpu.dimension_semantics<parallel>, #tpu.dimension_semantics<parallel>, #tpu.dimension_semantics<arbitrary>], iteration_bounds = array<i64: 1, 1, 1>, scalar_prefetch = 0 : i64, scratch_operands = 1 : i64, tpu.core_type = #tpu.core_type<tc>, window_params = [{transform_indices = @transform_0, window_bounds = array<i64: 8, 128>}, {transform_indices = @transform_1, window_bounds = array<i64: 128, 128>}, {transform_indices = @transform_2, window_bounds = array<i64: 1, 128>}, {transform_indices = @transform_3, window_bounds = array<i64: 8, 128>}]} {
    %c0_i32 = arith.constant 0 : i32
    %0 = arith.cmpi eq, %arg2, %c0_i32 : i32
    %1 = arith.extui %0 : i1 to i32
    %c0_i32_0 = arith.constant 0 : i32
    %2 = arith.cmpi ne, %1, %c0_i32_0 : i32
    scf.if %2 {
      %cst_10 = arith.constant 0.000000e+00 : f32
      %12 = vector.broadcast %cst_10 : f32 to vector<8x128xf32>
      %c0_11 = arith.constant 0 : index
      %c0_12 = arith.constant 0 : index
      %13 = vector.load %arg7[%c0_11, %c0_12] : memref<8x128xf32, #tpu.memory_space<vmem>>, vector<8x128xf32>
      tpu.vector_store %arg7[%c0_11, %c0_12], %12 {strides = array<i32>} : memref<8x128xf32, #tpu.memory_space<vmem>>, vector<8x128xf32>,
    } else {
    }
    %c0 = arith.constant 0 : index
    %c0_1 = arith.constant 0 : index
    %3 = vector.load %arg7[%c0, %c0_1] : memref<8x128xf32, #tpu.memory_space<vmem>>, vector<8x128xf32>
    %c0_2 = arith.constant 0 : index
    %c0_3 = arith.constant 0 : index
    %4 = vector.load %arg3[%c0_2, %c0_3] : memref<8x128xf32, #tpu.memory_space<vmem>>, vector<8x128xf32>
    %c0_4 = arith.constant 0 : index
    %c0_5 = arith.constant 0 : index
    %5 = vector.load %arg4[%c0_4, %c0_5] : memref<128x128xf32, #tpu.memory_space<vmem>>, vector<128x128xf32>
    %cst = arith.constant dense<0.000000e+00> : vector<8x128xf32>
    %6 = tpu.matmul %4, %5, %cst {dimension_numbers = #tpu.dot_dimension_numbers<[1], [0], [0], [1], [0, 0, 1, 1], [], []>} : vector<8x128xf32>, vector<128x128xf32>, vector<8x128xf32> -> vector<8x128xf32>
    %7 = arith.addf %3, %6 : vector<8x128xf32>
    %c0_6 = arith.constant 0 : index
    %c0_7 = arith.constant 0 : index
    %8 = vector.load %arg7[%c0_6, %c0_7] : memref<8x128xf32, #tpu.memory_space<vmem>>, vector<8x128xf32>
    tpu.vector_store %arg7[%c0_6, %c0_7], %7 {strides = array<i32>} : memref<8x128xf32, #tpu.memory_space<vmem>>, vector<8x128xf32>,
    %c0_i32_8 = arith.constant 0 : i32
    %9 = arith.cmpi eq, %arg2, %c0_i32_8 : i32
    %10 = arith.extui %9 : i1 to i32
    %c0_i32_9 = arith.constant 0 : i32
    %11 = arith.cmpi ne, %10, %c0_i32_9 : i32
    scf.if %11 {
      %c0_10 = arith.constant 0 : index
      %c0_11 = arith.constant 0 : index
      %12 = vector.load %arg7[%c0_10, %c0_11] : memref<8x128xf32, #tpu.memory_space<vmem>>, vector<8x128xf32>
      %c0_12 = arith.constant 0 : index
      %c0_13 = arith.constant 0 : index
      %13 = vector.load %arg5[%c0_12, %c0_13] : memref<1x128xf32, #tpu.memory_space<vmem>>, vector<1x128xf32>
      %14 = vector.broadcast %13 : vector<1x128xf32> to vector<8x128xf32>
      %15 = arith.addf %12, %14 : vector<8x128xf32>
      %c0_14 = arith.constant 0 : index
      %c0_15 = arith.constant 0 : index
      %16 = vector.load %arg6[%c0_14, %c0_15] : memref<8x128xf32, #tpu.memory_space<vmem>>, vector<8x128xf32>
      tpu.vector_store %arg6[%c0_14, %c0_15], %15 {strides = array<i32>} : memref<8x128xf32, #tpu.memory_space<vmem>>, vector<8x128xf32>,
    } else {
    }
    return
  }
  func.func @transform_0(%arg0: i32, %arg1: i32, %arg2: i32) -> (i32, i32) {
    %c0_i32 = arith.constant 0 : i32
    return %arg0, %arg2 : i32, i32
  }
  func.func @transform_1(%arg0: i32, %arg1: i32, %arg2: i32) -> (i32, i32) {
    %c0_i32 = arith.constant 0 : i32
    return %arg2, %arg1 : i32, i32
  }
  func.func @transform_2(%arg0: i32, %arg1: i32, %arg2: i32) -> (i32, i32) {
    %c0_i32 = arith.constant 0 : i32
    %c0_i32_0 = arith.constant 0 : i32
    return %c0_i32, %arg1 : i32, i32
  }
  func.func @transform_3(%arg0: i32, %arg1: i32, %arg2: i32) -> (i32, i32) {
    %c0_i32 = arith.constant 0 : i32
    return %arg0, %arg1 : i32, i32
  }
}

module attributes {stable_mosaic.version = 11 : i64} {
  func.func @_matmul_kernel(%arg0: i32, %arg1: i32, %arg2: i32, %arg3: memref<8x128xf32, #tpu.memory_space<vmem>>, %arg4: memref<128x128xf32, #tpu.memory_space<vmem>>, %arg5: memref<1x128xf32, #tpu.memory_space<vmem>>, %arg6: memref<8x128xf32, #tpu.memory_space<vmem>>, %arg7: memref<8x128xf32, #tpu.memory_space<vmem>>) attributes {dimension_semantics = [#tpu.dimension_semantics<parallel>, #tpu.dimension_semantics<parallel>, #tpu.dimension_semantics<arbitrary>], iteration_bounds = array<i64: 1, 1, 1>, scalar_prefetch = 0 : i64, scratch_operands = 1 : i64, tpu.core_type = #tpu.core_type<tc>, window_params = [{transform_indices = @transform_0, window_bounds = array<i64: 8, 128>}, {transform_indices = @transform_1, window_bounds = array<i64: 128, 128>}, {transform_indices = @transform_2, window_bounds = array<i64: 1, 128>}, {transform_indices = @transform_3, window_bounds = array<i64: 8, 128>}]} {
    %c0_i32 = arith.constant 0 : i32
    %0 = arith.cmpi eq, %arg2, %c0_i32 : i32
    %1 = arith.extui %0 : i1 to i32
    %c0_i32_0 = arith.constant 0 : i32
    %2 = arith.cmpi ne, %1, %c0_i32_0 : i32
    scf.if %2 {
      %cst_10 = arith.constant 0.000000e+00 : f32
      %12 = vector.broadcast %cst_10 : f32 to vector<8x128xf32>
      %c0_11 = arith.constant 0 : index
      %c0_12 = arith.constant 0 : index
      %13 = vector.load %arg7[%c0_11, %c0_12] : memref<8x128xf32, #tpu.memory_space<vmem>>, vector<8x128xf32>
      tpu.vector_store %arg7[%c0_11, %c0_12], %12 {strides = array<i32>} : memref<8x128xf32, #tpu.memory_space<vmem>>, vector<8x128xf32>,
    } else {
    }
    %c0 = arith.constant 0 : index
    %c0_1 = arith.constant 0 : index
    %3 = vector.load %arg7[%c0, %c0_1] : memref<8x128xf32, #tpu.memory_space<vmem>>, vector<8x128xf32>
    %c0_2 = arith.constant 0 : index
    %c0_3 = arith.constant 0 : index
    %4 = vector.load %arg3[%c0_2, %c0_3] : memref<8x128xf32, #tpu.memory_space<vmem>>, vector<8x128xf32>
    %c0_4 = arith.constant 0 : index
    %c0_5 = arith.constant 0 : index
    %5 = vector.load %arg4[%c0_4, %c0_5] : memref<128x128xf32, #tpu.memory_space<vmem>>, vector<128x128xf32>
    %cst = arith.constant dense<0.000000e+00> : vector<8x128xf32>
    %6 = tpu.matmul %4, %5, %cst {dimension_numbers = #tpu.dot_dimension_numbers<[1], [0], [0], [1], [0, 0, 1, 1], [], []>} : vector<8x128xf32>, vector<128x128xf32>, vector<8x128xf32> -> vector<8x128xf32>
    %7 = arith.addf %3, %6 : vector<8x128xf32>
    %c0_6 = arith.constant 0 : index
    %c0_7 = arith.constant 0 : index
    %8 = vector.load %arg7[%c0_6, %c0_7] : memref<8x128xf32, #tpu.memory_space<vmem>>, vector<8x128xf32>
    tpu.vector_store %arg7[%c0_6, %c0_7], %7 {strides = array<i32>} : memref<8x128xf32, #tpu.memory_space<vmem>>, vector<8x128xf32>,
    %c0_i32_8 = arith.constant 0 : i32
    %9 = arith.cmpi eq, %arg2, %c0_i32_8 : i32
    %10 = arith.extui %9 : i1 to i32
    %c0_i32_9 = arith.constant 0 : i32
    %11 = arith.cmpi ne, %10, %c0_i32_9 : i32
    scf.if %11 {
      %c0_10 = arith.constant 0 : index
      %c0_11 = arith.constant 0 : index
      %12 = vector.load %arg7[%c0_10, %c0_11] : memref<8x128xf32, #tpu.memory_space<vmem>>, vector<8x128xf32>
      %c0_12 = arith.constant 0 : index
      %c0_13 = arith.constant 0 : index
      %13 = vector.load %arg5[%c0_12, %c0_13] : memref<1x128xf32, #tpu.memory_space<vmem>>, vector<1x128xf32>
      %14 = vector.broadcast %13 : vector<1x128xf32> to vector<8x128xf32>
      %15 = arith.addf %12, %14 : vector<8x128xf32>
      %c0_14 = arith.constant 0 : index
      %c0_15 = arith.constant 0 : index
      %16 = vector.load %arg6[%c0_14, %c0_15] : memref<8x128xf32, #tpu.memory_space<vmem>>, vector<8x128xf32>
      tpu.vector_store %arg6[%c0_14, %c0_15], %15 {strides = array<i32>} : memref<8x128xf32, #tpu.memory_space<vmem>>, vector<8x128xf32>,
    } else {
    }
    return
  }
  func.func @transform_0(%arg0: i32, %arg1: i32, %arg2: i32) -> (i32, i32) {
    %c0_i32 = arith.constant 0 : i32
    return %arg0, %arg2 : i32, i32
  }
  func.func @transform_1(%arg0: i32, %arg1: i32, %arg2: i32) -> (i32, i32) {
    %c0_i32 = arith.constant 0 : i32
    return %arg2, %arg1 : i32, i32
  }
  func.func @transform_2(%arg0: i32, %arg1: i32, %arg2: i32) -> (i32, i32) {
    %c0_i32 = arith.constant 0 : i32
    %c0_i32_0 = arith.constant 0 : i32
    return %c0_i32, %arg1 : i32, i32
  }
  func.func @transform_3(%arg0: i32, %arg1: i32, %arg2: i32) -> (i32, i32) {
    %c0_i32 = arith.constant 0 : i32
    return %arg0, %arg1 : i32, i32
  }
}

</mosaic_0001>

<bundles_post_ra>
// kernel: edm_forward.27
= control target key start
LH: loop header
LB: loop body
LE: loop exit
PB: predicated region body
PF: predicated region fallthrough
CT: control target
= control target key end

     0   :  { %s1155_s12 = smov 0   ;;  %s1157_s13 = smov 0   ;;  %s1351_s0 = inlined_call_operand.vmem [shape: f32[1024,128], index: 0, kind: input, shape index: {}]   ;;  %s1352_s1 = inlined_call_operand.vmem [shape: f32[128,128], index: 1, kind: input, shape index: {}]   ;;  %s1353_s2 = inlined_call_operand.vmem [shape: f32[1,128], index: 2, kind: input, shape index: {}]   ;;  %s1354_s3 = inlined_call_operand.vmem [shape: f32[1024,128], index: 3, kind: output, shape index: {}]  }
   0x1   :  { %s1159_s14 = smov 0  }
   0x2 LB: > { %s32_s15 = sadd.s32 1, %s1129_s13  ;;  %p919_p0 = scmp.ge.s32.totalorder %s1133_s14, 1  ;;  %s1133_s14 = sphi %s1159_s14, %s13_s14   ;;  %s1129_s13 = sphi %s1157_s13, %s1356_s13   ;;  %s1125_s12 = sphi %s1155_s12, %s1355_s12  }
   0x3   : > { %p34_p1 = scmp.ge.s32.totalorder %s32_s15, 4  ;;  %p188_p2 = scmp.lt.s32.totalorder %s1133_s14, 5 }
   0x5   : > { %s1358_s15 = smov (%p34_p1, %s32_s15), 0  ;;  %p189_p3 = pnand %p919_p0, %p188_p2 }
   0x6   : > { %s920_s5 = sshll.u32 (!%p189_p3), %s1125_s12, 5 }
   0x7   : > { %192 = sbr.rel (%p189_p3) target bundleno = 274 (0x112), region = 32  ;;  %p230_p4 = scmp.lt.s32.totalorder (!%p189_p3), %s920_s5, 127 }
   0xc   : > { %v374_v0 = vld [vmem:[%s1352_s1 + $0x78] sm:$0xff]  ;;  %v373_v1 = vld [vmem:[%s1352_s1 + $0x70] sm:$0xff]  ;;  %v372_v2 = vld [vmem:[%s1352_s1 + $0x68] sm:$0xff]  ;;  %s1360_s5 = smov (!%p230_p4, %s920_s5), 127 }
   0xd   : > { %975 = vmatprep.subr.mxu0 %v374_v0  ;;  %1055 = vmatprep.subr.mxu1 %v374_v0  ;;  %v371_v3 = vld [vmem:[%s1352_s1 + $0x60] sm:$0xff]  ;;  %v370_v4 = vld [vmem:[%s1352_s1 + $0x58] sm:$0xff]  ;;  %v369_v5 = vld [vmem:[%s1352_s1 + $0x50] sm:$0xff]  ;;  %s921_s21 = sshll.u32 %s1360_s5, 3 }
   0xe   : > { %976 = vmatpush3.msra.mxu0 %v374_v0  ;;  %1071 = vmatpush3.msra.mxu1 %v374_v0  ;;  %v368_v6 = vld [vmem:[%s1352_s1 + $0x48] sm:$0xff]  ;;  %v367_v7 = vld [vmem:[%s1352_s1 + $0x40] sm:$0xff]  ;;  %v366_v8 = vld [vmem:[%s1352_s1 + $0x38] sm:$0xff]  ;;  %s1229_s26 = scalar_lea.vmem %s1351_s0, %s921_s21  ;;  %s1278_s7 = scalar_lea.vmem %s1354_s3, %s921_s21 }
   0xf   : > { %977 = vmatprep.subr.mxu0 %v373_v1  ;;  %1056 = vmatprep.subr.mxu1 %v373_v1  ;;  %v365_v9 = vld [vmem:[%s1352_s1 + $0x30] sm:$0xff]  ;;  %v364_v10 = vld [vmem:[%s1352_s1 + $0x28] sm:$0xff]  ;;  %v363_v11 = vld [vmem:[%s1352_s1 + $0x20] sm:$0xff] }
  0x10   : > { %978 = vmatpush3.msra.mxu0 %v373_v1  ;;  %1072 = vmatpush3.msra.mxu1 %v373_v1  ;;  %v362_v12 = vld [vmem:[%s1352_s1 + $0x18] sm:$0xff]  ;;  %v361_v13 = vld [vmem:[%s1352_s1 + $0x10] sm:$0xff]  ;;  %v360_v14 = vld [vmem:[%s1352_s1 + $0x8] sm:$0xff] }
  0x11   : > { %979 = vmatprep.subr.mxu0 %v372_v2  ;;  %1057 = vmatprep.subr.mxu1 %v372_v2  ;;  %v359_v15 = vld [vmem:[%s1352_s1] sm:$0xff]  ;;  %v328_v18 = vld [vmem:[%s1229_s26 + $0x8] sm:$0xff]  ;;  %v329_v20 = vld [vmem:[%s1229_s26 + $0x10] sm:$0xff] }
  0x12   : > { %980 = vmatpush3.msra.mxu0 %v372_v2  ;;  %1073 = vmatpush3.msra.mxu1 %v372_v2  ;;  %v327_v16 = vld [vmem:[%s1229_s26] sm:$0xff]  ;;  %v344_v19 = vld [vmem:[%s1229_s26 + $0x88] sm:$0xff]  ;;  %v345_v21 = vld [vmem:[%s1229_s26 + $0x90] sm:$0xff] }
  0x13   : > { %981 = vmatprep.subr.mxu0 %v371_v3  ;;  %1058 = vmatprep.subr.mxu1 %v371_v3  ;;  %v343_v17 = vld [vmem:[%s1229_s26 + $0x80] sm:$0xff]  ;;  %v330_v22 = vld [vmem:[%s1229_s26 + $0x18] sm:$0xff]  ;;  %v332_v26 = vld [vmem:[%s1229_s26 + $0x28] sm:$0xff] }
  0x14   : > { %982 = vmatpush3.msra.mxu0 %v371_v3  ;;  %1074 = vmatpush3.msra.mxu1 %v371_v3  ;;  %v346_v23 = vld [vmem:[%s1229_s26 + $0x98] sm:$0xff]  ;;  %v331_v24 = vld [vmem:[%s1229_s26 + $0x20] sm:$0xff]  ;;  %v348_v27 = vld [vmem:[%s1229_s26 + $0xa8] sm:$0xff] }
  0x15   : > { %983 = vmatprep.subr.mxu0 %v370_v4  ;;  %1059 = vmatprep.subr.mxu1 %v370_v4  ;;  %v347_v25 = vld [vmem:[%s1229_s26 + $0xa0] sm:$0xff]  ;;  %v333_v28 = vld [vmem:[%s1229_s26 + $0x30] sm:$0xff]  ;;  %v334_v30 = vld [vmem:[%s1229_s26 + $0x38] sm:$0xff] }
  0x16   : > { %984 = vmatpush3.msra.mxu0 %v370_v4  ;;  %1075 = vmatpush3.msra.mxu1 %v370_v4  ;;  %v349_v29 = vld [vmem:[%s1229_s26 + $0xb0] sm:$0xff]  ;;  %v350_v31 = vld [vmem:[%s1229_s26 + $0xb8] sm:$0xff]  ;;  %v335_v32 = vld [vmem:[%s1229_s26 + $0x40] sm:$0xff] }
  0x17   : > { %985 = vmatprep.subr.mxu0 %v369_v5  ;;  %1060 = vmatprep.subr.mxu1 %v369_v5  ;;  %v351_v33 = vld [vmem:[%s1229_s26 + $0xc0] sm:$0xff]  ;;  %v336_v34 = vld [vmem:[%s1229_s26 + $0x48] sm:$0xff]  ;;  %v337_v36 = vld [vmem:[%s1229_s26 + $0x50] sm:$0xff] }
  0x18   : > { %986 = vmatpush3.msra.mxu0 %v369_v5  ;;  %1076 = vmatpush3.msra.mxu1 %v369_v5  ;;  %v352_v35 = vld [vmem:[%s1229_s26 + $0xc8] sm:$0xff]  ;;  %v353_v37 = vld [vmem:[%s1229_s26 + $0xd0] sm:$0xff]  ;;  %v338_v38 = vld [vmem:[%s1229_s26 + $0x58] sm:$0xff] }
  0x19   : > { %987 = vmatprep.subr.mxu0 %v368_v6  ;;  %1061 = vmatprep.subr.mxu1 %v368_v6  ;;  %v354_v39 = vld [vmem:[%s1229_s26 + $0xd8] sm:$0xff]  ;;  %v339_v40 = vld [vmem:[%s1229_s26 + $0x60] sm:$0xff]  ;;  %v340_v42 = vld [vmem:[%s1229_s26 + $0x68] sm:$0xff] }
  0x1a   : > { %988 = vmatpush3.msra.mxu0 %v368_v6  ;;  %1077 = vmatpush3.msra.mxu1 %v368_v6  ;;  %v355_v41 = vld [vmem:[%s1229_s26 + $0xe0] sm:$0xff]  ;;  %v356_v43 = vld [vmem:[%s1229_s26 + $0xe8] sm:$0xff]  ;;  %v341_v44 = vld [vmem:[%s1229_s26 + $0x70] sm:$0xff] }
  0x1b   : > { %989 = vmatprep.subr.mxu0 %v367_v7  ;;  %1062 = vmatprep.subr.mxu1 %v367_v7  ;;  %v357_v45 = vld [vmem:[%s1229_s26 + $0xf0] sm:$0xff]  ;;  %v342_v46 = vld [vmem:[%s1229_s26 + $0x78] sm:$0xff]  ;;  %v1269_v48 = vld [vmem:[%s1353_s2] ss:$0 sm:$0xff] }
  0x1c   : > { %990 = vmatpush3.msra.mxu0 %v367_v7  ;;  %1078 = vmatpush3.msra.mxu1 %v367_v7  ;;  %v358_v47 = vld [vmem:[%s1229_s26 + $0xf8] sm:$0xff] }
  0x1d   : > { %991 = vmatprep.subr.mxu0 %v366_v8  ;;  %1063 = vmatprep.subr.mxu1 %v366_v8 }
  0x1e   : > { %992 = vmatpush3.msra.mxu0 %v366_v8  ;;  %1079 = vmatpush3.msra.mxu1 %v366_v8 }
  0x1f   : > { %993 = vmatprep.subr.mxu0 %v365_v9  ;;  %1064 = vmatprep.subr.mxu1 %v365_v9 }
  0x20   : > { %994 = vmatpush3.msra.mxu0 %v365_v9  ;;  %1080 = vmatpush3.msra.mxu1 %v365_v9 }
  0x21   : > { %995 = vmatprep.subr.mxu0 %v364_v10  ;;  %1065 = vmatprep.subr.mxu1 %v364_v10 }
  0x22   : > { %996 = vmatpush3.msra.mxu0 %v364_v10  ;;  %1081 = vmatpush3.msra.mxu1 %v364_v10 }
  0x23   : > { %997 = vmatprep.subr.mxu0 %v363_v11  ;;  %1066 = vmatprep.subr.mxu1 %v363_v11 }
  0x24   : > { %998 = vmatpush3.msra.mxu0 %v363_v11  ;;  %1082 = vmatpush3.msra.mxu1 %v363_v11 }
  0x25   : > { %999 = vmatprep.subr.mxu0 %v362_v12  ;;  %1067 = vmatprep.subr.mxu1 %v362_v12 }
  0x26   : > { %1000 = vmatpush3.msra.mxu0 %v362_v12  ;;  %1083 = vmatpush3.msra.mxu1 %v362_v12 }
  0x27   : > { %1001 = vmatprep.subr.mxu0 %v361_v13  ;;  %1068 = vmatprep.subr.mxu1 %v361_v13 }
  0x28   : > { %1002 = vmatpush3.msra.mxu0 %v361_v13  ;;  %1084 = vmatpush3.msra.mxu1 %v361_v13 }
  0x29   : > { %1003 = vmatprep.subr.mxu0 %v360_v14  ;;  %1069 = vmatprep.subr.mxu1 %v360_v14 }
  0x2a   : > { %1004 = vmatpush3.msra.mxu0 %v360_v14  ;;  %1085 = vmatpush3.msra.mxu1 %v360_v14 }
  0x2b   : > { %1005 = vmatprep.subr.mxu0 %v359_v15  ;;  %1070 = vmatprep.subr.mxu1 %v359_v15 }
  0x2c   : > { %1006 = vmatpush3.msra.mxu0 %v359_v15  ;;  %1086 = vmatpush3.msra.mxu1 %v359_v15 }
  0x2d   : > { %1007 = vmatprep.mubr.f32.mxu0 %v327_v16  ;;  %1031 = vmatprep.mubr.f32.mxu1 %v343_v17 }
  0x2e   : > { %1008 = vmatmul.mubr.f32.vlgmr.msra.gmra.mxu0 %v328_v18  ;;  %1032 = vmatmul.mubr.f32.vlgmr.msra.gmra.mxu1 %v344_v19 }
  0x2f   : > { %1010 = vmatprep.mubr.f32.mxu0 %v329_v20  ;;  %1034 = vmatprep.mubr.f32.mxu1 %v345_v21 }
  0x32   : > { %1011 = vmatmul.mubr.f32.gmra.mxu0 %v330_v22  ;;  %1035 = vmatmul.mubr.f32.gmra.mxu1 %v346_v23 }
  0x33   : > { %1013 = vmatprep.mubr.f32.mxu0 %v331_v24  ;;  %1037 = vmatprep.mubr.f32.mxu1 %v347_v25 }
  0x36   : > { %1014 = vmatmul.mubr.f32.gmra.mxu0 %v332_v26  ;;  %1038 = vmatmul.mubr.f32.gmra.mxu1 %v348_v27 }
  0x37   : > { %1016 = vmatprep.mubr.f32.mxu0 %v333_v28  ;;  %1040 = vmatprep.mubr.f32.mxu1 %v349_v29 }
  0x3a   : > { %1017 = vmatmul.mubr.f32.gmra.mxu0 %v334_v30  ;;  %1041 = vmatmul.mubr.f32.gmra.mxu1 %v350_v31 }
  0x3b   : > { %1019 = vmatprep.mubr.f32.mxu0 %v335_v32  ;;  %1043 = vmatprep.mubr.f32.mxu1 %v351_v33 }
  0x3e   : > { %1020 = vmatmul.mubr.f32.gmra.mxu0 %v336_v34  ;;  %1044 = vmatmul.mubr.f32.gmra.mxu1 %v352_v35 }
  0x3f   : > { %1022 = vmatprep.mubr.f32.mxu0 %v337_v36  ;;  %1046 = vmatprep.mubr.f32.mxu1 %v353_v37 }
  0x42   : > { %1023 = vmatmul.mubr.f32.gmra.mxu0 %v338_v38  ;;  %1047 = vmatmul.mubr.f32.gmra.mxu1 %v354_v39 }
  0x43   : > { %1025 = vmatprep.mubr.f32.mxu0 %v339_v40  ;;  %1049 = vmatprep.mubr.f32.mxu1 %v355_v41 }
  0x46   : > { %1026 = vmatmul.mubr.f32.gmra.mxu0 %v340_v42  ;;  %1050 = vmatmul.mubr.f32.gmra.mxu1 %v356_v43 }
  0x47   : > { %1028 = vmatprep.mubr.f32.mxu0 %v341_v44  ;;  %1052 = vmatprep.mubr.f32.mxu1 %v357_v45 }
  0x4a   : > { %1029 = vmatmul.mubr.f32.gmra.mxu0 %v342_v46  ;;  %1053 = vmatmul.mubr.f32.gmra.mxu1 %v358_v47 }
  0xee   : > { %v1009_v49 = vpop.f32.mrf.mxu0  ;;  %v1033_v50 = vpop.f32.mrf.mxu1 }
  0xef   : > { %v707_v51 = vadd.f32 %v1009_v49, %v1269_v48  ;;  %v723_v52 = vadd.f32 %v1033_v50, %v1269_v48 }
  0xf0   : > { %v441_v53 = vpop.f32.mrf.mxu0  ;;  %v521_v54 = vpop.f32.mrf.mxu1 }
  0xf1   : > { %v739_v55 = vmax.f32 %v707_v51, 0.0  ;;  %v755_v56 = vmax.f32 %v723_v52, 0.0  ;;  %v706_v57 = vadd.f32 %v1269_v48, %v441_v53  ;;  %v722_v58 = vadd.f32 %v1269_v48, %v521_v54 }
  0xf2   : > { %v1012_v59 = vpop.f32.mrf.mxu0  ;;  %v1036_v60 = vpop.f32.mrf.mxu1 }
  0xf3   : > { %771 = vst [vmem:[%s1278_s7 + $0x8] sm:$0xff] %v739_v55  ;;  %787 = vst [vmem:[%s1278_s7 + $0x88] sm:$0xff] %v755_v56  ;;  %v738_v61 = vmax.f32 %v706_v57, 0.0  ;;  %v754_v62 = vmax.f32 %v722_v58, 0.0  ;;  %v709_v63 = vadd.f32 %v1012_v59, %v1269_v48  ;;  %v725_v0 = vadd.f32 %v1036_v60, %v1269_v48 }
  0xf4   : > { %v451_v1 = vpop.f32.mrf.mxu0  ;;  %v531_v2 = vpop.f32.mrf.mxu1 }
  0xf5   : > { %770 = vst [vmem:[%s1278_s7] sm:$0xff] %v738_v61  ;;  %786 = vst [vmem:[%s1278_s7 + $0x80] sm:$0xff] %v754_v62  ;;  %v741_v3 = vmax.f32 %v709_v63, 0.0  ;;  %v757_v4 = vmax.f32 %v725_v0, 0.0  ;;  %v708_v5 = vadd.f32 %v1269_v48, %v451_v1  ;;  %v724_v6 = vadd.f32 %v1269_v48, %v531_v2 }
  0xf6   : > { %v1015_v7 = vpop.f32.mrf.mxu0  ;;  %v1039_v8 = vpop.f32.mrf.mxu1 }
  0xf7   : > { %773 = vst [vmem:[%s1278_s7 + $0x18] sm:$0xff] %v741_v3  ;;  %789 = vst [vmem:[%s1278_s7 + $0x98] sm:$0xff] %v757_v4  ;;  %v740_v9 = vmax.f32 %v708_v5, 0.0  ;;  %v756_v10 = vmax.f32 %v724_v6, 0.0  ;;  %v711_v11 = vadd.f32 %v1015_v7, %v1269_v48  ;;  %v727_v12 = vadd.f32 %v1039_v8, %v1269_v48 }
  0xf8   : > { %v461_v13 = vpop.f32.mrf.mxu0  ;;  %v541_v14 = vpop.f32.mrf.mxu1 }
  0xf9   : > { %772 = vst [vmem:[%s1278_s7 + $0x10] sm:$0xff] %v740_v9  ;;  %788 = vst [vmem:[%s1278_s7 + $0x90] sm:$0xff] %v756_v10  ;;  %v743_v15 = vmax.f32 %v711_v11, 0.0  ;;  %v759_v16 = vmax.f32 %v727_v12, 0.0  ;;  %v710_v17 = vadd.f32 %v1269_v48, %v461_v13  ;;  %v726_v18 = vadd.f32 %v1269_v48, %v541_v14 }
  0xfa   : > { %v1018_v19 = vpop.f32.mrf.mxu0  ;;  %v1042_v20 = vpop.f32.mrf.mxu1 }
  0xfb   : > { %775 = vst [vmem:[%s1278_s7 + $0x28] sm:$0xff] %v743_v15  ;;  %791 = vst [vmem:[%s1278_s7 + $0xa8] sm:$0xff] %v759_v16  ;;  %v742_v21 = vmax.f32 %v710_v17, 0.0  ;;  %v758_v22 = vmax.f32 %v726_v18, 0.0  ;;  %v713_v23 = vadd.f32 %v1018_v19, %v1269_v48  ;;  %v729_v24 = vadd.f32 %v1042_v20, %v1269_v48 }
  0xfc   : > { %v471_v25 = vpop.f32.mrf.mxu0  ;;  %v551_v26 = vpop.f32.mrf.mxu1 }
  0xfd   : > { %774 = vst [vmem:[%s1278_s7 + $0x20] sm:$0xff] %v742_v21  ;;  %790 = vst [vmem:[%s1278_s7 + $0xa0] sm:$0xff] %v758_v22  ;;  %v745_v27 = vmax.f32 %v713_v23, 0.0  ;;  %v761_v28 = vmax.f32 %v729_v24, 0.0  ;;  %v712_v29 = vadd.f32 %v1269_v48, %v471_v25  ;;  %v728_v30 = vadd.f32 %v1269_v48, %v551_v26 }
  0xfe   : > { %v1021_v31 = vpop.f32.mrf.mxu0  ;;  %v1045_v32 = vpop.f32.mrf.mxu1 }
  0xff   : > { %777 = vst [vmem:[%s1278_s7 + $0x38] sm:$0xff] %v745_v27  ;;  %793 = vst [vmem:[%s1278_s7 + $0xb8] sm:$0xff] %v761_v28  ;;  %v744_v33 = vmax.f32 %v712_v29, 0.0  ;;  %v760_v34 = vmax.f32 %v728_v30, 0.0  ;;  %v715_v35 = vadd.f32 %v1021_v31, %v1269_v48  ;;  %v731_v36 = vadd.f32 %v1045_v32, %v1269_v48 }
 0x100   : > { %v481_v37 = vpop.f32.mrf.mxu0  ;;  %v561_v38 = vpop.f32.mrf.mxu1 }
 0x101   : > { %776 = vst [vmem:[%s1278_s7 + $0x30] sm:$0xff] %v744_v33  ;;  %792 = vst [vmem:[%s1278_s7 + $0xb0] sm:$0xff] %v760_v34  ;;  %v747_v39 = vmax.f32 %v715_v35, 0.0  ;;  %v763_v40 = vmax.f32 %v731_v36, 0.0  ;;  %v714_v41 = vadd.f32 %v1269_v48, %v481_v37  ;;  %v730_v42 = vadd.f32 %v1269_v48, %v561_v38 }
 0x102   : > { %v1024_v43 = vpop.f32.mrf.mxu0  ;;  %v1048_v44 = vpop.f32.mrf.mxu1 }
 0x103   : > { %779 = vst [vmem:[%s1278_s7 + $0x48] sm:$0xff] %v747_v39  ;;  %795 = vst [vmem:[%s1278_s7 + $0xc8] sm:$0xff] %v763_v40  ;;  %v746_v45 = vmax.f32 %v714_v41, 0.0  ;;  %v762_v46 = vmax.f32 %v730_v42, 0.0  ;;  %v717_v47 = vadd.f32 %v1024_v43, %v1269_v48  ;;  %v733_v49 = vadd.f32 %v1048_v44, %v1269_v48 }
 0x104   : > { %v491_v50 = vpop.f32.mrf.mxu0  ;;  %v571_v51 = vpop.f32.mrf.mxu1 }
 0x105   : > { %778 = vst [vmem:[%s1278_s7 + $0x40] sm:$0xff] %v746_v45  ;;  %794 = vst [vmem:[%s1278_s7 + $0xc0] sm:$0xff] %v762_v46  ;;  %v749_v52 = vmax.f32 %v717_v47, 0.0  ;;  %v765_v53 = vmax.f32 %v733_v49, 0.0  ;;  %v716_v54 = vadd.f32 %v1269_v48, %v491_v50  ;;  %v732_v55 = vadd.f32 %v1269_v48, %v571_v51 }
 0x106   : > { %v1027_v56 = vpop.f32.mrf.mxu0  ;;  %v1051_v57 = vpop.f32.mrf.mxu1 }
 0x107   : > { %781 = vst [vmem:[%s1278_s7 + $0x58] sm:$0xff] %v749_v52  ;;  %797 = vst [vmem:[%s1278_s7 + $0xd8] sm:$0xff] %v765_v53  ;;  %v748_v58 = vmax.f32 %v716_v54, 0.0  ;;  %v764_v59 = vmax.f32 %v732_v55, 0.0  ;;  %v719_v60 = vadd.f32 %v1027_v56, %v1269_v48  ;;  %v735_v61 = vadd.f32 %v1051_v57, %v1269_v48 }
 0x108   : > { %v501_v62 = vpop.f32.mrf.mxu0  ;;  %v581_v63 = vpop.f32.mrf.mxu1 }
 0x109   : > { %780 = vst [vmem:[%s1278_s7 + $0x50] sm:$0xff] %v748_v58  ;;  %796 = vst [vmem:[%s1278_s7 + $0xd0] sm:$0xff] %v764_v59  ;;  %v751_v0 = vmax.f32 %v719_v60, 0.0  ;;  %v767_v1 = vmax.f32 %v735_v61, 0.0  ;;  %v718_v2 = vadd.f32 %v1269_v48, %v501_v62  ;;  %v734_v3 = vadd.f32 %v1269_v48, %v581_v63 }
 0x10a   : > { %v1030_v4 = vpop.f32.mrf.mxu0  ;;  %v1054_v5 = vpop.f32.mrf.mxu1 }
 0x10b   : > { %783 = vst [vmem:[%s1278_s7 + $0x68] sm:$0xff] %v751_v0  ;;  %799 = vst [vmem:[%s1278_s7 + $0xe8] sm:$0xff] %v767_v1  ;;  %v750_v6 = vmax.f32 %v718_v2, 0.0  ;;  %v766_v7 = vmax.f32 %v734_v3, 0.0  ;;  %v721_v8 = vadd.f32 %v1030_v4, %v1269_v48  ;;  %v737_v9 = vadd.f32 %v1054_v5, %v1269_v48 }
 0x10c   : > { %v511_v10 = vpop.f32.mrf.mxu0  ;;  %v591_v11 = vpop.f32.mrf.mxu1 }
 0x10d   : > { %782 = vst [vmem:[%s1278_s7 + $0x60] sm:$0xff] %v750_v6  ;;  %798 = vst [vmem:[%s1278_s7 + $0xe0] sm:$0xff] %v766_v7  ;;  %v753_v12 = vmax.f32 %v721_v8, 0.0  ;;  %v769_v13 = vmax.f32 %v737_v9, 0.0  ;;  %v720_v14 = vadd.f32 %v1269_v48, %v511_v10  ;;  %v736_v15 = vadd.f32 %v1269_v48, %v591_v11 }
 0x10f   : > { %785 = vst [vmem:[%s1278_s7 + $0x78] sm:$0xff] %v753_v12  ;;  %801 = vst [vmem:[%s1278_s7 + $0xf8] sm:$0xff] %v769_v13  ;;  %v752_v16 = vmax.f32 %v720_v14, 0.0  ;;  %v768_v17 = vmax.f32 %v736_v15, 0.0 }
 0x111   : > { %784 = vst [vmem:[%s1278_s7 + $0x70] sm:$0xff] %v752_v16  ;;  %800 = vst [vmem:[%s1278_s7 + $0xf0] sm:$0xff] %v768_v17 }
 0x112 PF: > { %s13_s14 = sadd.s32 1, %s1133_s14   ;;  %s1355_s12 = smov %s1129_s13 }
 0x113   : > { %p10_p5 = scmp.ge.s32.totalorder %s13_s14, 6   ;;  %s1356_s13 = smov %s1358_s15 }
 0x115   :  { %12 = sbr.rel (!%p10_p5) target bundleno = 2 (0x2), region = 76 }

// kernel: edm_forward.28
= control target key start
LH: loop header
LB: loop body
LE: loop exit
PB: predicated region body
PF: predicated region fallthrough
CT: control target
= control target key end

     0   :  { %v1076_v0 = vmov 0.0   ;;  %s1750_s1 = inlined_call_operand.vmem [shape: f32[384,128], index: 1, kind: input, shape index: {}]   ;;  %s1751_s0 = inlined_call_operand.vmem [shape: f32[256,384], index: 0, kind: input, shape index: {}]   ;;  %s1752_s2 = inlined_call_operand.vmem [shape: f32[1,128], index: 2, kind: input, shape index: {}]   ;;  %s1753_s3 = inlined_call_operand.vmem [shape: f32[256,128], index: 3, kind: output, shape index: {}]  }
   0x1   :  { %226 = vmatprep.subr.mxu0 %v1076_v0  ;;  %1011 = vmatprep.subr.mxu1 %v1076_v0  ;;  %v193_v1 = vld [vmem:[%s1750_s1 + $0x78] sm:$0xff]  ;;  %v192_v2 = vld [vmem:[%s1750_s1 + $0x70] sm:$0xff]  ;;  %v191_v3 = vld [vmem:[%s1750_s1 + $0x68] sm:$0xff] }
   0x2   :  { %227 = vmatpush1.msra.mxu0 %v193_v1  ;;  %1043 = vmatpush1.msra.mxu1 %v193_v1  ;;  %v190_v4 = vld [vmem:[%s1750_s1 + $0x60] sm:$0xff]  ;;  %v189_v5 = vld [vmem:[%s1750_s1 + $0x58] sm:$0xff]  ;;  %v188_v6 = vld [vmem:[%s1750_s1 + $0x50] sm:$0xff] }
   0x3   :  { %228 = vmatprep.subr.mxu0 %v1076_v0  ;;  %1012 = vmatprep.subr.mxu1 %v1076_v0  ;;  %v187_v7 = vld [vmem:[%s1750_s1 + $0x48] sm:$0xff]  ;;  %v186_v8 = vld [vmem:[%s1750_s1 + $0x40] sm:$0xff]  ;;  %v185_v9 = vld [vmem:[%s1750_s1 + $0x38] sm:$0xff] }
   0x4   :  { %229 = vmatpush1.msra.mxu0 %v192_v2  ;;  %1044 = vmatpush1.msra.mxu1 %v192_v2  ;;  %v184_v10 = vld [vmem:[%s1750_s1 + $0x30] sm:$0xff]  ;;  %v183_v11 = vld [vmem:[%s1750_s1 + $0x28] sm:$0xff]  ;;  %v182_v12 = vld [vmem:[%s1750_s1 + $0x20] sm:$0xff] }
   0x5   :  { %230 = vmatprep.subr.mxu0 %v1076_v0  ;;  %1013 = vmatprep.subr.mxu1 %v1076_v0  ;;  %v181_v13 = vld [vmem:[%s1750_s1 + $0x18] sm:$0xff]  ;;  %v180_v14 = vld [vmem:[%s1750_s1 + $0x10] sm:$0xff]  ;;  %v179_v15 = vld [vmem:[%s1750_s1 + $0x8] sm:$0xff] }
   0x6   :  { %231 = vmatpush1.msra.mxu0 %v191_v3  ;;  %1045 = vmatpush1.msra.mxu1 %v191_v3  ;;  %v178_v16 = vld [vmem:[%s1750_s1] sm:$0xff]  ;;  %v209_v17 = vld [vmem:[%s1750_s1 + $0xf8] sm:$0xff]  ;;  %v208_v18 = vld [vmem:[%s1750_s1 + $0xf0] sm:$0xff] }
   0x7   :  { %232 = vmatprep.subr.mxu0 %v1076_v0  ;;  %1014 = vmatprep.subr.mxu1 %v1076_v0  ;;  %v207_v19 = vld [vmem:[%s1750_s1 + $0xe8] sm:$0xff]  ;;  %v206_v20 = vld [vmem:[%s1750_s1 + $0xe0] sm:$0xff]  ;;  %v205_v21 = vld [vmem:[%s1750_s1 + $0xd8] sm:$0xff] }
   0x8   :  { %233 = vmatpush1.msra.mxu0 %v190_v4  ;;  %1046 = vmatpush1.msra.mxu1 %v190_v4  ;;  %v204_v22 = vld [vmem:[%s1750_s1 + $0xd0] sm:$0xff]  ;;  %v203_v23 = vld [vmem:[%s1750_s1 + $0xc8] sm:$0xff]  ;;  %v202_v24 = vld [vmem:[%s1750_s1 + $0xc0] sm:$0xff] }
   0x9   :  { %234 = vmatprep.subr.mxu0 %v1076_v0  ;;  %1015 = vmatprep.subr.mxu1 %v1076_v0  ;;  %v201_v25 = vld [vmem:[%s1750_s1 + $0xb8] sm:$0xff]  ;;  %v200_v26 = vld [vmem:[%s1750_s1 + $0xb0] sm:$0xff]  ;;  %v199_v27 = vld [vmem:[%s1750_s1 + $0xa8] sm:$0xff] }
   0xa   :  { %235 = vmatpush1.msra.mxu0 %v189_v5  ;;  %1047 = vmatpush1.msra.mxu1 %v189_v5  ;;  %v198_v28 = vld [vmem:[%s1750_s1 + $0xa0] sm:$0xff]  ;;  %v197_v29 = vld [vmem:[%s1750_s1 + $0x98] sm:$0xff]  ;;  %v196_v30 = vld [vmem:[%s1750_s1 + $0x90] sm:$0xff] }
   0xb   :  { %236 = vmatprep.subr.mxu0 %v1076_v0  ;;  %1016 = vmatprep.subr.mxu1 %v1076_v0  ;;  %v195_v31 = vld [vmem:[%s1750_s1 + $0x88] sm:$0xff]  ;;  %v194_v32 = vld [vmem:[%s1750_s1 + $0x80] sm:$0xff]  ;;  %v225_v37 = vld [vmem:[%s1750_s1 + $0x178] sm:$0xff] }
   0xc   :  { %237 = vmatpush1.msra.mxu0 %v188_v6  ;;  %1048 = vmatpush1.msra.mxu1 %v188_v6  ;;  %v83_v33 = vld [vmem:[%s1751_s0 + $0x8] sm:$0xff]  ;;  %v82_v35 = vld [vmem:[%s1751_s0] sm:$0xff]  ;;  %v224_v40 = vld [vmem:[%s1750_s1 + $0x170] sm:$0xff] }
   0xd   :  { %238 = vmatprep.subr.mxu0 %v1076_v0  ;;  %1017 = vmatprep.subr.mxu1 %v1076_v0  ;;  %v155_v34 = vld [vmem:[%s1751_s0 + $0x248] sm:$0xff]  ;;  %v154_v36 = vld [vmem:[%s1751_s0 + $0x240] sm:$0xff]  ;;  %v85_v41 = vld [vmem:[%s1751_s0 + $0x18] sm:$0xff] }
   0xe   :  { %239 = vmatpush1.msra.mxu0 %v187_v7  ;;  %1049 = vmatpush1.msra.mxu1 %v187_v7  ;;  %v86_v38 = vld [vmem:[%s1751_s0 + $0x20] sm:$0xff]  ;;  %v157_v42 = vld [vmem:[%s1751_s0 + $0x258] sm:$0xff]  ;;  %v223_v43 = vld [vmem:[%s1750_s1 + $0x168] sm:$0xff] }
   0xf   :  { %240 = vmatprep.subr.mxu0 %v1076_v0  ;;  %1018 = vmatprep.subr.mxu1 %v1076_v0  ;;  %v158_v39 = vld [vmem:[%s1751_s0 + $0x260] sm:$0xff]  ;;  %v89_v44 = vld [vmem:[%s1751_s0 + $0x38] sm:$0xff]  ;;  %v88_v47 = vld [vmem:[%s1751_s0 + $0x30] sm:$0xff] }
  0x10   :  { %241 = vmatpush1.msra.mxu0 %v186_v8  ;;  %1050 = vmatpush1.msra.mxu1 %v186_v8  ;;  %v222_v45 = vld [vmem:[%s1750_s1 + $0x160] sm:$0xff]  ;;  %v161_v46 = vld [vmem:[%s1751_s0 + $0x278] sm:$0xff]  ;;  %v160_v48 = vld [vmem:[%s1751_s0 + $0x270] sm:$0xff] }
  0x11   :  { %242 = vmatprep.subr.mxu0 %v1076_v0  ;;  %1019 = vmatprep.subr.mxu1 %v1076_v0  ;;  %v221_v49 = vld [vmem:[%s1750_s1 + $0x158] sm:$0xff]  ;;  %v92_v50 = vld [vmem:[%s1751_s0 + $0x50] sm:$0xff]  ;;  %v91_v53 = vld [vmem:[%s1751_s0 + $0x48] sm:$0xff] }
  0x12   :  { %243 = vmatpush1.msra.mxu0 %v185_v9  ;;  %1051 = vmatpush1.msra.mxu1 %v185_v9  ;;  %v220_v51 = vld [vmem:[%s1750_s1 + $0x150] sm:$0xff]  ;;  %v163_v54 = vld [vmem:[%s1751_s0 + $0x288] sm:$0xff]  ;;  %v218_v57 = vld [vmem:[%s1750_s1 + $0x140] sm:$0xff] }
  0x13   :  { %244 = vmatprep.subr.mxu0 %v1076_v0  ;;  %1020 = vmatprep.subr.mxu1 %v1076_v0  ;;  %v164_v52 = vld [vmem:[%s1751_s0 + $0x290] sm:$0xff]  ;;  %v219_v55 = vld [vmem:[%s1750_s1 + $0x148] sm:$0xff]  ;;  %v94_v59 = vld [vmem:[%s1751_s0 + $0x60] sm:$0xff] }
  0x14   :  { %245 = vmatpush1.msra.mxu0 %v184_v10  ;;  %1052 = vmatpush1.msra.mxu1 %v184_v10  ;;  %v95_v56 = vld [vmem:[%s1751_s0 + $0x68] sm:$0xff]  ;;  %v166_v60 = vld [vmem:[%s1751_s0 + $0x2a0] sm:$0xff]  ;;  %v217_v61 = vld [vmem:[%s1750_s1 + $0x138] sm:$0xff] }
  0x15   :  { %246 = vmatprep.subr.mxu0 %v1076_v0  ;;  %1021 = vmatprep.subr.mxu1 %v1076_v0  ;;  %v167_v58 = vld [vmem:[%s1751_s0 + $0x2a8] sm:$0xff]  ;;  %v98_v62 = vld [vmem:[%s1751_s0 + $0x80] sm:$0xff]  ;;  %v216_v63 = vld [vmem:[%s1750_s1 + $0x130] sm:$0xff] }
  0x16   :  { %247 = vmatpush1.msra.mxu0 %v183_v11  ;;  %1053 = vmatpush1.msra.mxu1 %v183_v11  ;;  %v97_v1 = vld [vmem:[%s1751_s0 + $0x78] sm:$0xff]  ;;  %v215_v3 = vld [vmem:[%s1750_s1 + $0x128] sm:$0xff]  ;;  %v214_v5 = vld [vmem:[%s1750_s1 + $0x120] sm:$0xff] }
  0x17   :  { %248 = vmatprep.subr.mxu0 %v1076_v0  ;;  %1022 = vmatprep.subr.mxu1 %v1076_v0  ;;  %v169_v2 = vld [vmem:[%s1751_s0 + $0x2b8] sm:$0xff]  ;;  %v100_v7 = vld [vmem:[%s1751_s0 + $0x90] sm:$0xff] }
  0x18   :  { %249 = vmatpush1.msra.mxu0 %v182_v12  ;;  %1054 = vmatpush1.msra.mxu1 %v182_v12  ;;  %v101_v4 = vld [vmem:[%s1751_s0 + $0x98] sm:$0xff]  ;;  %v172_v8 = vld [vmem:[%s1751_s0 + $0x2d0] sm:$0xff] }
  0x19   :  { %250 = vmatprep.subr.mxu0 %v1076_v0  ;;  %1023 = vmatprep.subr.mxu1 %v1076_v0  ;;  %v173_v6 = vld [vmem:[%s1751_s0 + $0x2d8] sm:$0xff]  ;;  %v104_v10 = vld [vmem:[%s1751_s0 + $0xb0] sm:$0xff] }
  0x1a   :  { %251 = vmatpush1.msra.mxu0 %v181_v13  ;;  %1055 = vmatpush1.msra.mxu1 %v181_v13  ;;  %v213_v9 = vld [vmem:[%s1750_s1 + $0x118] sm:$0xff]  ;;  %v212_v11 = vld [vmem:[%s1750_s1 + $0x110] sm:$0xff]  ;;  %v103_v13 = vld [vmem:[%s1751_s0 + $0xa8] sm:$0xff] }
  0x1b   :  { %252 = vmatprep.subr.mxu0 %v1076_v0  ;;  %1024 = vmatprep.subr.mxu1 %v1076_v0  ;;  %v176_v12 = vld [vmem:[%s1751_s0 + $0x2f0] sm:$0xff] }
  0x1c   :  { %253 = vmatpush1.msra.mxu0 %v180_v14  ;;  %1056 = vmatpush1.msra.mxu1 %v180_v14  ;;  %v175_v14 = vld [vmem:[%s1751_s0 + $0x2e8] sm:$0xff] }
  0x1d   :  { %254 = vmatprep.subr.mxu0 %v1076_v0  ;;  %1025 = vmatprep.subr.mxu1 %v1076_v0 }
  0x1e   :  { %255 = vmatpush1.msra.mxu0 %v179_v15  ;;  %1057 = vmatpush1.msra.mxu1 %v179_v15  ;;  %v211_v15 = vld [vmem:[%s1750_s1 + $0x108] sm:$0xff] }
  0x1f   :  { %256 = vmatprep.subr.mxu0 %v1076_v0  ;;  %1026 = vmatprep.subr.mxu1 %v1076_v0 }
  0x20   :  { %257 = vmatpush1.msra.mxu0 %v178_v16  ;;  %1058 = vmatpush1.msra.mxu1 %v178_v16  ;;  %v107_v16 = vld [vmem:[%s1751_s0 + $0xc8] sm:$0xff] }
  0x21   :  { %258 = vmatprep.subr.mxu0 %v1076_v0  ;;  %1027 = vmatprep.subr.mxu1 %v1076_v0 }
  0x22   :  { %259 = vmatpush2.msra.mxu0 %v209_v17  ;;  %1059 = vmatpush2.msra.mxu1 %v209_v17  ;;  %v210_v17 = vld [vmem:[%s1750_s1 + $0x100] sm:$0xff] }
  0x23   :  { %260 = vmatprep.subr.mxu0 %v1076_v0  ;;  %1028 = vmatprep.subr.mxu1 %v1076_v0 }
  0x24   :  { %261 = vmatpush2.msra.mxu0 %v208_v18  ;;  %1060 = vmatpush2.msra.mxu1 %v208_v18  ;;  %v84_v18 = vld [vmem:[%s1751_s0 + $0x10] sm:$0xff] }
  0x25   :  { %262 = vmatprep.subr.mxu0 %v1076_v0  ;;  %1029 = vmatprep.subr.mxu1 %v1076_v0 }
  0x26   :  { %263 = vmatpush2.msra.mxu0 %v207_v19  ;;  %1061 = vmatpush2.msra.mxu1 %v207_v19  ;;  %v106_v19 = vld [vmem:[%s1751_s0 + $0xc0] sm:$0xff] }
  0x27   :  { %264 = vmatprep.subr.mxu0 %v1076_v0  ;;  %1030 = vmatprep.subr.mxu1 %v1076_v0 }
  0x28   :  { %265 = vmatpush2.msra.mxu0 %v206_v20  ;;  %1062 = vmatpush2.msra.mxu1 %v206_v20  ;;  %v87_v20 = vld [vmem:[%s1751_s0 + $0x28] sm:$0xff] }
  0x29   :  { %266 = vmatprep.subr.mxu0 %v1076_v0  ;;  %1031 = vmatprep.subr.mxu1 %v1076_v0 }
  0x2a   :  { %267 = vmatpush2.msra.mxu0 %v205_v21  ;;  %1063 = vmatpush2.msra.mxu1 %v205_v21  ;;  %v110_v21 = vld [vmem:[%s1751_s0 + $0xe0] sm:$0xff] }
  0x2b   :  { %268 = vmatprep.subr.mxu0 %v1076_v0  ;;  %1032 = vmatprep.subr.mxu1 %v1076_v0 }
  0x2c   :  { %269 = vmatpush2.msra.mxu0 %v204_v22  ;;  %1064 = vmatpush2.msra.mxu1 %v204_v22  ;;  %v90_v22 = vld [vmem:[%s1751_s0 + $0x40] sm:$0xff] }
  0x2d   :  { %270 = vmatprep.subr.mxu0 %v1076_v0  ;;  %1033 = vmatprep.subr.mxu1 %v1076_v0 }
  0x2e   :  { %271 = vmatpush2.msra.mxu0 %v203_v23  ;;  %1065 = vmatpush2.msra.mxu1 %v203_v23  ;;  %v109_v23 = vld [vmem:[%s1751_s0 + $0xd8] sm:$0xff] }
  0x2f   :  { %272 = vmatprep.subr.mxu0 %v1076_v0  ;;  %1034 = vmatprep.subr.mxu1 %v1076_v0 }
  0x30   :  { %273 = vmatpush2.msra.mxu0 %v202_v24  ;;  %1066 = vmatpush2.msra.mxu1 %v202_v24  ;;  %v93_v24 = vld [vmem:[%s1751_s0 + $0x58] sm:$0xff] }
  0x31   :  { %274 = vmatprep.subr.mxu0 %v1076_v0  ;;  %1035 = vmatprep.subr.mxu1 %v1076_v0 }
  0x32   :  { %275 = vmatpush2.msra.mxu0 %v201_v25  ;;  %1067 = vmatpush2.msra.mxu1 %v201_v25  ;;  %v113_v25 = vld [vmem:[%s1751_s0 + $0xf8] sm:$0xff] }
  0x33   :  { %276 = vmatprep.subr.mxu0 %v1076_v0  ;;  %1036 = vmatprep.subr.mxu1 %v1076_v0 }
  0x34   :  { %277 = vmatpush2.msra.mxu0 %v200_v26  ;;  %1068 = vmatpush2.msra.mxu1 %v200_v26  ;;  %v96_v26 = vld [vmem:[%s1751_s0 + $0x70] sm:$0xff] }
  0x35   :  { %278 = vmatprep.subr.mxu0 %v1076_v0  ;;  %1037 = vmatprep.subr.mxu1 %v1076_v0 }
  0x36   :  { %279 = vmatpush2.msra.mxu0 %v199_v27  ;;  %1069 = vmatpush2.msra.mxu1 %v199_v27  ;;  %v112_v27 = vld [vmem:[%s1751_s0 + $0xf0] sm:$0xff] }
  0x37   :  { %280 = vmatprep.subr.mxu0 %v1076_v0  ;;  %1038 = vmatprep.subr.mxu1 %v1076_v0 }
  0x38   :  { %281 = vmatpush2.msra.mxu0 %v198_v28  ;;  %1070 = vmatpush2.msra.mxu1 %v198_v28  ;;  %v99_v28 = vld [vmem:[%s1751_s0 + $0x88] sm:$0xff] }
  0x39   :  { %282 = vmatprep.subr.mxu0 %v1076_v0  ;;  %1039 = vmatprep.subr.mxu1 %v1076_v0 }
  0x3a   :  { %283 = vmatpush2.msra.mxu0 %v197_v29  ;;  %1071 = vmatpush2.msra.mxu1 %v197_v29  ;;  %v116_v29 = vld [vmem:[%s1751_s0 + $0x110] sm:$0xff] }
  0x3b   :  { %284 = vmatprep.subr.mxu0 %v1076_v0  ;;  %1040 = vmatprep.subr.mxu1 %v1076_v0 }
  0x3c   :  { %285 = vmatpush2.msra.mxu0 %v196_v30  ;;  %1072 = vmatpush2.msra.mxu1 %v196_v30  ;;  %v102_v30 = vld [vmem:[%s1751_s0 + $0xa0] sm:$0xff] }
  0x3d   :  { %286 = vmatprep.subr.mxu0 %v1076_v0  ;;  %1041 = vmatprep.subr.mxu1 %v1076_v0 }
  0x3e   :  { %287 = vmatpush2.msra.mxu0 %v195_v31  ;;  %1073 = vmatpush2.msra.mxu1 %v195_v31  ;;  %v115_v31 = vld [vmem:[%s1751_s0 + $0x108] sm:$0xff] }
  0x3f   :  { %288 = vmatprep.subr.mxu0 %v1076_v0  ;;  %1042 = vmatprep.subr.mxu1 %v1076_v0  ;;  %v170_v0 = vld [vmem:[%s1751_s0 + $0x2c0] sm:$0xff] }
  0x40   :  { %289 = vmatpush2.msra.mxu0 %v194_v32  ;;  %1074 = vmatpush2.msra.mxu1 %v194_v32  ;;  %v105_v32 = vld [vmem:[%s1751_s0 + $0xb8] sm:$0xff] }
  0x41   :  { %290 = vmatprep.mubr.f32.mxu0 %v83_v33  ;;  %410 = vmatprep.mubr.f32.mxu1 %v155_v34  ;;  %v119_v33 = vld [vmem:[%s1751_s0 + $0x128] sm:$0xff]  ;;  %v108_v34 = vld [vmem:[%s1751_s0 + $0xd0] sm:$0xff] }
  0x42   :  { %291 = vmatmul.mubr.f32.vlgmr.msra.gmra.mxu0 %v82_v35  ;;  %411 = vmatmul.mubr.f32.vlgmr.msra.gmra.mxu1 %v154_v36  ;;  %v118_v35 = vld [vmem:[%s1751_s0 + $0x120] sm:$0xff]  ;;  %v111_v36 = vld [vmem:[%s1751_s0 + $0xe8] sm:$0xff] }
  0x43   :  { %931 = vmatprep.subr.mxu1 %v225_v37  ;;  %295 = vmatprep.mubr.f32.mxu0 %v86_v38  ;;  %v114_v38 = vld [vmem:[%s1751_s0 + $0x100] sm:$0xff] }
  0x44   :  { %932 = vmatpush3.msra.mxu1 %v225_v37  ;;  %415 = vmatprep.mubr.f32.mxu1 %v158_v39  ;;  %v122_v37 = vld [vmem:[%s1751_s0 + $0x140] sm:$0xff]  ;;  %v121_v39 = vld [vmem:[%s1751_s0 + $0x138] sm:$0xff] }
  0x45   :  { %933 = vmatprep.subr.mxu1 %v224_v40 }
  0x46   :  { %934 = vmatpush3.msra.mxu1 %v224_v40  ;;  %296 = vmatmul.mubr.f32.gmra.mxu0 %v85_v41  ;;  %v117_v40 = vld [vmem:[%s1751_s0 + $0x118] sm:$0xff] }
  0x47   :  { %416 = vmatmul.mubr.f32.gmra.mxu1 %v157_v42  ;;  %935 = vmatprep.subr.mxu1 %v223_v43  ;;  %v125_v41 = vld [vmem:[%s1751_s0 + $0x158] sm:$0xff]  ;;  %v120_v42 = vld [vmem:[%s1751_s0 + $0x130] sm:$0xff] }
  0x48   :  { %936 = vmatpush3.msra.mxu1 %v223_v43  ;;  %300 = vmatprep.mubr.f32.mxu0 %v89_v44  ;;  %v124_v43 = vld [vmem:[%s1751_s0 + $0x150] sm:$0xff]  ;;  %v123_v44 = vld [vmem:[%s1751_s0 + $0x148] sm:$0xff] }
  0x49   :  { %937 = vmatprep.subr.mxu1 %v222_v45  ;;  %420 = vmatprep.mubr.f32.mxu1 %v161_v46  ;;  %v126_v46 = vld [vmem:[%s1751_s0 + $0x160] sm:$0xff] }
  0x4a   :  { %938 = vmatpush3.msra.mxu1 %v222_v45  ;;  %301 = vmatmul.mubr.f32.gmra.mxu0 %v88_v47  ;;  %v128_v45 = vld [vmem:[%s1751_s0 + $0x170] sm:$0xff]  ;;  %v127_v47 = vld [vmem:[%s1751_s0 + $0x168] sm:$0xff] }
  0x4b   :  { %421 = vmatmul.mubr.f32.gmra.mxu1 %v160_v48  ;;  %939 = vmatprep.subr.mxu1 %v221_v49  ;;  %v129_v48 = vld [vmem:[%s1751_s0 + $0x178] sm:$0xff] }
  0x4c   :  { %940 = vmatpush3.msra.mxu1 %v221_v49  ;;  %305 = vmatprep.mubr.f32.mxu0 %v92_v50  ;;  %v131_v49 = vld [vmem:[%s1751_s0 + $0x188] sm:$0xff]  ;;  %v132_v50 = vld [vmem:[%s1751_s0 + $0x190] sm:$0xff] }
  0x4d   :  { %941 = vmatprep.subr.mxu1 %v220_v51  ;;  %425 = vmatprep.mubr.f32.mxu1 %v164_v52  ;;  %v135_v52 = vld [vmem:[%s1751_s0 + $0x1a8] sm:$0xff] }
  0x4e   :  { %942 = vmatpush3.msra.mxu1 %v220_v51  ;;  %306 = vmatmul.mubr.f32.gmra.mxu0 %v91_v53  ;;  %v130_v51 = vld [vmem:[%s1751_s0 + $0x180] sm:$0xff] }
  0x4f   :  { %426 = vmatmul.mubr.f32.gmra.mxu1 %v163_v54  ;;  %943 = vmatprep.subr.mxu1 %v219_v55  ;;  %v134_v53 = vld [vmem:[%s1751_s0 + $0x1a0] sm:$0xff] }
  0x50   :  { %944 = vmatpush3.msra.mxu1 %v219_v55  ;;  %310 = vmatprep.mubr.f32.mxu0 %v95_v56  ;;  %v138_v54 = vld [vmem:[%s1751_s0 + $0x1c0] sm:$0xff]  ;;  %v133_v55 = vld [vmem:[%s1751_s0 + $0x198] sm:$0xff] }
  0x51   :  { %945 = vmatprep.subr.mxu1 %v218_v57  ;;  %430 = vmatprep.mubr.f32.mxu1 %v167_v58  ;;  %v141_v56 = vld [vmem:[%s1751_s0 + $0x1d8] sm:$0xff]  ;;  %v144_v58 = vld [vmem:[%s1751_s0 + $0x1f0] sm:$0xff] }
  0x52   :  { %946 = vmatpush3.msra.mxu1 %v218_v57  ;;  %311 = vmatmul.mubr.f32.gmra.mxu0 %v94_v59  ;;  %v137_v57 = vld [vmem:[%s1751_s0 + $0x1b8] sm:$0xff]  ;;  %v136_v59 = vld [vmem:[%s1751_s0 + $0x1b0] sm:$0xff] }
  0x53   :  { %431 = vmatmul.mubr.f32.gmra.mxu1 %v166_v60  ;;  %947 = vmatprep.subr.mxu1 %v217_v61  ;;  %v147_v60 = vld [vmem:[%s1751_s0 + $0x208] sm:$0xff] }
  0x54   :  { %948 = vmatpush3.msra.mxu1 %v217_v61  ;;  %315 = vmatprep.mubr.f32.mxu0 %v98_v62  ;;  %v140_v61 = vld [vmem:[%s1751_s0 + $0x1d0] sm:$0xff]  ;;  %v150_v62 = vld [vmem:[%s1751_s0 + $0x220] sm:$0xff] }
  0x55   :  { %949 = vmatprep.subr.mxu1 %v216_v63  ;;  %435 = vmatprep.mubr.f32.mxu1 %v170_v0  ;;  %v153_v0 = vld [vmem:[%s1751_s0 + $0x238] sm:$0xff] }
  0x56   :  { %950 = vmatpush3.msra.mxu1 %v216_v63  ;;  %316 = vmatmul.mubr.f32.gmra.mxu0 %v97_v1  ;;  %v139_v63 = vld [vmem:[%s1751_s0 + $0x1c8] sm:$0xff] }
  0x57   :  { %436 = vmatmul.mubr.f32.gmra.mxu1 %v169_v2  ;;  %951 = vmatprep.subr.mxu1 %v215_v3  ;;  %v143_v1 = vld [vmem:[%s1751_s0 + $0x1e8] sm:$0xff]  ;;  %v156_v2 = vld [vmem:[%s1751_s0 + $0x250] sm:$0xff] }
  0x58   :  { %952 = vmatpush3.msra.mxu1 %v215_v3  ;;  %320 = vmatprep.mubr.f32.mxu0 %v101_v4  ;;  %v142_v3 = vld [vmem:[%s1751_s0 + $0x1e0] sm:$0xff]  ;;  %v159_v4 = vld [vmem:[%s1751_s0 + $0x268] sm:$0xff] }
  0x59   :  { %953 = vmatprep.subr.mxu1 %v214_v5  ;;  %440 = vmatprep.mubr.f32.mxu1 %v173_v6  ;;  %v162_v6 = vld [vmem:[%s1751_s0 + $0x280] sm:$0xff] }
  0x5a   :  { %954 = vmatpush3.msra.mxu1 %v214_v5  ;;  %321 = vmatmul.mubr.f32.gmra.mxu0 %v100_v7  ;;  %v146_v5 = vld [vmem:[%s1751_s0 + $0x200] sm:$0xff]  ;;  %v145_v7 = vld [vmem:[%s1751_s0 + $0x1f8] sm:$0xff] }
  0x5b   :  { %441 = vmatmul.mubr.f32.gmra.mxu1 %v172_v8  ;;  %955 = vmatprep.subr.mxu1 %v213_v9  ;;  %v165_v8 = vld [vmem:[%s1751_s0 + $0x298] sm:$0xff] }
  0x5c   :  { %956 = vmatpush3.msra.mxu1 %v213_v9  ;;  %325 = vmatprep.mubr.f32.mxu0 %v104_v10  ;;  %v149_v9 = vld [vmem:[%s1751_s0 + $0x218] sm:$0xff]  ;;  %v168_v10 = vld [vmem:[%s1751_s0 + $0x2b0] sm:$0xff] }
  0x5d   :  { %957 = vmatprep.subr.mxu1 %v212_v11  ;;  %445 = vmatprep.mubr.f32.mxu1 %v176_v12  ;;  %v171_v12 = vld [vmem:[%s1751_s0 + $0x2c8] sm:$0xff] }
  0x5e   :  { %958 = vmatpush3.msra.mxu1 %v212_v11  ;;  %326 = vmatmul.mubr.f32.gmra.mxu0 %v103_v13  ;;  %v148_v11 = vld [vmem:[%s1751_s0 + $0x210] sm:$0xff] }
  0x5f   :  { %446 = vmatmul.mubr.f32.gmra.mxu1 %v175_v14  ;;  %959 = vmatprep.subr.mxu1 %v211_v15  ;;  %v152_v13 = vld [vmem:[%s1751_s0 + $0x230] sm:$0xff]  ;;  %v174_v14 = vld [vmem:[%s1751_s0 + $0x2e0] sm:$0xff] }
  0x60   :  { %960 = vmatpush3.msra.mxu1 %v211_v15  ;;  %330 = vmatprep.mubr.f32.mxu0 %v107_v16  ;;  %v151_v15 = vld [vmem:[%s1751_s0 + $0x228] sm:$0xff]  ;;  %v177_v16 = vld [vmem:[%s1751_s0 + $0x2f8] sm:$0xff] }
  0x61   :  { %961 = vmatprep.subr.mxu1 %v210_v17  ;;  %963 = vmatprep.mubr.f32.mxu1 %v84_v18 }
  0x62   :  { %962 = vmatpush3.msra.mxu1 %v210_v17  ;;  %331 = vmatmul.mubr.f32.gmra.mxu0 %v106_v19 }
  0x63   :  { %964 = vmatmul.mubr.f32.vlgmr.msra.gmra.mxu1 %v87_v20  ;;  %335 = vmatprep.mubr.f32.mxu0 %v110_v21 }
  0x64   :  { %966 = vmatprep.mubr.f32.mxu1 %v90_v22 }
  0x66   :  { %336 = vmatmul.mubr.f32.gmra.mxu0 %v109_v23 }
  0x67   :  { %967 = vmatmul.mubr.f32.gmra.mxu1 %v93_v24  ;;  %340 = vmatprep.mubr.f32.mxu0 %v113_v25 }
  0x68   :  { %969 = vmatprep.mubr.f32.mxu1 %v96_v26 }
  0x6a   :  { %341 = vmatmul.mubr.f32.gmra.mxu0 %v112_v27 }
  0x6b   :  { %970 = vmatmul.mubr.f32.gmra.mxu1 %v99_v28  ;;  %345 = vmatprep.mubr.f32.mxu0 %v116_v29 }
  0x6c   :  { %972 = vmatprep.mubr.f32.mxu1 %v102_v30 }
  0x6e   :  { %346 = vmatmul.mubr.f32.gmra.mxu0 %v115_v31 }
  0x6f   :  { %973 = vmatmul.mubr.f32.gmra.mxu1 %v105_v32  ;;  %350 = vmatprep.mubr.f32.mxu0 %v119_v33 }
  0x70   :  { %975 = vmatprep.mubr.f32.mxu1 %v108_v34 }
  0x72   :  { %351 = vmatmul.mubr.f32.gmra.mxu0 %v118_v35 }
  0x73   :  { %976 = vmatmul.mubr.f32.gmra.mxu1 %v111_v36  ;;  %355 = vmatprep.mubr.f32.mxu0 %v122_v37 }
  0x74   :  { %978 = vmatprep.mubr.f32.mxu1 %v114_v38 }
  0x76   :  { %356 = vmatmul.mubr.f32.gmra.mxu0 %v121_v39 }
  0x77   :  { %979 = vmatmul.mubr.f32.gmra.mxu1 %v117_v40  ;;  %360 = vmatprep.mubr.f32.mxu0 %v125_v41 }
  0x78   :  { %981 = vmatprep.mubr.f32.mxu1 %v120_v42 }
  0x7a   :  { %361 = vmatmul.mubr.f32.gmra.mxu0 %v124_v43 }
  0x7b   :  { %982 = vmatmul.mubr.f32.gmra.mxu1 %v123_v44  ;;  %365 = vmatprep.mubr.f32.mxu0 %v128_v45 }
  0x7c   :  { %984 = vmatprep.mubr.f32.mxu1 %v126_v46 }
  0x7e   :  { %366 = vmatmul.mubr.f32.gmra.mxu0 %v127_v47 }
  0x7f   :  { %985 = vmatmul.mubr.f32.gmra.mxu1 %v129_v48  ;;  %370 = vmatprep.mubr.f32.mxu0 %v131_v49 }
  0x80   :  { %987 = vmatprep.mubr.f32.mxu1 %v132_v50 }
  0x82   :  { %371 = vmatmul.mubr.f32.gmra.mxu0 %v130_v51  ;;  %v1612_v51 = vld [vmem:[%s1752_s2] ss:$0 sm:$0xff] }
  0x83   :  { %988 = vmatmul.mubr.f32.gmra.mxu1 %v135_v52  ;;  %375 = vmatprep.mubr.f32.mxu0 %v134_v53 }
  0x84   :  { %990 = vmatprep.mubr.f32.mxu1 %v138_v54 }
  0x86   :  { %376 = vmatmul.mubr.f32.gmra.mxu0 %v133_v55 }
  0x87   :  { %991 = vmatmul.mubr.f32.gmra.mxu1 %v141_v56  ;;  %380 = vmatprep.mubr.f32.mxu0 %v137_v57 }
  0x88   :  { %993 = vmatprep.mubr.f32.mxu1 %v144_v58 }
  0x8a   :  { %381 = vmatmul.mubr.f32.gmra.mxu0 %v136_v59 }
  0x8b   :  { %994 = vmatmul.mubr.f32.gmra.mxu1 %v147_v60  ;;  %385 = vmatprep.mubr.f32.mxu0 %v140_v61 }
  0x8c   :  { %996 = vmatprep.mubr.f32.mxu1 %v150_v62 }
  0x8e   :  { %386 = vmatmul.mubr.f32.gmra.mxu0 %v139_v63 }
  0x8f   :  { %997 = vmatmul.mubr.f32.gmra.mxu1 %v153_v0  ;;  %390 = vmatprep.mubr.f32.mxu0 %v143_v1 }
  0x90   :  { %999 = vmatprep.mubr.f32.mxu1 %v156_v2 }
  0x92   :  { %391 = vmatmul.mubr.f32.gmra.mxu0 %v142_v3 }
  0x93   :  { %1000 = vmatmul.mubr.f32.gmra.mxu1 %v159_v4  ;;  %395 = vmatprep.mubr.f32.mxu0 %v146_v5 }
  0x94   :  { %1002 = vmatprep.mubr.f32.mxu1 %v162_v6 }
  0x96   :  { %396 = vmatmul.mubr.f32.gmra.mxu0 %v145_v7 }
  0x97   :  { %1003 = vmatmul.mubr.f32.gmra.mxu1 %v165_v8  ;;  %400 = vmatprep.mubr.f32.mxu0 %v149_v9 }
  0x98   :  { %1005 = vmatprep.mubr.f32.mxu1 %v168_v10 }
  0x9a   :  { %401 = vmatmul.mubr.f32.gmra.mxu0 %v148_v11 }
  0x9b   :  { %1006 = vmatmul.mubr.f32.gmra.mxu1 %v171_v12  ;;  %405 = vmatprep.mubr.f32.mxu0 %v152_v13 }
  0x9c   :  { %1008 = vmatprep.mubr.f32.mxu1 %v174_v14 }
  0x9e   :  { %406 = vmatmul.mubr.f32.gmra.mxu0 %v151_v15 }
  0x9f   :  { %1009 = vmatmul.mubr.f32.gmra.mxu1 %v177_v16 }
 0x102   :  { %v292_v17 = vpop.f32.mrf.mxu0  ;;  %v1593_v18 = vpop.f32.mrf.mxu1 }
 0x104   :  { %v294_v19 = vpop.f32.mrf.mxu0  ;;  %v414_v20 = vpop.f32.mrf.mxu1 }
 0x106   :  { %v297_v21 = vpop.f32.mrf.mxu0 }
 0x107   :  { %v1595_v22 = vpop.f32.mrf.mxu1 }
 0x108   :  { %v299_v23 = vpop.f32.mrf.mxu0 }
 0x109   :  { %v419_v24 = vpop.f32.mrf.mxu1 }
 0x10a   :  { %v302_v25 = vpop.f32.mrf.mxu0 }
 0x10b   :  { %v1597_v26 = vpop.f32.mrf.mxu1 }
 0x10c   :  { %v304_v27 = vpop.f32.mrf.mxu0 }
 0x10d   :  { %v424_v28 = vpop.f32.mrf.mxu1 }
 0x10e   :  { %v307_v29 = vpop.f32.mrf.mxu0 }
 0x10f   :  { %v1599_v30 = vpop.f32.mrf.mxu1 }
 0x110   :  { %v309_v31 = vpop.f32.mrf.mxu0 }
 0x111   :  { %v429_v32 = vpop.f32.mrf.mxu1 }
 0x112   :  { %v312_v33 = vpop.f32.mrf.mxu0 }
 0x113   :  { %v1601_v34 = vpop.f32.mrf.mxu1 }
 0x114   :  { %v314_v35 = vpop.f32.mrf.mxu0 }
 0x115   :  { %v434_v36 = vpop.f32.mrf.mxu1 }
 0x116   :  { %v317_v37 = vpop.f32.mrf.mxu0 }
 0x117   :  { %v1603_v38 = vpop.f32.mrf.mxu1 }
 0x118   :  { %v319_v39 = vpop.f32.mrf.mxu0 }
 0x119   :  { %v439_v40 = vpop.f32.mrf.mxu1 }
 0x11a   :  { %v322_v41 = vpop.f32.mrf.mxu0 }
 0x11b   :  { %v1605_v42 = vpop.f32.mrf.mxu1 }
 0x11c   :  { %v324_v43 = vpop.f32.mrf.mxu0 }
 0x11d   :  { %v444_v44 = vpop.f32.mrf.mxu1 }
 0x11e   :  { %v327_v45 = vpop.f32.mrf.mxu0 }
 0x11f   :  { %v1607_v46 = vpop.f32.mrf.mxu1 }
 0x120   :  { %v329_v47 = vpop.f32.mrf.mxu0 }
 0x121   :  { %v449_v48 = vpop.f32.mrf.mxu1 }
 0x122   :  { %v332_v49 = vpop.f32.mrf.mxu0 }
 0x123   :  { %v965_v50 = vpop.f32.mrf.mxu1 }
 0x124   :  { %v523_v52 = vadd.f32 %v965_v50, %v297_v21  ;;  %v334_v53 = vpop.f32.mrf.mxu0 }
 0x125   :  { %v517_v54 = vpop.f32.mrf.mxu1 }
 0x126   :  { %v783_v55 = vadd.f32 %v1612_v51, %v523_v52  ;;  %v518_v56 = vadd.f32 %v517_v54, %v292_v17  ;;  %v337_v57 = vpop.f32.mrf.mxu0 }
 0x127   :  { %v968_v58 = vpop.f32.mrf.mxu1 }
 0x128   :  { %v815_v59 = vmax.f32 %v783_v55, 0.0  ;;  %v782_v60 = vadd.f32 %v1612_v51, %v518_v56  ;;  %v533_v61 = vadd.f32 %v968_v58, %v307_v29  ;;  %v339_v62 = vpop.f32.mrf.mxu0 }
 0x129   :  { %v527_v63 = vpop.f32.mrf.mxu1 }
 0x12a   :  { %847 = vst [vmem:[%s1753_s3 + $0x8] sm:$0xff] %v815_v59  ;;  %v814_v0 = vmax.f32 %v782_v60, 0.0  ;;  %v785_v1 = vadd.f32 %v1612_v51, %v533_v61  ;;  %v528_v2 = vadd.f32 %v527_v63, %v302_v25  ;;  %v342_v3 = vpop.f32.mrf.mxu0 }
 0x12b   :  { %v971_v4 = vpop.f32.mrf.mxu1 }
 0x12c   :  { %846 = vst [vmem:[%s1753_s3] sm:$0xff] %v814_v0  ;;  %v817_v5 = vmax.f32 %v785_v1, 0.0  ;;  %v784_v6 = vadd.f32 %v1612_v51, %v528_v2  ;;  %v543_v7 = vadd.f32 %v971_v4, %v317_v37  ;;  %v344_v8 = vpop.f32.mrf.mxu0 }
 0x12d   :  { %v537_v9 = vpop.f32.mrf.mxu1 }
 0x12e   :  { %849 = vst [vmem:[%s1753_s3 + $0x18] sm:$0xff] %v817_v5  ;;  %v816_v10 = vmax.f32 %v784_v6, 0.0  ;;  %v787_v11 = vadd.f32 %v1612_v51, %v543_v7  ;;  %v538_v12 = vadd.f32 %v537_v9, %v312_v33  ;;  %v347_v13 = vpop.f32.mrf.mxu0 }
 0x12f   :  { %v974_v14 = vpop.f32.mrf.mxu1 }
 0x130   :  { %848 = vst [vmem:[%s1753_s3 + $0x10] sm:$0xff] %v816_v10  ;;  %v819_v15 = vmax.f32 %v787_v11, 0.0  ;;  %v786_v16 = vadd.f32 %v1612_v51, %v538_v12  ;;  %v553_v17 = vadd.f32 %v974_v14, %v327_v45  ;;  %v349_v19 = vpop.f32.mrf.mxu0 }
 0x131   :  { %v547_v20 = vpop.f32.mrf.mxu1 }
 0x132   :  { %851 = vst [vmem:[%s1753_s3 + $0x28] sm:$0xff] %v819_v15  ;;  %v818_v21 = vmax.f32 %v786_v16, 0.0  ;;  %v789_v23 = vadd.f32 %v1612_v51, %v553_v17  ;;  %v548_v24 = vadd.f32 %v547_v20, %v322_v41  ;;  %v352_v25 = vpop.f32.mrf.mxu0 }
 0x133   :  { %v977_v27 = vpop.f32.mrf.mxu1 }
 0x134   :  { %850 = vst [vmem:[%s1753_s3 + $0x20] sm:$0xff] %v818_v21  ;;  %v821_v28 = vmax.f32 %v789_v23, 0.0  ;;  %v788_v29 = vadd.f32 %v1612_v51, %v548_v24  ;;  %v563_v31 = vadd.f32 %v977_v27, %v337_v57  ;;  %v354_v32 = vpop.f32.mrf.mxu0 }
 0x135   :  { %v557_v33 = vpop.f32.mrf.mxu1 }
 0x136   :  { %853 = vst [vmem:[%s1753_s3 + $0x38] sm:$0xff] %v821_v28  ;;  %v820_v35 = vmax.f32 %v788_v29, 0.0  ;;  %v791_v36 = vadd.f32 %v1612_v51, %v563_v31  ;;  %v558_v37 = vadd.f32 %v557_v33, %v332_v49  ;;  %v357_v39 = vpop.f32.mrf.mxu0 }
 0x137   :  { %v980_v40 = vpop.f32.mrf.mxu1 }
 0x138   :  { %852 = vst [vmem:[%s1753_s3 + $0x30] sm:$0xff] %v820_v35  ;;  %v823_v41 = vmax.f32 %v791_v36, 0.0  ;;  %v790_v43 = vadd.f32 %v1612_v51, %v558_v37  ;;  %v573_v44 = vadd.f32 %v980_v40, %v347_v13  ;;  %v359_v45 = vpop.f32.mrf.mxu0 }
 0x139   :  { %v567_v47 = vpop.f32.mrf.mxu1 }
 0x13a   :  { %855 = vst [vmem:[%s1753_s3 + $0x48] sm:$0xff] %v823_v41  ;;  %v822_v48 = vmax.f32 %v790_v43, 0.0  ;;  %v793_v50 = vadd.f32 %v1612_v51, %v573_v44  ;;  %v568_v49 = vadd.f32 %v567_v47, %v342_v3  ;;  %v362_v52 = vpop.f32.mrf.mxu0 }
 0x13b   :  { %v983_v53 = vpop.f32.mrf.mxu1 }
 0x13c   :  { %854 = vst [vmem:[%s1753_s3 + $0x40] sm:$0xff] %v822_v48  ;;  %v825_v54 = vmax.f32 %v793_v50, 0.0  ;;  %v792_v55 = vadd.f32 %v1612_v51, %v568_v49  ;;  %v583_v56 = vadd.f32 %v983_v53, %v357_v39  ;;  %v364_v57 = vpop.f32.mrf.mxu0 }
 0x13d   :  { %v577_v58 = vpop.f32.mrf.mxu1 }
 0x13e   :  { %857 = vst [vmem:[%s1753_s3 + $0x58] sm:$0xff] %v825_v54  ;;  %v824_v59 = vmax.f32 %v792_v55, 0.0  ;;  %v795_v60 = vadd.f32 %v1612_v51, %v583_v56  ;;  %v578_v61 = vadd.f32 %v577_v58, %v352_v25  ;;  %v367_v62 = vpop.f32.mrf.mxu0 }
 0x13f   :  { %v986_v63 = vpop.f32.mrf.mxu1 }
 0x140   :  { %856 = vst [vmem:[%s1753_s3 + $0x50] sm:$0xff] %v824_v59  ;;  %v827_v0 = vmax.f32 %v795_v60, 0.0  ;;  %v794_v1 = vadd.f32 %v1612_v51, %v578_v61  ;;  %v593_v2 = vadd.f32 %v986_v63, %v367_v62  ;;  %v369_v3 = vpop.f32.mrf.mxu0 }
 0x141   :  { %v587_v4 = vpop.f32.mrf.mxu1 }
 0x142   :  { %859 = vst [vmem:[%s1753_s3 + $0x68] sm:$0xff] %v827_v0  ;;  %v826_v5 = vmax.f32 %v794_v1, 0.0  ;;  %v797_v6 = vadd.f32 %v1612_v51, %v593_v2  ;;  %v588_v7 = vadd.f32 %v587_v4, %v362_v52  ;;  %v372_v8 = vpop.f32.mrf.mxu0 }
 0x143   :  { %v989_v9 = vpop.f32.mrf.mxu1 }
 0x144   :  { %858 = vst [vmem:[%s1753_s3 + $0x60] sm:$0xff] %v826_v5  ;;  %v829_v10 = vmax.f32 %v797_v6, 0.0  ;;  %v796_v11 = vadd.f32 %v1612_v51, %v588_v7  ;;  %v374_v12 = vpop.f32.mrf.mxu0 }
 0x145   :  { %v597_v13 = vpop.f32.mrf.mxu1 }
 0x146   :  { %861 = vst [vmem:[%s1753_s3 + $0x78] sm:$0xff] %v829_v10  ;;  %v828_v14 = vmax.f32 %v796_v11, 0.0  ;;  %v598_v15 = vadd.f32 %v597_v13, %v372_v8  ;;  %v377_v16 = vpop.f32.mrf.mxu0 }
 0x147   :  { %v603_v17 = vadd.f32 %v989_v9, %v377_v16  ;;  %v992_v19 = vpop.f32.mrf.mxu1 }
 0x148   :  { %860 = vst [vmem:[%s1753_s3 + $0x70] sm:$0xff] %v828_v14  ;;  %v798_v20 = vadd.f32 %v1612_v51, %v598_v15  ;;  %v379_v21 = vpop.f32.mrf.mxu0 }
 0x149   :  { %v799_v23 = vadd.f32 %v1612_v51, %v603_v17  ;;  %v607_v24 = vpop.f32.mrf.mxu1 }
 0x14a   :  { %v830_v25 = vmax.f32 %v798_v20, 0.0  ;;  %v382_v27 = vpop.f32.mrf.mxu0 }
 0x14b   :  { %v831_v28 = vmax.f32 %v799_v23, 0.0  ;;  %v608_v29 = vadd.f32 %v607_v24, %v382_v27  ;;  %v995_v31 = vpop.f32.mrf.mxu1 }
 0x14c   :  { %862 = vst [vmem:[%s1753_s3 + $0x80] sm:$0xff] %v830_v25  ;;  %v384_v32 = vpop.f32.mrf.mxu0 }
 0x14d   :  { %863 = vst [vmem:[%s1753_s3 + $0x88] sm:$0xff] %v831_v28  ;;  %v800_v33 = vadd.f32 %v1612_v51, %v608_v29  ;;  %v617_v35 = vpop.f32.mrf.mxu1 }
 0x14e   :  { %v387_v36 = vpop.f32.mrf.mxu0 }
 0x14f   :  { %v832_v37 = vmax.f32 %v800_v33, 0.0  ;;  %v613_v39 = vadd.f32 %v992_v19, %v387_v36  ;;  %v998_v40 = vpop.f32.mrf.mxu1 }
 0x150   :  { %v389_v41 = vpop.f32.mrf.mxu0 }
 0x151   :  { %864 = vst [vmem:[%s1753_s3 + $0x90] sm:$0xff] %v832_v37  ;;  %v801_v43 = vadd.f32 %v1612_v51, %v613_v39  ;;  %v627_v44 = vpop.f32.mrf.mxu1 }
 0x152   :  { %v392_v45 = vpop.f32.mrf.mxu0 }
 0x153   :  { %v833_v47 = vmax.f32 %v801_v43, 0.0  ;;  %v618_v48 = vadd.f32 %v617_v35, %v392_v45  ;;  %v1001_v50 = vpop.f32.mrf.mxu1 }
 0x154   :  { %v643_v49 = vadd.f32 %v1001_v50, %v1595_v22  ;;  %v394_v52 = vpop.f32.mrf.mxu0 }
 0x155   :  { %865 = vst [vmem:[%s1753_s3 + $0x98] sm:$0xff] %v833_v47  ;;  %v802_v53 = vadd.f32 %v1612_v51, %v618_v48  ;;  %v637_v54 = vpop.f32.mrf.mxu1 }
 0x156   :  { %v807_v55 = vadd.f32 %v1612_v51, %v643_v49  ;;  %v638_v56 = vadd.f32 %v637_v54, %v1593_v18  ;;  %v397_v57 = vpop.f32.mrf.mxu0 }
 0x157   :  { %v834_v58 = vmax.f32 %v802_v53, 0.0  ;;  %v623_v59 = vadd.f32 %v995_v31, %v397_v57  ;;  %v1004_v60 = vpop.f32.mrf.mxu1 }
 0x158   :  { %v839_v61 = vmax.f32 %v807_v55, 0.0  ;;  %v806_v62 = vadd.f32 %v1612_v51, %v638_v56  ;;  %v653_v22 = vadd.f32 %v1004_v60, %v1599_v30  ;;  %v399_v63 = vpop.f32.mrf.mxu0 }
 0x159   :  { %866 = vst [vmem:[%s1753_s3 + $0xa0] sm:$0xff] %v834_v58  ;;  %v803_v0 = vadd.f32 %v1612_v51, %v623_v59  ;;  %v647_v1 = vpop.f32.mrf.mxu1 }
 0x15a   :  { %871 = vst [vmem:[%s1753_s3 + $0xc8] sm:$0xff] %v839_v61  ;;  %v838_v18 = vmax.f32 %v806_v62, 0.0  ;;  %v809_v2 = vadd.f32 %v1612_v51, %v653_v22  ;;  %v648_v3 = vadd.f32 %v647_v1, %v1597_v26  ;;  %v402_v4 = vpop.f32.mrf.mxu0 }
 0x15b   :  { %v835_v5 = vmax.f32 %v803_v0, 0.0  ;;  %v628_v30 = vadd.f32 %v627_v44, %v402_v4  ;;  %v1007_v6 = vpop.f32.mrf.mxu1 }
 0x15c   :  { %870 = vst [vmem:[%s1753_s3 + $0xc0] sm:$0xff] %v838_v18  ;;  %v841_v7 = vmax.f32 %v809_v2, 0.0  ;;  %v808_v8 = vadd.f32 %v1612_v51, %v648_v3  ;;  %v663_v9 = vadd.f32 %v1007_v6, %v1603_v38  ;;  %v404_v10 = vpop.f32.mrf.mxu0 }
 0x15d   :  { %867 = vst [vmem:[%s1753_s3 + $0xa8] sm:$0xff] %v835_v5  ;;  %v804_v26 = vadd.f32 %v1612_v51, %v628_v30  ;;  %v657_v11 = vpop.f32.mrf.mxu1 }
 0x15e   :  { %873 = vst [vmem:[%s1753_s3 + $0xd8] sm:$0xff] %v841_v7  ;;  %v840_v12 = vmax.f32 %v808_v8, 0.0  ;;  %v811_v13 = vadd.f32 %v1612_v51, %v663_v9  ;;  %v658_v14 = vadd.f32 %v657_v11, %v1601_v34  ;;  %v407_v15 = vpop.f32.mrf.mxu0 }
 0x15f   :  { %v836_v16 = vmax.f32 %v804_v26, 0.0  ;;  %v633_v38 = vadd.f32 %v998_v40, %v407_v15  ;;  %v1010_v17 = vpop.f32.mrf.mxu1 }
 0x160   :  { %872 = vst [vmem:[%s1753_s3 + $0xd0] sm:$0xff] %v840_v12  ;;  %v843_v19 = vmax.f32 %v811_v13, 0.0  ;;  %v810_v20 = vadd.f32 %v1612_v51, %v658_v14  ;;  %v673_v21 = vadd.f32 %v1010_v17, %v1607_v46  ;;  %v409_v23 = vpop.f32.mrf.mxu0 }
 0x161   :  { %868 = vst [vmem:[%s1753_s3 + $0xb0] sm:$0xff] %v836_v16  ;;  %v805_v34 = vadd.f32 %v1612_v51, %v633_v38  ;;  %v667_v24 = vpop.f32.mrf.mxu1 }
 0x162   :  { %875 = vst [vmem:[%s1753_s3 + $0xe8] sm:$0xff] %v843_v19  ;;  %v842_v25 = vmax.f32 %v810_v20, 0.0  ;;  %v813_v27 = vadd.f32 %v1612_v51, %v673_v21  ;;  %v668_v28 = vadd.f32 %v667_v24, %v1605_v42 }
 0x163   :  { %v837_v29 = vmax.f32 %v805_v34, 0.0 }
 0x164   :  { %874 = vst [vmem:[%s1753_s3 + $0xe0] sm:$0xff] %v842_v25  ;;  %v845_v46 = vmax.f32 %v813_v27, 0.0  ;;  %v812_v31 = vadd.f32 %v1612_v51, %v668_v28 }
 0x165   :  { %869 = vst [vmem:[%s1753_s3 + $0xb8] sm:$0xff] %v837_v29 }
 0x166   :  { %877 = vst [vmem:[%s1753_s3 + $0xf8] sm:$0xff] %v845_v46  ;;  %v844_v32 = vmax.f32 %v812_v31, 0.0 }
 0x168   :  { %876 = vst [vmem:[%s1753_s3 + $0xf0] sm:$0xff] %v844_v32 }

// kernel: edm_forward.29
= control target key start
LH: loop header
LB: loop body
LE: loop exit
PB: predicated region body
PF: predicated region fallthrough
CT: control target
= control target key end

     0   :  { %s766_s1 = inlined_call_operand.vmem [shape: f32[384,128], index: 1, kind: input, shape index: {}]   ;;  %s767_s0 = inlined_call_operand.vmem [shape: f32[64,384], index: 0, kind: input, shape index: {}]   ;;  %s768_s2 = inlined_call_operand.vmem [shape: f32[1,128], index: 2, kind: input, shape index: {}]   ;;  %s769_s3 = inlined_call_operand.vmem [shape: f32[64,128], index: 3, kind: output, shape index: {}]  }
   0x1   :  { %v89_v0 = vld [vmem:[%s766_s1 + $0xf8] sm:$0xff]  ;;  %v88_v2 = vld [vmem:[%s766_s1 + $0xf0] sm:$0xff]  ;;  %v87_v5 = vld [vmem:[%s766_s1 + $0xe8] sm:$0xff] }
   0x2   :  { %v73_v1 = vld [vmem:[%s766_s1 + $0x78] sm:$0xff]  ;;  %379 = vmatprep.subr.mxu0 %v89_v0  ;;  %v72_v4 = vld [vmem:[%s766_s1 + $0x70] sm:$0xff]  ;;  %v71_v7 = vld [vmem:[%s766_s1 + $0x68] sm:$0xff] }
   0x3   :  { %v105_v3 = vld [vmem:[%s766_s1 + $0x178] sm:$0xff]  ;;  %380 = vmatpush3.msra.mxu0 %v73_v1  ;;  %v104_v6 = vld [vmem:[%s766_s1 + $0x170] sm:$0xff]  ;;  %v103_v8 = vld [vmem:[%s766_s1 + $0x168] sm:$0xff] }
   0x4   :  { %459 = vmatprep.subr.mxu1 %v105_v3  ;;  %381 = vmatprep.subr.mxu0 %v88_v2  ;;  %v86_v9 = vld [vmem:[%s766_s1 + $0xe0] sm:$0xff]  ;;  %v85_v12 = vld [vmem:[%s766_s1 + $0xd8] sm:$0xff]  ;;  %v84_v15 = vld [vmem:[%s766_s1 + $0xd0] sm:$0xff] }
   0x5   :  { %460 = vmatpush3.msra.mxu1 %v105_v3  ;;  %382 = vmatpush3.msra.mxu0 %v72_v4  ;;  %v70_v10 = vld [vmem:[%s766_s1 + $0x60] sm:$0xff]  ;;  %v69_v13 = vld [vmem:[%s766_s1 + $0x58] sm:$0xff]  ;;  %v68_v16 = vld [vmem:[%s766_s1 + $0x50] sm:$0xff] }
   0x6   :  { %461 = vmatprep.subr.mxu1 %v104_v6  ;;  %383 = vmatprep.subr.mxu0 %v87_v5  ;;  %v102_v11 = vld [vmem:[%s766_s1 + $0x160] sm:$0xff]  ;;  %v101_v14 = vld [vmem:[%s766_s1 + $0x158] sm:$0xff]  ;;  %v100_v17 = vld [vmem:[%s766_s1 + $0x150] sm:$0xff] }
   0x7   :  { %462 = vmatpush3.msra.mxu1 %v104_v6  ;;  %384 = vmatpush3.msra.mxu0 %v71_v7  ;;  %v83_v18 = vld [vmem:[%s766_s1 + $0xc8] sm:$0xff]  ;;  %v82_v21 = vld [vmem:[%s766_s1 + $0xc0] sm:$0xff]  ;;  %v81_v24 = vld [vmem:[%s766_s1 + $0xb8] sm:$0xff] }
   0x8   :  { %463 = vmatprep.subr.mxu1 %v103_v8  ;;  %385 = vmatprep.subr.mxu0 %v86_v9  ;;  %v67_v19 = vld [vmem:[%s766_s1 + $0x48] sm:$0xff]  ;;  %v66_v22 = vld [vmem:[%s766_s1 + $0x40] sm:$0xff]  ;;  %v65_v25 = vld [vmem:[%s766_s1 + $0x38] sm:$0xff] }
   0x9   :  { %464 = vmatpush3.msra.mxu1 %v103_v8  ;;  %386 = vmatpush3.msra.mxu0 %v70_v10  ;;  %v99_v20 = vld [vmem:[%s766_s1 + $0x148] sm:$0xff]  ;;  %v98_v23 = vld [vmem:[%s766_s1 + $0x140] sm:$0xff]  ;;  %v97_v26 = vld [vmem:[%s766_s1 + $0x138] sm:$0xff] }
   0xa   :  { %465 = vmatprep.subr.mxu1 %v102_v11  ;;  %387 = vmatprep.subr.mxu0 %v85_v12  ;;  %v80_v27 = vld [vmem:[%s766_s1 + $0xb0] sm:$0xff]  ;;  %v79_v30 = vld [vmem:[%s766_s1 + $0xa8] sm:$0xff]  ;;  %v78_v33 = vld [vmem:[%s766_s1 + $0xa0] sm:$0xff] }
   0xb   :  { %466 = vmatpush3.msra.mxu1 %v102_v11  ;;  %388 = vmatpush3.msra.mxu0 %v69_v13  ;;  %v64_v28 = vld [vmem:[%s766_s1 + $0x30] sm:$0xff]  ;;  %v63_v31 = vld [vmem:[%s766_s1 + $0x28] sm:$0xff]  ;;  %v62_v34 = vld [vmem:[%s766_s1 + $0x20] sm:$0xff] }
   0xc   :  { %467 = vmatprep.subr.mxu1 %v101_v14  ;;  %389 = vmatprep.subr.mxu0 %v84_v15  ;;  %v96_v29 = vld [vmem:[%s766_s1 + $0x130] sm:$0xff]  ;;  %v95_v32 = vld [vmem:[%s766_s1 + $0x128] sm:$0xff]  ;;  %v94_v35 = vld [vmem:[%s766_s1 + $0x120] sm:$0xff] }
   0xd   :  { %468 = vmatpush3.msra.mxu1 %v101_v14  ;;  %390 = vmatpush3.msra.mxu0 %v68_v16  ;;  %v77_v36 = vld [vmem:[%s766_s1 + $0x98] sm:$0xff]  ;;  %v76_v39 = vld [vmem:[%s766_s1 + $0x90] sm:$0xff]  ;;  %v75_v42 = vld [vmem:[%s766_s1 + $0x88] sm:$0xff] }
   0xe   :  { %469 = vmatprep.subr.mxu1 %v100_v17  ;;  %391 = vmatprep.subr.mxu0 %v83_v18  ;;  %v61_v37 = vld [vmem:[%s766_s1 + $0x18] sm:$0xff]  ;;  %v60_v40 = vld [vmem:[%s766_s1 + $0x10] sm:$0xff]  ;;  %v59_v43 = vld [vmem:[%s766_s1 + $0x8] sm:$0xff] }
   0xf   :  { %470 = vmatpush3.msra.mxu1 %v100_v17  ;;  %392 = vmatpush3.msra.mxu0 %v67_v19  ;;  %v93_v38 = vld [vmem:[%s766_s1 + $0x118] sm:$0xff]  ;;  %v92_v41 = vld [vmem:[%s766_s1 + $0x110] sm:$0xff]  ;;  %v91_v44 = vld [vmem:[%s766_s1 + $0x108] sm:$0xff] }
  0x10   :  { %471 = vmatprep.subr.mxu1 %v99_v20  ;;  %393 = vmatprep.subr.mxu0 %v82_v21  ;;  %v74_v45 = vld [vmem:[%s766_s1 + $0x80] sm:$0xff]  ;;  %v35_v46 = vld [vmem:[%s767_s0 + $0x8] sm:$0xff]  ;;  %v36_v50 = vld [vmem:[%s767_s0 + $0x10] sm:$0xff] }
  0x11   :  { %472 = vmatpush3.msra.mxu1 %v99_v20  ;;  %394 = vmatpush3.msra.mxu0 %v66_v22  ;;  %v58_v47 = vld [vmem:[%s766_s1] sm:$0xff]  ;;  %v39_v51 = vld [vmem:[%s767_s0 + $0x28] sm:$0xff]  ;;  %v37_v54 = vld [vmem:[%s767_s0 + $0x18] sm:$0xff] }
  0x12   :  { %473 = vmatprep.subr.mxu1 %v98_v23  ;;  %395 = vmatprep.subr.mxu0 %v81_v24  ;;  %v34_v48 = vld [vmem:[%s767_s0] sm:$0xff]  ;;  %v41_v55 = vld [vmem:[%s767_s0 + $0x38] sm:$0xff]  ;;  %v48_v57 = vld [vmem:[%s767_s0 + $0x70] sm:$0xff] }
  0x13   :  { %474 = vmatpush3.msra.mxu1 %v98_v23  ;;  %396 = vmatpush3.msra.mxu0 %v65_v25  ;;  %v90_v49 = vld [vmem:[%s766_s1 + $0x100] sm:$0xff]  ;;  %v45_v56 = vld [vmem:[%s767_s0 + $0x58] sm:$0xff]  ;;  %v40_v58 = vld [vmem:[%s767_s0 + $0x30] sm:$0xff] }
  0x14   :  { %475 = vmatprep.subr.mxu1 %v97_v26  ;;  %397 = vmatprep.subr.mxu0 %v80_v27  ;;  %v38_v52 = vld [vmem:[%s767_s0 + $0x20] sm:$0xff]  ;;  %v44_v59 = vld [vmem:[%s767_s0 + $0x50] sm:$0xff]  ;;  %v51_v60 = vld [vmem:[%s767_s0 + $0x88] sm:$0xff] }
  0x15   :  { %476 = vmatpush3.msra.mxu1 %v97_v26  ;;  %398 = vmatpush3.msra.mxu0 %v64_v28  ;;  %v42_v53 = vld [vmem:[%s767_s0 + $0x40] sm:$0xff]  ;;  %v43_v62 = vld [vmem:[%s767_s0 + $0x48] sm:$0xff]  ;;  %v57_v0 = vld [vmem:[%s767_s0 + $0xb8] sm:$0xff] }
  0x16   :  { %477 = vmatprep.subr.mxu1 %v96_v29  ;;  %399 = vmatprep.subr.mxu0 %v79_v30  ;;  %v54_v61 = vld [vmem:[%s767_s0 + $0xa0] sm:$0xff]  ;;  %v47_v63 = vld [vmem:[%s767_s0 + $0x68] sm:$0xff]  ;;  %v49_v3 = vld [vmem:[%s767_s0 + $0x78] sm:$0xff] }
  0x17   :  { %478 = vmatpush3.msra.mxu1 %v96_v29  ;;  %400 = vmatpush3.msra.mxu0 %v63_v31  ;;  %v46_v1 = vld [vmem:[%s767_s0 + $0x60] sm:$0xff]  ;;  %v53_v4 = vld [vmem:[%s767_s0 + $0x98] sm:$0xff]  ;;  %v52_v5 = vld [vmem:[%s767_s0 + $0x90] sm:$0xff] }
  0x18   :  { %479 = vmatprep.subr.mxu1 %v95_v32  ;;  %401 = vmatprep.subr.mxu0 %v78_v33  ;;  %v50_v2 = vld [vmem:[%s767_s0 + $0x80] sm:$0xff]  ;;  %v56_v6 = vld [vmem:[%s767_s0 + $0xb0] sm:$0xff]  ;;  %v55_v7 = vld [vmem:[%s767_s0 + $0xa8] sm:$0xff] }
  0x19   :  { %480 = vmatpush3.msra.mxu1 %v95_v32  ;;  %402 = vmatpush3.msra.mxu0 %v62_v34  ;;  %v378_v14 = vld [vmem:[%s768_s2] ss:$0 sm:$0xff] }
  0x1a   :  { %481 = vmatprep.subr.mxu1 %v94_v35  ;;  %403 = vmatprep.subr.mxu0 %v77_v36 }
  0x1b   :  { %482 = vmatpush3.msra.mxu1 %v94_v35  ;;  %404 = vmatpush3.msra.mxu0 %v61_v37 }
  0x1c   :  { %483 = vmatprep.subr.mxu1 %v93_v38  ;;  %405 = vmatprep.subr.mxu0 %v76_v39 }
  0x1d   :  { %484 = vmatpush3.msra.mxu1 %v93_v38  ;;  %406 = vmatpush3.msra.mxu0 %v60_v40 }
  0x1e   :  { %485 = vmatprep.subr.mxu1 %v92_v41  ;;  %407 = vmatprep.subr.mxu0 %v75_v42 }
  0x1f   :  { %486 = vmatpush3.msra.mxu1 %v92_v41  ;;  %408 = vmatpush3.msra.mxu0 %v59_v43 }
  0x20   :  { %487 = vmatprep.subr.mxu1 %v91_v44  ;;  %409 = vmatprep.subr.mxu0 %v74_v45 }
  0x21   :  { %170 = vmatprep.mubr.f32.mxu0 %v35_v46  ;;  %410 = vmatpush3.msra.mxu0 %v58_v47 }
  0x22   :  { %488 = vmatpush3.msra.mxu1 %v91_v44  ;;  %171 = vmatmul.mubr.f32.vlgmr.msra.gmra.mxu0 %v34_v48 }
  0x23   :  { %489 = vmatprep.subr.mxu1 %v90_v49  ;;  %491 = vmatprep.mubr.f32.mxu1 %v36_v50 }
  0x24   :  { %490 = vmatpush3.msra.mxu1 %v90_v49  ;;  %175 = vmatprep.mubr.f32.mxu0 %v38_v52 }
  0x25   :  { %492 = vmatmul.mubr.f32.vlgmr.msra.gmra.mxu1 %v39_v51 }
  0x26   :  { %494 = vmatprep.mubr.f32.mxu1 %v42_v53  ;;  %176 = vmatmul.mubr.f32.gmra.mxu0 %v37_v54 }
  0x27   :  { %180 = vmatprep.mubr.f32.mxu0 %v41_v55 }
  0x29   :  { %495 = vmatmul.mubr.f32.gmra.mxu1 %v45_v56 }
  0x2a   :  { %497 = vmatprep.mubr.f32.mxu1 %v48_v57  ;;  %181 = vmatmul.mubr.f32.gmra.mxu0 %v40_v58 }
  0x2b   :  { %185 = vmatprep.mubr.f32.mxu0 %v44_v59 }
  0x2d   :  { %498 = vmatmul.mubr.f32.gmra.mxu1 %v51_v60 }
  0x2e   :  { %500 = vmatprep.mubr.f32.mxu1 %v54_v61  ;;  %186 = vmatmul.mubr.f32.gmra.mxu0 %v43_v62 }
  0x2f   :  { %190 = vmatprep.mubr.f32.mxu0 %v47_v63 }
  0x31   :  { %501 = vmatmul.mubr.f32.gmra.mxu1 %v57_v0 }
  0x32   :  { %191 = vmatmul.mubr.f32.gmra.mxu0 %v46_v1 }
  0x33   :  { %195 = vmatprep.mubr.f32.mxu0 %v50_v2 }
  0x36   :  { %196 = vmatmul.mubr.f32.gmra.mxu0 %v49_v3 }
  0x37   :  { %200 = vmatprep.mubr.f32.mxu0 %v53_v4 }
  0x3a   :  { %201 = vmatmul.mubr.f32.gmra.mxu0 %v52_v5 }
  0x3b   :  { %205 = vmatprep.mubr.f32.mxu0 %v56_v6 }
  0x3e   :  { %206 = vmatmul.mubr.f32.gmra.mxu0 %v55_v7 }
  0xe2   :  { %v411_v8 = vpop.f32.mrf.mxu0 }
  0xe4   :  { %v412_v9 = vpop.f32.mrf.mxu0 }
  0xe5   :  { %v493_v10 = vpop.f32.mrf.mxu1  ;;  %v413_v11 = vadd.f32 %v412_v9, %v411_v8 }
  0xe6   :  { %v414_v12 = vpop.f32.mrf.mxu0 }
  0xe7   :  { %v277_v13 = vpop.f32.mrf.mxu1 }
  0xe8   :  { %v278_v15 = vadd.f32 %v413_v11, %v277_v13  ;;  %v415_v16 = vpop.f32.mrf.mxu0 }
  0xe9   :  { %v496_v17 = vpop.f32.mrf.mxu1  ;;  %v416_v19 = vadd.f32 %v415_v16, %v414_v12 }
  0xea   :  { %v350_v18 = vadd.f32 %v378_v14, %v278_v15  ;;  %v417_v20 = vpop.f32.mrf.mxu0 }
  0xeb   :  { %v283_v22 = vadd.f32 %v493_v10, %v416_v19  ;;  %v287_v24 = vpop.f32.mrf.mxu1 }
  0xec   :  { %v358_v21 = vmax.f32 %v350_v18, 0.0  ;;  %v418_v23 = vpop.f32.mrf.mxu0 }
  0xed   :  { %v351_v25 = vadd.f32 %v378_v14, %v283_v22  ;;  %v419_v26 = vadd.f32 %v418_v23, %v417_v20  ;;  %v499_v31 = vpop.f32.mrf.mxu1 }
  0xee   :  { %366 = vst [vmem:[%s769_s3] sm:$0xff] %v358_v21  ;;  %v420_v27 = vpop.f32.mrf.mxu0 }
  0xef   :  { %v359_v28 = vmax.f32 %v351_v25, 0.0  ;;  %v288_v29 = vadd.f32 %v419_v26, %v287_v24  ;;  %v297_v38 = vpop.f32.mrf.mxu1 }
  0xf0   :  { %v421_v30 = vpop.f32.mrf.mxu0 }
  0xf1   :  { %367 = vst [vmem:[%s769_s3 + $0x8] sm:$0xff] %v359_v28  ;;  %v352_v32 = vadd.f32 %v378_v14, %v288_v29  ;;  %v422_v33 = vadd.f32 %v421_v30, %v420_v27  ;;  %v502_v45 = vpop.f32.mrf.mxu1 }
  0xf2   :  { %v423_v34 = vpop.f32.mrf.mxu0 }
  0xf3   :  { %v360_v35 = vmax.f32 %v352_v32, 0.0  ;;  %v293_v36 = vadd.f32 %v496_v17, %v422_v33  ;;  %v307_v52 = vpop.f32.mrf.mxu1 }
  0xf4   :  { %v424_v37 = vpop.f32.mrf.mxu0 }
  0xf5   :  { %368 = vst [vmem:[%s769_s3 + $0x10] sm:$0xff] %v360_v35  ;;  %v353_v39 = vadd.f32 %v378_v14, %v293_v36  ;;  %v425_v40 = vadd.f32 %v424_v37, %v423_v34 }
  0xf6   :  { %v426_v41 = vpop.f32.mrf.mxu0 }
  0xf7   :  { %v361_v42 = vmax.f32 %v353_v39, 0.0  ;;  %v298_v43 = vadd.f32 %v425_v40, %v297_v38 }
  0xf8   :  { %v427_v44 = vpop.f32.mrf.mxu0 }
  0xf9   :  { %369 = vst [vmem:[%s769_s3 + $0x18] sm:$0xff] %v361_v42  ;;  %v354_v46 = vadd.f32 %v378_v14, %v298_v43  ;;  %v428_v47 = vadd.f32 %v427_v44, %v426_v41 }
  0xfa   :  { %v429_v48 = vpop.f32.mrf.mxu0 }
  0xfb   :  { %v362_v49 = vmax.f32 %v354_v46, 0.0  ;;  %v303_v50 = vadd.f32 %v499_v31, %v428_v47 }
  0xfc   :  { %v430_v51 = vpop.f32.mrf.mxu0 }
  0xfd   :  { %370 = vst [vmem:[%s769_s3 + $0x20] sm:$0xff] %v362_v49  ;;  %v355_v53 = vadd.f32 %v378_v14, %v303_v50  ;;  %v431_v54 = vadd.f32 %v430_v51, %v429_v48 }
  0xfe   :  { %v432_v55 = vpop.f32.mrf.mxu0 }
  0xff   :  { %v363_v56 = vmax.f32 %v355_v53, 0.0  ;;  %v308_v57 = vadd.f32 %v431_v54, %v307_v52 }
 0x100   :  { %v433_v58 = vpop.f32.mrf.mxu0 }
 0x101   :  { %371 = vst [vmem:[%s769_s3 + $0x28] sm:$0xff] %v363_v56  ;;  %v356_v59 = vadd.f32 %v378_v14, %v308_v57  ;;  %v434_v60 = vadd.f32 %v433_v58, %v432_v55 }
 0x103   :  { %v364_v61 = vmax.f32 %v356_v59, 0.0  ;;  %v313_v62 = vadd.f32 %v502_v45, %v434_v60 }
 0x105   :  { %372 = vst [vmem:[%s769_s3 + $0x30] sm:$0xff] %v364_v61  ;;  %v357_v63 = vadd.f32 %v378_v14, %v313_v62 }
 0x107   :  { %v365_v0 = vmax.f32 %v357_v63, 0.0 }
 0x109   :  { %373 = vst [vmem:[%s769_s3 + $0x38] sm:$0xff] %v365_v0 }

// kernel: edm_forward.30
= control target key start
LH: loop header
LB: loop body
LE: loop exit
PB: predicated region body
PF: predicated region fallthrough
CT: control target
= control target key end

     0   :  { %s365_s1 = inlined_call_operand.vmem [shape: f32[256,128], index: 1, kind: input, shape index: {}]   ;;  %s366_s0 = inlined_call_operand.vmem [shape: f32[16,256], index: 0, kind: input, shape index: {}]   ;;  %s367_s2 = inlined_call_operand.vmem [shape: f32[1,128], index: 2, kind: input, shape index: {}]   ;;  %s368_s3 = inlined_call_operand.vmem [shape: f32[16,128], index: 3, kind: output, shape index: {}]  }
   0x1   :  { %v57_v0 = vld [vmem:[%s365_s1 + $0xf8] sm:$0xff]  ;;  %v56_v2 = vld [vmem:[%s365_s1 + $0xf0] sm:$0xff]  ;;  %v55_v4 = vld [vmem:[%s365_s1 + $0xe8] sm:$0xff] }
   0x2   :  { %v41_v1 = vld [vmem:[%s365_s1 + $0x78] sm:$0xff]  ;;  %158 = vmatprep.subr.mxu0 %v57_v0  ;;  %196 = vmatprep.subr.mxu1 %v57_v0  ;;  %v40_v3 = vld [vmem:[%s365_s1 + $0x70] sm:$0xff]  ;;  %v39_v5 = vld [vmem:[%s365_s1 + $0x68] sm:$0xff] }
   0x3   :  { %159 = vmatpush3.msra.mxu0 %v41_v1  ;;  %212 = vmatpush3.msra.mxu1 %v41_v1  ;;  %v54_v6 = vld [vmem:[%s365_s1 + $0xe0] sm:$0xff]  ;;  %v53_v8 = vld [vmem:[%s365_s1 + $0xd8] sm:$0xff]  ;;  %v52_v10 = vld [vmem:[%s365_s1 + $0xd0] sm:$0xff] }
   0x4   :  { %160 = vmatprep.subr.mxu0 %v56_v2  ;;  %197 = vmatprep.subr.mxu1 %v56_v2  ;;  %v38_v7 = vld [vmem:[%s365_s1 + $0x60] sm:$0xff]  ;;  %v37_v9 = vld [vmem:[%s365_s1 + $0x58] sm:$0xff]  ;;  %v36_v11 = vld [vmem:[%s365_s1 + $0x50] sm:$0xff] }
   0x5   :  { %161 = vmatpush3.msra.mxu0 %v40_v3  ;;  %213 = vmatpush3.msra.mxu1 %v40_v3  ;;  %v51_v12 = vld [vmem:[%s365_s1 + $0xc8] sm:$0xff]  ;;  %v50_v14 = vld [vmem:[%s365_s1 + $0xc0] sm:$0xff]  ;;  %v49_v16 = vld [vmem:[%s365_s1 + $0xb8] sm:$0xff] }
   0x6   :  { %162 = vmatprep.subr.mxu0 %v55_v4  ;;  %198 = vmatprep.subr.mxu1 %v55_v4  ;;  %v35_v13 = vld [vmem:[%s365_s1 + $0x48] sm:$0xff]  ;;  %v34_v15 = vld [vmem:[%s365_s1 + $0x40] sm:$0xff]  ;;  %v33_v17 = vld [vmem:[%s365_s1 + $0x38] sm:$0xff] }
   0x7   :  { %163 = vmatpush3.msra.mxu0 %v39_v5  ;;  %214 = vmatpush3.msra.mxu1 %v39_v5  ;;  %v48_v18 = vld [vmem:[%s365_s1 + $0xb0] sm:$0xff]  ;;  %v47_v20 = vld [vmem:[%s365_s1 + $0xa8] sm:$0xff]  ;;  %v46_v22 = vld [vmem:[%s365_s1 + $0xa0] sm:$0xff] }
   0x8   :  { %164 = vmatprep.subr.mxu0 %v54_v6  ;;  %199 = vmatprep.subr.mxu1 %v54_v6  ;;  %v32_v19 = vld [vmem:[%s365_s1 + $0x30] sm:$0xff]  ;;  %v31_v21 = vld [vmem:[%s365_s1 + $0x28] sm:$0xff]  ;;  %v30_v23 = vld [vmem:[%s365_s1 + $0x20] sm:$0xff] }
   0x9   :  { %165 = vmatpush3.msra.mxu0 %v38_v7  ;;  %215 = vmatpush3.msra.mxu1 %v38_v7  ;;  %v45_v24 = vld [vmem:[%s365_s1 + $0x98] sm:$0xff]  ;;  %v44_v26 = vld [vmem:[%s365_s1 + $0x90] sm:$0xff]  ;;  %v43_v28 = vld [vmem:[%s365_s1 + $0x88] sm:$0xff] }
   0xa   :  { %166 = vmatprep.subr.mxu0 %v53_v8  ;;  %200 = vmatprep.subr.mxu1 %v53_v8  ;;  %v29_v25 = vld [vmem:[%s365_s1 + $0x18] sm:$0xff]  ;;  %v28_v27 = vld [vmem:[%s365_s1 + $0x10] sm:$0xff]  ;;  %v27_v29 = vld [vmem:[%s365_s1 + $0x8] sm:$0xff] }
   0xb   :  { %167 = vmatpush3.msra.mxu0 %v37_v9  ;;  %216 = vmatpush3.msra.mxu1 %v37_v9  ;;  %v42_v30 = vld [vmem:[%s365_s1 + $0x80] sm:$0xff]  ;;  %v23_v32 = vld [vmem:[%s366_s0 + $0x8] sm:$0xff]  ;;  %v25_v33 = vld [vmem:[%s366_s0 + $0x18] sm:$0xff] }
   0xc   :  { %168 = vmatprep.subr.mxu0 %v52_v10  ;;  %201 = vmatprep.subr.mxu1 %v52_v10  ;;  %v26_v31 = vld [vmem:[%s365_s1] sm:$0xff]  ;;  %v24_v35 = vld [vmem:[%s366_s0 + $0x10] sm:$0xff] }
   0xd   :  { %169 = vmatpush3.msra.mxu0 %v36_v11  ;;  %217 = vmatpush3.msra.mxu1 %v36_v11  ;;  %v22_v34 = vld [vmem:[%s366_s0] sm:$0xff] }
   0xe   :  { %170 = vmatprep.subr.mxu0 %v51_v12  ;;  %202 = vmatprep.subr.mxu1 %v51_v12  ;;  %v157_v39 = vld [vmem:[%s367_s2] ss:$0 sm:$0xff] }
   0xf   :  { %171 = vmatpush3.msra.mxu0 %v35_v13  ;;  %218 = vmatpush3.msra.mxu1 %v35_v13 }
  0x10   :  { %172 = vmatprep.subr.mxu0 %v50_v14  ;;  %203 = vmatprep.subr.mxu1 %v50_v14 }
  0x11   :  { %173 = vmatpush3.msra.mxu0 %v34_v15  ;;  %219 = vmatpush3.msra.mxu1 %v34_v15 }
  0x12   :  { %174 = vmatprep.subr.mxu0 %v49_v16  ;;  %204 = vmatprep.subr.mxu1 %v49_v16 }
  0x13   :  { %175 = vmatpush3.msra.mxu0 %v33_v17  ;;  %220 = vmatpush3.msra.mxu1 %v33_v17 }
  0x14   :  { %176 = vmatprep.subr.mxu0 %v48_v18  ;;  %205 = vmatprep.subr.mxu1 %v48_v18 }
  0x15   :  { %177 = vmatpush3.msra.mxu0 %v32_v19  ;;  %221 = vmatpush3.msra.mxu1 %v32_v19 }
  0x16   :  { %178 = vmatprep.subr.mxu0 %v47_v20  ;;  %206 = vmatprep.subr.mxu1 %v47_v20 }
  0x17   :  { %179 = vmatpush3.msra.mxu0 %v31_v21  ;;  %222 = vmatpush3.msra.mxu1 %v31_v21 }
  0x18   :  { %180 = vmatprep.subr.mxu0 %v46_v22  ;;  %207 = vmatprep.subr.mxu1 %v46_v22 }
  0x19   :  { %181 = vmatpush3.msra.mxu0 %v30_v23  ;;  %223 = vmatpush3.msra.mxu1 %v30_v23 }
  0x1a   :  { %182 = vmatprep.subr.mxu0 %v45_v24  ;;  %208 = vmatprep.subr.mxu1 %v45_v24 }
  0x1b   :  { %183 = vmatpush3.msra.mxu0 %v29_v25  ;;  %224 = vmatpush3.msra.mxu1 %v29_v25 }
  0x1c   :  { %184 = vmatprep.subr.mxu0 %v44_v26  ;;  %209 = vmatprep.subr.mxu1 %v44_v26 }
  0x1d   :  { %185 = vmatpush3.msra.mxu0 %v28_v27  ;;  %225 = vmatpush3.msra.mxu1 %v28_v27 }
  0x1e   :  { %186 = vmatprep.subr.mxu0 %v43_v28  ;;  %210 = vmatprep.subr.mxu1 %v43_v28 }
  0x1f   :  { %187 = vmatpush3.msra.mxu0 %v27_v29  ;;  %226 = vmatpush3.msra.mxu1 %v27_v29 }
  0x20   :  { %188 = vmatprep.subr.mxu0 %v42_v30  ;;  %211 = vmatprep.subr.mxu1 %v42_v30 }
  0x21   :  { %189 = vmatpush3.msra.mxu0 %v26_v31  ;;  %227 = vmatpush3.msra.mxu1 %v26_v31 }
  0x22   :  { %122 = vmatprep.mubr.f32.mxu0 %v23_v32  ;;  %127 = vmatprep.mubr.f32.mxu1 %v25_v33 }
  0x23   :  { %123 = vmatmul.mubr.f32.vlgmr.msra.gmra.mxu0 %v22_v34  ;;  %128 = vmatmul.mubr.f32.vlgmr.msra.gmra.mxu1 %v24_v35 }
  0xe3   :  { %v190_v36 = vpop.f32.mrf.mxu0  ;;  %v193_v37 = vpop.f32.mrf.mxu1 }
  0xe5   :  { %v191_v38 = vpop.f32.mrf.mxu0  ;;  %v194_v40 = vpop.f32.mrf.mxu1 }
  0xe6   :  { %v192_v41 = vadd.f32 %v191_v38, %v190_v36  ;;  %v195_v42 = vadd.f32 %v194_v40, %v193_v37 }
  0xe8   :  { %v149_v43 = vadd.f32 %v192_v41, %v157_v39  ;;  %v150_v44 = vadd.f32 %v195_v42, %v157_v39 }
  0xea   :  { %151 = vst [vmem:[%s368_s3] sm:$0xff] %v149_v43  ;;  %152 = vst [vmem:[%s368_s3 + $0x8] sm:$0xff] %v150_v44 }

// kernel: edm_forward.32
= control target key start
LH: loop header
LB: loop body
LE: loop exit
PB: predicated region body
PF: predicated region fallthrough
CT: control target
= control target key end

     0   :  { %v182_v0 = vmov 0.0   ;;  %vm183_vm0 = vmmov 0   ;;  %s261_s1 = inlined_call_operand.vmem [shape: f32[128,128], index: 1, kind: input, shape index: {}]   ;;  %s262_s0 = inlined_call_operand.vmem [shape: f32[8,128], index: 0, kind: input, shape index: {}]   ;;  %s263_s2 = inlined_call_operand.vmem [shape: f32[1,128], index: 2, kind: input, shape index: {}]   ;;  %s264_s3 = inlined_call_operand.vmem [shape: f32[8,128], index: 3, kind: output, shape index: {}]  }
   0x1   :  { %145 = vmatprep.subr.mxu0 %v182_v0  ;;  %v36_v1 = vld [vmem:[%s261_s1 + $0x78] sm:$0xff]  ;;  %v35_v2 = vld [vmem:[%s261_s1 + $0x70] sm:$0xff]  ;;  %177 = vmatprep.mubr.msk.f32.mxu0 %vm183_vm0, %v182_v0  ;;  %v34_v3 = vld [vmem:[%s261_s1 + $0x68] sm:$0xff] }
   0x2   :  { %146 = vmatpush3.msra.mxu0 %v36_v1  ;;  %v33_v4 = vld [vmem:[%s261_s1 + $0x60] sm:$0xff]  ;;  %v32_v5 = vld [vmem:[%s261_s1 + $0x58] sm:$0xff]  ;;  %v31_v6 = vld [vmem:[%s261_s1 + $0x50] sm:$0xff] }
   0x3   :  { %147 = vmatprep.subr.mxu0 %v182_v0  ;;  %v30_v7 = vld [vmem:[%s261_s1 + $0x48] sm:$0xff]  ;;  %v29_v8 = vld [vmem:[%s261_s1 + $0x40] sm:$0xff]  ;;  %v28_v9 = vld [vmem:[%s261_s1 + $0x38] sm:$0xff] }
   0x4   :  { %148 = vmatpush3.msra.mxu0 %v35_v2  ;;  %v27_v10 = vld [vmem:[%s261_s1 + $0x30] sm:$0xff]  ;;  %v26_v11 = vld [vmem:[%s261_s1 + $0x28] sm:$0xff]  ;;  %v25_v12 = vld [vmem:[%s261_s1 + $0x20] sm:$0xff] }
   0x5   :  { %149 = vmatprep.subr.mxu0 %v182_v0  ;;  %v24_v13 = vld [vmem:[%s261_s1 + $0x18] sm:$0xff]  ;;  %v23_v14 = vld [vmem:[%s261_s1 + $0x10] sm:$0xff]  ;;  %v22_v15 = vld [vmem:[%s261_s1 + $0x8] sm:$0xff] }
   0x6   :  { %150 = vmatpush3.msra.mxu0 %v34_v3  ;;  %v21_v16 = vld [vmem:[%s261_s1] sm:$0xff] }
   0x7   :  { %151 = vmatprep.subr.mxu0 %v182_v0  ;;  %v20_v17 = vld [vmem:[%s262_s0] sm:$0xff] }
   0x8   :  { %152 = vmatpush3.msra.mxu0 %v33_v4  ;;  %v127_v18 = vld [vmem:[%s263_s2] ss:$0 sm:$0xff] }
   0x9   :  { %153 = vmatprep.subr.mxu0 %v182_v0 }
   0xa   :  { %154 = vmatpush3.msra.mxu0 %v32_v5 }
   0xb   :  { %155 = vmatprep.subr.mxu0 %v182_v0 }
   0xc   :  { %156 = vmatpush3.msra.mxu0 %v31_v6 }
   0xd   :  { %157 = vmatprep.subr.mxu0 %v182_v0 }
   0xe   :  { %158 = vmatpush3.msra.mxu0 %v30_v7 }
   0xf   :  { %159 = vmatprep.subr.mxu0 %v182_v0 }
  0x10   :  { %160 = vmatpush3.msra.mxu0 %v29_v8 }
  0x11   :  { %161 = vmatprep.subr.mxu0 %v182_v0 }
  0x12   :  { %162 = vmatpush3.msra.mxu0 %v28_v9 }
  0x13   :  { %163 = vmatprep.subr.mxu0 %v182_v0 }
  0x14   :  { %164 = vmatpush3.msra.mxu0 %v27_v10 }
  0x15   :  { %165 = vmatprep.subr.mxu0 %v182_v0 }
  0x16   :  { %166 = vmatpush3.msra.mxu0 %v26_v11 }
  0x17   :  { %167 = vmatprep.subr.mxu0 %v182_v0 }
  0x18   :  { %168 = vmatpush3.msra.mxu0 %v25_v12 }
  0x19   :  { %169 = vmatprep.subr.mxu0 %v182_v0 }
  0x1a   :  { %170 = vmatpush3.msra.mxu0 %v24_v13 }
  0x1b   :  { %171 = vmatprep.subr.mxu0 %v182_v0 }
  0x1c   :  { %172 = vmatpush3.msra.mxu0 %v23_v14 }
  0x1d   :  { %173 = vmatprep.subr.mxu0 %v182_v0 }
  0x1e   :  { %174 = vmatpush3.msra.mxu0 %v22_v15 }
  0x1f   :  { %175 = vmatprep.subr.mxu0 %v182_v0 }
  0x20   :  { %176 = vmatpush3.msra.mxu0 %v21_v16 }
  0x21   :  { %178 = vmatmul.mubr.f32.vlgmr.msra.gmra.mxu0 %v20_v17 }
  0xe1   :  { %v103_v19 = vpop.f32.mrf.mxu0 }
  0xe2   :  { %v120_v20 = vadd.f32 %v127_v18, %v103_v19 }
  0xe3   :  { %v179_v21 = vpop.f32.mrf.mxu0 }
  0xe4   :  { %v121_v22 = vmax.f32 %v120_v20, 0.0 }
  0xe6   :  { %122 = vst [vmem:[%s264_s3] sm:$0xff] %v121_v22 }

// kernel: edm_forward.33
= control target key start
LH: loop header
LB: loop body
LE: loop exit
PB: predicated region body
PF: predicated region fallthrough
CT: control target
= control target key end

     0   :  { %v182_v0 = vmov 0.0   ;;  %vm183_vm0 = vmmov 0   ;;  %s261_s1 = inlined_call_operand.vmem [shape: f32[128,128], index: 1, kind: input, shape index: {}]   ;;  %s262_s0 = inlined_call_operand.vmem [shape: f32[8,128], index: 0, kind: input, shape index: {}]   ;;  %s263_s2 = inlined_call_operand.vmem [shape: f32[1,128], index: 2, kind: input, shape index: {}]   ;;  %s264_s3 = inlined_call_operand.vmem [shape: f32[8,128], index: 3, kind: output, shape index: {}]  }
   0x1   :  { %145 = vmatprep.subr.mxu0 %v182_v0  ;;  %v36_v1 = vld [vmem:[%s261_s1 + $0x78] sm:$0xff]  ;;  %v35_v2 = vld [vmem:[%s261_s1 + $0x70] sm:$0xff]  ;;  %177 = vmatprep.mubr.msk.f32.mxu0 %vm183_vm0, %v182_v0  ;;  %v34_v3 = vld [vmem:[%s261_s1 + $0x68] sm:$0xff] }
   0x2   :  { %146 = vmatpush3.msra.mxu0 %v36_v1  ;;  %v33_v4 = vld [vmem:[%s261_s1 + $0x60] sm:$0xff]  ;;  %v32_v5 = vld [vmem:[%s261_s1 + $0x58] sm:$0xff]  ;;  %v31_v6 = vld [vmem:[%s261_s1 + $0x50] sm:$0xff] }
   0x3   :  { %147 = vmatprep.subr.mxu0 %v182_v0  ;;  %v30_v7 = vld [vmem:[%s261_s1 + $0x48] sm:$0xff]  ;;  %v29_v8 = vld [vmem:[%s261_s1 + $0x40] sm:$0xff]  ;;  %v28_v9 = vld [vmem:[%s261_s1 + $0x38] sm:$0xff] }
   0x4   :  { %148 = vmatpush3.msra.mxu0 %v35_v2  ;;  %v27_v10 = vld [vmem:[%s261_s1 + $0x30] sm:$0xff]  ;;  %v26_v11 = vld [vmem:[%s261_s1 + $0x28] sm:$0xff]  ;;  %v25_v12 = vld [vmem:[%s261_s1 + $0x20] sm:$0xff] }
   0x5   :  { %149 = vmatprep.subr.mxu0 %v182_v0  ;;  %v24_v13 = vld [vmem:[%s261_s1 + $0x18] sm:$0xff]  ;;  %v23_v14 = vld [vmem:[%s261_s1 + $0x10] sm:$0xff]  ;;  %v22_v15 = vld [vmem:[%s261_s1 + $0x8] sm:$0xff] }
   0x6   :  { %150 = vmatpush3.msra.mxu0 %v34_v3  ;;  %v21_v16 = vld [vmem:[%s261_s1] sm:$0xff] }
   0x7   :  { %151 = vmatprep.subr.mxu0 %v182_v0  ;;  %v20_v17 = vld [vmem:[%s262_s0] sm:$0xff] }
   0x8   :  { %152 = vmatpush3.msra.mxu0 %v33_v4  ;;  %v127_v18 = vld [vmem:[%s263_s2] ss:$0 sm:$0xff] }
   0x9   :  { %153 = vmatprep.subr.mxu0 %v182_v0 }
   0xa   :  { %154 = vmatpush3.msra.mxu0 %v32_v5 }
   0xb   :  { %155 = vmatprep.subr.mxu0 %v182_v0 }
   0xc   :  { %156 = vmatpush3.msra.mxu0 %v31_v6 }
   0xd   :  { %157 = vmatprep.subr.mxu0 %v182_v0 }
   0xe   :  { %158 = vmatpush3.msra.mxu0 %v30_v7 }
   0xf   :  { %159 = vmatprep.subr.mxu0 %v182_v0 }
  0x10   :  { %160 = vmatpush3.msra.mxu0 %v29_v8 }
  0x11   :  { %161 = vmatprep.subr.mxu0 %v182_v0 }
  0x12   :  { %162 = vmatpush3.msra.mxu0 %v28_v9 }
  0x13   :  { %163 = vmatprep.subr.mxu0 %v182_v0 }
  0x14   :  { %164 = vmatpush3.msra.mxu0 %v27_v10 }
  0x15   :  { %165 = vmatprep.subr.mxu0 %v182_v0 }
  0x16   :  { %166 = vmatpush3.msra.mxu0 %v26_v11 }
  0x17   :  { %167 = vmatprep.subr.mxu0 %v182_v0 }
  0x18   :  { %168 = vmatpush3.msra.mxu0 %v25_v12 }
  0x19   :  { %169 = vmatprep.subr.mxu0 %v182_v0 }
  0x1a   :  { %170 = vmatpush3.msra.mxu0 %v24_v13 }
  0x1b   :  { %171 = vmatprep.subr.mxu0 %v182_v0 }
  0x1c   :  { %172 = vmatpush3.msra.mxu0 %v23_v14 }
  0x1d   :  { %173 = vmatprep.subr.mxu0 %v182_v0 }
  0x1e   :  { %174 = vmatpush3.msra.mxu0 %v22_v15 }
  0x1f   :  { %175 = vmatprep.subr.mxu0 %v182_v0 }
  0x20   :  { %176 = vmatpush3.msra.mxu0 %v21_v16 }
  0x21   :  { %178 = vmatmul.mubr.f32.vlgmr.msra.gmra.mxu0 %v20_v17 }
  0xe1   :  { %v103_v19 = vpop.f32.mrf.mxu0 }
  0xe2   :  { %v120_v20 = vadd.f32 %v127_v18, %v103_v19 }
  0xe3   :  { %v179_v21 = vpop.f32.mrf.mxu0 }
  0xe4   :  { %v121_v22 = vmax.f32 %v120_v20, 0.0 }
  0xe6   :  { %122 = vst [vmem:[%s264_s3] sm:$0xff] %v121_v22 }

// kernel: edm_forward.31
= control target key start
LH: loop header
LB: loop body
LE: loop exit
PB: predicated region body
PF: predicated region fallthrough
CT: control target
= control target key end

     0   :  { %s809_s30 = smov 0   ;;  %s891_s0 = inlined_call_operand.vmem [shape: f32[8,2,16], index: 0, kind: input, shape index: {}]   ;;  %s892_s1 = inlined_call_operand.vmem [shape: f32[8,2,16], index: 1, kind: input, shape index: {}]   ;;  %s893_s2 = inlined_call_operand.vmem [shape: f32[8,2,16], index: 2, kind: input, shape index: {}]   ;;  %s894_s3 = inlined_call_operand.vmem [shape: f32[16,16], index: 3, kind: input, shape index: {}]   ;;  %s895_s4 = inlined_call_operand.vmem [shape: f32[16,16], index: 4, kind: input, shape index: {}]   ;;  %s896_s5 = inlined_call_operand.vmem [shape: f32[16,16], index: 5, kind: input, shape index: {}]   ;;  %s897_s6 = inlined_call_operand.vmem [shape: f32[1,16], index: 6, kind: input, shape index: {}]   ;;  %s898_s7 = inlined_call_operand.vmem [shape: f32[1,16], index: 7, kind: input, shape index: {}]   ;;  %s899_s8 = inlined_call_operand.vmem [shape: f32[1,16], index: 8, kind: input, shape index: {}]   ;;  %s900_s9 = inlined_call_operand.vmem [shape: f32[2,16], index: 9, kind: output, shape index: {}]  }
   0x1 LB: > { %s815_s10 = sadd.s32 4294967295, %s754_s30   ;;  %p683_p0 = scmp.ge.s32.totalorder %s754_s30, 1  ;;  %s754_s30 = sphi %s809_s30, %s19_s30  }
   0x2   : > { %p299_p1 = scmp.lt.s32.totalorder %s754_s30, 9 }
   0x4   : > { %p300_p2 = pnand %p683_p0, %p299_p1 }
   0x5   : > { %p337_p3 = scmp.lt.s32.totalorder (!%p300_p2), %s815_s10, 7  ;;  %p687_p4 = scmp.ne.s32.totalorder (!%p300_p2), %s815_s10, 0 }
   0x6   : > { %303 = sbr.rel (%p300_p2) target bundleno = 281 (0x119), region = 56 }
   0xb   : > { %s338_s11 = scalar_select %p337_p3, %s815_s10, 7 }
   0xc   : > { %352 = sbr.rel (%p687_p4) target bundleno = 19 (0x13), region = 60 }
   0xd   : > { %s821_s12 = sshll.u32 %s338_s11, 1 }
   0xe   : > { %s340_s15 = scalar_lea.vmem %s891_s0, %s821_s12  ;;  %s344_s18 = scalar_lea.vmem %s892_s1, %s821_s12 }
   0xf   : > { %s348_s21 = scalar_lea.vmem %s893_s2, %s821_s12 }
  0x11   : > { %vm353_vm0 = vcmask 123904   ;;  %v756_v0 = vmov 0.0  }
  0x12   : > { %354 = vst.msk [vmem:[#allocation2] sm:$0x3] %vm353_vm0, %v756_v0 }
  0x13 PF: > { %v357_v1 = vld [vmem:[%s894_s3 + $0x8] sm:$0xff]  ;;  %v757_v2 = vmov 0.0   ;;  %v356_v3 = vld [vmem:[%s894_s3] sm:$0xff]  ;;  %vm758_vm1 = vmmov 0   ;;  %vm365_vm2 = vcmask 130048   ;;  %vm621_vm3 = vcmask 123904  }
  0x14   : > { %706 = vmatprep.subr.mxu0 %v757_v2  ;;  %710 = vmatprep.mubr.msk.f32.mxu0 %vm758_vm1, %v757_v2  ;;  %v440_v4 = vld [vmem:[%s895_s4 + $0x8] sm:$0xff]  ;;  %v439_v6 = vld [vmem:[%s895_s4] sm:$0xff]  ;;  %p694_p5 = scmp.ne.s32.totalorder %s815_s10, 7 }
  0x15   : > { %707 = vmatpush3.msra.mxu0 %v357_v1  ;;  %713 = vmatprep.subr.mxu1 %v757_v2  ;;  %v519_v7 = vld [vmem:[%s896_s5 + $0x8] sm:$0xff]  ;;  %v518_v8 = vld [vmem:[%s896_s5] sm:$0xff] }
  0x16   : > { %708 = vmatprep.subr.mxu0 %v757_v2  ;;  %714 = vmatpush3.msra.mxu1 %v440_v4  ;;  %v688_v9 = vld [vmem:[%s897_s6] ss:$0 sm:$0xff] }
  0x17   : > { %709 = vmatpush3.msra.mxu0 %v356_v3  ;;  %715 = vmatprep.subr.mxu1 %v757_v2  ;;  %v597_v11 = vld [vmem:[%s340_s15] sm:$0x3] }
  0x18   : > { %716 = vmatpush3.msra.mxu1 %v439_v6  ;;  %717 = vmatprep.mubr.msk.f32.mxu1 %vm758_vm1, %v757_v2  ;;  %v690_v12 = vld [vmem:[%s898_s7] ss:$0 sm:$0xff] }
  0x19   : > { %v355_v5 = vld [vmem:[#allocation2] sm:$0x3]  ;;  %720 = vmatprep.subr.mxu0 %v757_v2 }
  0x1a   : > { %711 = vmatmul.mubr.msk.f32.vlgmr.msra.gmra.mxu0 %vm365_vm2, %v355_v5  ;;  %718 = vmatmul.mubr.msk.f32.vlgmr.msra.gmra.mxu1 %vm365_vm2, %v355_v5  ;;  %v605_v16 = vld [vmem:[%s344_s18] sm:$0x3] }
  0x1b   : > { %721 = vmatpush3.msra.mxu0 %v519_v7  ;;  %724 = vmatprep.mubr.msk.f32.mxu0 %vm758_vm1, %v757_v2  ;;  %v692_v30 = vld [vmem:[%s899_s8] ss:$0 sm:$0xff] }
  0x1c   : > { %722 = vmatprep.subr.mxu0 %v757_v2  ;;  %v613_v34 = vld [vmem:[%s348_s21] sm:$0x3] }
  0x1d   : > { %723 = vmatpush3.msra.mxu0 %v518_v8 }
  0x1e   : > { %725 = vmatmul.mubr.msk.f32.vlgmr.msra.gmra.mxu0 %vm365_vm2, %v355_v5 }
  0xda   : > { %v435_v10 = vpop.f32.mrf.mxu0  ;;  %v514_v15 = vpop.f32.mrf.mxu1 }
  0xdb   : > { %v436_v13 = vadd.f32 %v688_v9, %v435_v10  ;;  %v515_v18 = vadd.f32 %v690_v12, %v514_v15 }
  0xdc   : > { %v712_v14 = vpop.f32.mrf.mxu0  ;;  %v719_v19 = vpop.f32.mrf.mxu1 }
  0xdd   : > { %v598_v17 = vadd.f32 %v597_v11, %v436_v13  ;;  %v606_v21 = vadd.f32 %v605_v16, %v515_v18 }
  0xde   : > { %v593_v22 = vpop.f32.mrf.mxu0 }
  0xdf   : > { %v599_v20 = vsub.f32 0.0, %v598_v17  ;;  %v607_v25 = vsub.f32 0.0, %v606_v21  ;;  %v594_v32 = vadd.f32 %v692_v30, %v593_v22 }
  0xe0   : > { %v726_v24 = vpop.f32.mrf.mxu0 }
  0xe1   : > { %v600_v23 = vmul.f32 1.442695, %v599_v20  ;;  %v608_v26 = vmul.f32 1.442695, %v607_v25 }
  0xe3   : > { %738 = vpow2.f32 %v600_v23 }
  0xe4   : > { %740 = vpow2.f32 %v608_v26 }
  0xf0   : > { %v739_v27 = vpop.eup %738 }
  0xf1   : > { %v602_v28 = vadd.f32 1.0, %v739_v27  ;;  %v741_v29 = vpop.eup %740 }
  0xf2   : > { %v610_v31 = vadd.f32 1.0, %v741_v29 }
  0xf3   : > { %742 = vrcp.f32 %v602_v28 }
  0xf4   : > { %744 = vrcp.f32 %v610_v31 }
 0x100   : > { %v743_v33 = vpop.eup %742 }
 0x101   : > { %v614_v35 = vmul.f32 %v743_v33, %v594_v32  ;;  %v745_v37 = vpop.eup %744 }
 0x102   : > { %v617_v38 = vsub.f32 1.0, %v745_v37  ;;  %v619_v40 = vmul.f32 %v745_v37, %v355_v5 }
 0x103   : > { %v615_v36 = vadd.f32 %v614_v35, %v613_v34 }
 0x105   : > { %746 = vtanh.f32 %v615_v36 }
 0x112   : > { %v747_v39 = vpop.eup %746 }
 0x113   : > { %v618_v41 = vmul.f32 %v747_v39, %v617_v38  ;;  %626 = sbr.rel (%p694_p5) target bundleno = 281 (0x119), region = 64 }
 0x115   : > { %v620_v42 = vadd.f32 %v619_v40, %v618_v41 }
 0x117   : > { %622 = vst.msk [vmem:[#allocation2] sm:$0x3] %vm621_vm3, %v620_v42 }
 0x118   : > { %627 = vst.msk [vmem:[%s900_s9] sm:$0x3] %vm621_vm3, %v620_v42 }
 0x119 PF: > { %s19_s30 = sadd.s32 1, %s754_s30  }
 0x11a   : > { %p16_p6 = scmp.ge.s32.totalorder %s19_s30, 10  }
 0x11c   :  { %18 = sbr.rel (!%p16_p6) target bundleno = 1 (0x1), region = 96 }

// kernel: edm_forward.34
= control target key start
LH: loop header
LB: loop body
LE: loop exit
PB: predicated region body
PF: predicated region fallthrough
CT: control target
= control target key end

     0   :  { %v184_v0 = vmov 0.0   ;;  %vm185_vm0 = vmmov 0   ;;  %s263_s1 = inlined_call_operand.vmem [shape: f32[128,128], index: 1, kind: input, shape index: {}]   ;;  %s264_s0 = inlined_call_operand.vmem [shape: f32[8,128], index: 0, kind: input, shape index: {}]   ;;  %s265_s2 = inlined_call_operand.vmem [shape: f32[1,128], index: 2, kind: input, shape index: {}]   ;;  %s266_s3 = inlined_call_operand.vmem [shape: f32[8,128], index: 3, kind: output, shape index: {}]  }
   0x1   :  { %145 = vmatprep.subr.mxu0 %v184_v0  ;;  %v36_v1 = vld [vmem:[%s263_s1 + $0x78] sm:$0xff]  ;;  %v35_v2 = vld [vmem:[%s263_s1 + $0x70] sm:$0xff]  ;;  %177 = vmatprep.mubr.msk.f32.mxu0 %vm185_vm0, %v184_v0  ;;  %v34_v3 = vld [vmem:[%s263_s1 + $0x68] sm:$0xff] }
   0x2   :  { %146 = vmatpush3.msra.mxu0 %v36_v1  ;;  %v33_v4 = vld [vmem:[%s263_s1 + $0x60] sm:$0xff]  ;;  %v32_v5 = vld [vmem:[%s263_s1 + $0x58] sm:$0xff]  ;;  %v31_v6 = vld [vmem:[%s263_s1 + $0x50] sm:$0xff] }
   0x3   :  { %147 = vmatprep.subr.mxu0 %v184_v0  ;;  %v30_v7 = vld [vmem:[%s263_s1 + $0x48] sm:$0xff]  ;;  %v29_v8 = vld [vmem:[%s263_s1 + $0x40] sm:$0xff]  ;;  %v28_v9 = vld [vmem:[%s263_s1 + $0x38] sm:$0xff] }
   0x4   :  { %148 = vmatpush3.msra.mxu0 %v35_v2  ;;  %v27_v10 = vld [vmem:[%s263_s1 + $0x30] sm:$0xff]  ;;  %v26_v11 = vld [vmem:[%s263_s1 + $0x28] sm:$0xff]  ;;  %v25_v12 = vld [vmem:[%s263_s1 + $0x20] sm:$0xff] }
   0x5   :  { %149 = vmatprep.subr.mxu0 %v184_v0  ;;  %v24_v13 = vld [vmem:[%s263_s1 + $0x18] sm:$0xff]  ;;  %v23_v14 = vld [vmem:[%s263_s1 + $0x10] sm:$0xff]  ;;  %v22_v15 = vld [vmem:[%s263_s1 + $0x8] sm:$0xff] }
   0x6   :  { %150 = vmatpush3.msra.mxu0 %v34_v3  ;;  %v21_v16 = vld [vmem:[%s263_s1] sm:$0xff] }
   0x7   :  { %151 = vmatprep.subr.mxu0 %v184_v0  ;;  %v20_v17 = vld [vmem:[%s264_s0] sm:$0xff] }
   0x8   :  { %152 = vmatpush3.msra.mxu0 %v33_v4  ;;  %v127_v18 = vld [vmem:[%s265_s2] ss:$0 sm:$0xff] }
   0x9   :  { %153 = vmatprep.subr.mxu0 %v184_v0 }
   0xa   :  { %154 = vmatpush3.msra.mxu0 %v32_v5 }
   0xb   :  { %155 = vmatprep.subr.mxu0 %v184_v0 }
   0xc   :  { %156 = vmatpush3.msra.mxu0 %v31_v6 }
   0xd   :  { %157 = vmatprep.subr.mxu0 %v184_v0 }
   0xe   :  { %158 = vmatpush3.msra.mxu0 %v30_v7 }
   0xf   :  { %159 = vmatprep.subr.mxu0 %v184_v0 }
  0x10   :  { %160 = vmatpush3.msra.mxu0 %v29_v8 }
  0x11   :  { %161 = vmatprep.subr.mxu0 %v184_v0 }
  0x12   :  { %162 = vmatpush3.msra.mxu0 %v28_v9 }
  0x13   :  { %163 = vmatprep.subr.mxu0 %v184_v0 }
  0x14   :  { %164 = vmatpush3.msra.mxu0 %v27_v10 }
  0x15   :  { %165 = vmatprep.subr.mxu0 %v184_v0 }
  0x16   :  { %166 = vmatpush3.msra.mxu0 %v26_v11 }
  0x17   :  { %167 = vmatprep.subr.mxu0 %v184_v0 }
  0x18   :  { %168 = vmatpush3.msra.mxu0 %v25_v12 }
  0x19   :  { %169 = vmatprep.subr.mxu0 %v184_v0 }
  0x1a   :  { %170 = vmatpush3.msra.mxu0 %v24_v13 }
  0x1b   :  { %171 = vmatprep.subr.mxu0 %v184_v0 }
  0x1c   :  { %172 = vmatpush3.msra.mxu0 %v23_v14 }
  0x1d   :  { %173 = vmatprep.subr.mxu0 %v184_v0 }
  0x1e   :  { %174 = vmatpush3.msra.mxu0 %v22_v15 }
  0x1f   :  { %175 = vmatprep.subr.mxu0 %v184_v0 }
  0x20   :  { %176 = vmatpush3.msra.mxu0 %v21_v16 }
  0x21   :  { %178 = vmatmul.mubr.f32.vlgmr.msra.gmra.mxu0 %v20_v17 }
  0xe1   :  { %v103_v19 = vpop.f32.mrf.mxu0 }
  0xe2   :  { %v120_v20 = vadd.f32 %v127_v18, %v103_v19 }
  0xe3   :  { %v179_v21 = vpop.f32.mrf.mxu0 }
  0xe4   :  { %182 = vtanh.f32 %v120_v20 }
  0xf1   :  { %v183_v22 = vpop.eup %182 }
  0xf2   :  { %122 = vst [vmem:[%s266_s3] sm:$0xff] %v183_v22 }

// kernel: edm_forward.36
= control target key start
LH: loop header
LB: loop body
LE: loop exit
PB: predicated region body
PF: predicated region fallthrough
CT: control target
= control target key end

     0   :  { %v181_v0 = vmov 0.0   ;;  %vm182_vm0 = vmmov 0   ;;  %s260_s1 = inlined_call_operand.vmem [shape: f32[128,128], index: 1, kind: input, shape index: {}]   ;;  %s261_s0 = inlined_call_operand.vmem [shape: f32[8,128], index: 0, kind: input, shape index: {}]   ;;  %s262_s2 = inlined_call_operand.vmem [shape: f32[1,128], index: 2, kind: input, shape index: {}]   ;;  %s263_s3 = inlined_call_operand.vmem [shape: f32[8,128], index: 3, kind: output, shape index: {}]  }
   0x1   :  { %144 = vmatprep.subr.mxu0 %v181_v0  ;;  %v36_v1 = vld [vmem:[%s260_s1 + $0x78] sm:$0xff]  ;;  %v35_v2 = vld [vmem:[%s260_s1 + $0x70] sm:$0xff]  ;;  %176 = vmatprep.mubr.msk.f32.mxu0 %vm182_vm0, %v181_v0  ;;  %v34_v3 = vld [vmem:[%s260_s1 + $0x68] sm:$0xff] }
   0x2   :  { %145 = vmatpush3.msra.mxu0 %v36_v1  ;;  %v33_v4 = vld [vmem:[%s260_s1 + $0x60] sm:$0xff]  ;;  %v32_v5 = vld [vmem:[%s260_s1 + $0x58] sm:$0xff]  ;;  %v31_v6 = vld [vmem:[%s260_s1 + $0x50] sm:$0xff] }
   0x3   :  { %146 = vmatprep.subr.mxu0 %v181_v0  ;;  %v30_v7 = vld [vmem:[%s260_s1 + $0x48] sm:$0xff]  ;;  %v29_v8 = vld [vmem:[%s260_s1 + $0x40] sm:$0xff]  ;;  %v28_v9 = vld [vmem:[%s260_s1 + $0x38] sm:$0xff] }
   0x4   :  { %147 = vmatpush3.msra.mxu0 %v35_v2  ;;  %v27_v10 = vld [vmem:[%s260_s1 + $0x30] sm:$0xff]  ;;  %v26_v11 = vld [vmem:[%s260_s1 + $0x28] sm:$0xff]  ;;  %v25_v12 = vld [vmem:[%s260_s1 + $0x20] sm:$0xff] }
   0x5   :  { %148 = vmatprep.subr.mxu0 %v181_v0  ;;  %v24_v13 = vld [vmem:[%s260_s1 + $0x18] sm:$0xff]  ;;  %v23_v14 = vld [vmem:[%s260_s1 + $0x10] sm:$0xff]  ;;  %v22_v15 = vld [vmem:[%s260_s1 + $0x8] sm:$0xff] }
   0x6   :  { %149 = vmatpush3.msra.mxu0 %v34_v3  ;;  %v21_v16 = vld [vmem:[%s260_s1] sm:$0xff] }
   0x7   :  { %150 = vmatprep.subr.mxu0 %v181_v0  ;;  %v20_v17 = vld [vmem:[%s261_s0] sm:$0xff] }
   0x8   :  { %151 = vmatpush3.msra.mxu0 %v33_v4  ;;  %v126_v18 = vld [vmem:[%s262_s2] ss:$0 sm:$0xff] }
   0x9   :  { %152 = vmatprep.subr.mxu0 %v181_v0 }
   0xa   :  { %153 = vmatpush3.msra.mxu0 %v32_v5 }
   0xb   :  { %154 = vmatprep.subr.mxu0 %v181_v0 }
   0xc   :  { %155 = vmatpush3.msra.mxu0 %v31_v6 }
   0xd   :  { %156 = vmatprep.subr.mxu0 %v181_v0 }
   0xe   :  { %157 = vmatpush3.msra.mxu0 %v30_v7 }
   0xf   :  { %158 = vmatprep.subr.mxu0 %v181_v0 }
  0x10   :  { %159 = vmatpush3.msra.mxu0 %v29_v8 }
  0x11   :  { %160 = vmatprep.subr.mxu0 %v181_v0 }
  0x12   :  { %161 = vmatpush3.msra.mxu0 %v28_v9 }
  0x13   :  { %162 = vmatprep.subr.mxu0 %v181_v0 }
  0x14   :  { %163 = vmatpush3.msra.mxu0 %v27_v10 }
  0x15   :  { %164 = vmatprep.subr.mxu0 %v181_v0 }
  0x16   :  { %165 = vmatpush3.msra.mxu0 %v26_v11 }
  0x17   :  { %166 = vmatprep.subr.mxu0 %v181_v0 }
  0x18   :  { %167 = vmatpush3.msra.mxu0 %v25_v12 }
  0x19   :  { %168 = vmatprep.subr.mxu0 %v181_v0 }
  0x1a   :  { %169 = vmatpush3.msra.mxu0 %v24_v13 }
  0x1b   :  { %170 = vmatprep.subr.mxu0 %v181_v0 }
  0x1c   :  { %171 = vmatpush3.msra.mxu0 %v23_v14 }
  0x1d   :  { %172 = vmatprep.subr.mxu0 %v181_v0 }
  0x1e   :  { %173 = vmatpush3.msra.mxu0 %v22_v15 }
  0x1f   :  { %174 = vmatprep.subr.mxu0 %v181_v0 }
  0x20   :  { %175 = vmatpush3.msra.mxu0 %v21_v16 }
  0x21   :  { %177 = vmatmul.mubr.f32.vlgmr.msra.gmra.mxu0 %v20_v17 }
  0xe1   :  { %v103_v19 = vpop.f32.mrf.mxu0 }
  0xe2   :  { %v120_v20 = vadd.f32 %v126_v18, %v103_v19 }
  0xe3   :  { %v178_v21 = vpop.f32.mrf.mxu0 }
  0xe4   :  { %121 = vst [vmem:[%s263_s3] sm:$0xff] %v120_v20 }

// kernel: edm_forward.35
= control target key start
LH: loop header
LB: loop body
LE: loop exit
PB: predicated region body
PF: predicated region fallthrough
CT: control target
= control target key end

     0   :  { %v181_v0 = vmov 0.0   ;;  %vm182_vm0 = vmmov 0   ;;  %s260_s1 = inlined_call_operand.vmem [shape: f32[128,128], index: 1, kind: input, shape index: {}]   ;;  %s261_s0 = inlined_call_operand.vmem [shape: f32[8,128], index: 0, kind: input, shape index: {}]   ;;  %s262_s2 = inlined_call_operand.vmem [shape: f32[1,128], index: 2, kind: input, shape index: {}]   ;;  %s263_s3 = inlined_call_operand.vmem [shape: f32[8,128], index: 3, kind: output, shape index: {}]  }
   0x1   :  { %144 = vmatprep.subr.mxu0 %v181_v0  ;;  %v36_v1 = vld [vmem:[%s260_s1 + $0x78] sm:$0xff]  ;;  %v35_v2 = vld [vmem:[%s260_s1 + $0x70] sm:$0xff]  ;;  %176 = vmatprep.mubr.msk.f32.mxu0 %vm182_vm0, %v181_v0  ;;  %v34_v3 = vld [vmem:[%s260_s1 + $0x68] sm:$0xff] }
   0x2   :  { %145 = vmatpush3.msra.mxu0 %v36_v1  ;;  %v33_v4 = vld [vmem:[%s260_s1 + $0x60] sm:$0xff]  ;;  %v32_v5 = vld [vmem:[%s260_s1 + $0x58] sm:$0xff]  ;;  %v31_v6 = vld [vmem:[%s260_s1 + $0x50] sm:$0xff] }
   0x3   :  { %146 = vmatprep.subr.mxu0 %v181_v0  ;;  %v30_v7 = vld [vmem:[%s260_s1 + $0x48] sm:$0xff]  ;;  %v29_v8 = vld [vmem:[%s260_s1 + $0x40] sm:$0xff]  ;;  %v28_v9 = vld [vmem:[%s260_s1 + $0x38] sm:$0xff] }
   0x4   :  { %147 = vmatpush3.msra.mxu0 %v35_v2  ;;  %v27_v10 = vld [vmem:[%s260_s1 + $0x30] sm:$0xff]  ;;  %v26_v11 = vld [vmem:[%s260_s1 + $0x28] sm:$0xff]  ;;  %v25_v12 = vld [vmem:[%s260_s1 + $0x20] sm:$0xff] }
   0x5   :  { %148 = vmatprep.subr.mxu0 %v181_v0  ;;  %v24_v13 = vld [vmem:[%s260_s1 + $0x18] sm:$0xff]  ;;  %v23_v14 = vld [vmem:[%s260_s1 + $0x10] sm:$0xff]  ;;  %v22_v15 = vld [vmem:[%s260_s1 + $0x8] sm:$0xff] }
   0x6   :  { %149 = vmatpush3.msra.mxu0 %v34_v3  ;;  %v21_v16 = vld [vmem:[%s260_s1] sm:$0xff] }
   0x7   :  { %150 = vmatprep.subr.mxu0 %v181_v0  ;;  %v20_v17 = vld [vmem:[%s261_s0] sm:$0xff] }
   0x8   :  { %151 = vmatpush3.msra.mxu0 %v33_v4  ;;  %v126_v18 = vld [vmem:[%s262_s2] ss:$0 sm:$0xff] }
   0x9   :  { %152 = vmatprep.subr.mxu0 %v181_v0 }
   0xa   :  { %153 = vmatpush3.msra.mxu0 %v32_v5 }
   0xb   :  { %154 = vmatprep.subr.mxu0 %v181_v0 }
   0xc   :  { %155 = vmatpush3.msra.mxu0 %v31_v6 }
   0xd   :  { %156 = vmatprep.subr.mxu0 %v181_v0 }
   0xe   :  { %157 = vmatpush3.msra.mxu0 %v30_v7 }
   0xf   :  { %158 = vmatprep.subr.mxu0 %v181_v0 }
  0x10   :  { %159 = vmatpush3.msra.mxu0 %v29_v8 }
  0x11   :  { %160 = vmatprep.subr.mxu0 %v181_v0 }
  0x12   :  { %161 = vmatpush3.msra.mxu0 %v28_v9 }
  0x13   :  { %162 = vmatprep.subr.mxu0 %v181_v0 }
  0x14   :  { %163 = vmatpush3.msra.mxu0 %v27_v10 }
  0x15   :  { %164 = vmatprep.subr.mxu0 %v181_v0 }
  0x16   :  { %165 = vmatpush3.msra.mxu0 %v26_v11 }
  0x17   :  { %166 = vmatprep.subr.mxu0 %v181_v0 }
  0x18   :  { %167 = vmatpush3.msra.mxu0 %v25_v12 }
  0x19   :  { %168 = vmatprep.subr.mxu0 %v181_v0 }
  0x1a   :  { %169 = vmatpush3.msra.mxu0 %v24_v13 }
  0x1b   :  { %170 = vmatprep.subr.mxu0 %v181_v0 }
  0x1c   :  { %171 = vmatpush3.msra.mxu0 %v23_v14 }
  0x1d   :  { %172 = vmatprep.subr.mxu0 %v181_v0 }
  0x1e   :  { %173 = vmatpush3.msra.mxu0 %v22_v15 }
  0x1f   :  { %174 = vmatprep.subr.mxu0 %v181_v0 }
  0x20   :  { %175 = vmatpush3.msra.mxu0 %v21_v16 }
  0x21   :  { %177 = vmatmul.mubr.f32.vlgmr.msra.gmra.mxu0 %v20_v17 }
  0xe1   :  { %v103_v19 = vpop.f32.mrf.mxu0 }
  0xe2   :  { %v120_v20 = vadd.f32 %v126_v18, %v103_v19 }
  0xe3   :  { %v178_v21 = vpop.f32.mrf.mxu0 }
  0xe4   :  { %121 = vst [vmem:[%s263_s3] sm:$0xff] %v120_v20 }

</bundles_post_ra>
